<compile_context>
chip_gen: v7x
topology: tpu7x:2x2x1
jax: 0.10.0
libtpu: 0.0.40
codegen_flags: <defaults>
</compile_context>

<pallas_src>
import functools

import jax
import jax.numpy as jnp
from jax import lax
from jax.experimental import pallas as pl
from jax.experimental.pallas import tpu as pltpu

LANES = 128
SUBLANES = 8
BIG_NEG = 1e9


def _round_up(v, m):
    return max(m, ((v + m - 1) // m) * m)


# ----------------------------------------------------------- fused kernel ---
def _fused_rgnn_kernel(num_layers, num_relations, num_graphs, num_graphs_pad,
                       hidden_dim,
                       x_ref, a_ref, mask_ref,
                       in_w_ref, in_b_ref,
                       w_ref, b_ref, gamma_ref, beta_ref,
                       cw1_ref, cb1_ref, cw2_ref, cb2_ref,
                       out_ref):
    D = hidden_dim

    # ---- input projection (bf16 operands, f32 accumulation) ----------------
    h = jnp.dot(x_ref[...], in_w_ref[...],
                preferred_element_type=jnp.float32) + in_b_ref[...]

    # ---- RGCN layers (statically unrolled; num_layers is small) ------------
    for l in range(num_layers):
        h_bf = h.astype(jnp.bfloat16)
        # one wide matmul: [Npad, D] @ [D, (R+1)*D] = [root | msg_0 | ... | msg_{R-1}]
        m = jnp.dot(h_bf, w_ref[l], preferred_element_type=jnp.float32)
        acc = m[:, :D] + b_ref[l]                    # root transform + bias
        msgs = m[:, D:].astype(jnp.bfloat16)         # cast message slab ONCE
        for r in range(num_relations):               # mean-normalized aggregation
            acc = acc + jnp.dot(a_ref[r], msgs[:, r * D:(r + 1) * D],
                                preferred_element_type=jnp.float32)
        acc = acc + h                                # residual (shapes always match)
        acc = jnp.maximum(acc, 0.0)                  # ReLU
        # two-pass LayerNorm (mean-subtracted variance, eps = 1e-5, affine)
        inv_d = 1.0 / D
        mean = jnp.sum(acc, axis=-1, keepdims=True) * inv_d
        centered = acc - mean
        var = jnp.sum(centered * centered, axis=-1, keepdims=True) * inv_d
        h = centered * lax.rsqrt(var + 1e-5) * gamma_ref[l] + beta_ref[l]
        # TODO(synk): dropout omitted -- inference semantics (identity when training=False)

    # ---- global max pool: per-graph masked select + sublane max-reduce -----
    rows = []
    for g in range(num_graphs):
        col = mask_ref[:, g:g + 1]                               # [n_pad, 1]
        masked = jnp.where(col > 0.0, h, -BIG_NEG)               # VPU select
        pooled_g = jnp.max(masked, axis=0, keepdims=True)        # [1, D] XLU reduce
        # empty-graph guard: clamp all-masked rows to 0 instead of -1e9
        rows.append(jnp.where(pooled_g > -0.5 * BIG_NEG, pooled_g, 0.0))
    if num_graphs_pad > num_graphs:
        rows.append(jnp.zeros((num_graphs_pad - num_graphs, D), jnp.float32))
    pooled = jnp.concatenate(rows, axis=0)                       # [G_pad, D]

    # ---- classifier MLP -----------------------------------------------------
    z = jnp.dot(pooled.astype(jnp.bfloat16), cw1_ref[...],
                preferred_element_type=jnp.float32) + cb1_ref[...]
    z = jnp.maximum(z, 0.0)
    # TODO(synk): classifier dropout omitted (inference mode)
    out_ref[...] = jnp.dot(z.astype(jnp.bfloat16), cw2_ref[...],
                           preferred_element_type=jnp.float32) + cb2_ref[...]


# ------------------------------------------------------------- parameters ---
def init_params(key, input_dim, hidden_dim, output_dim, num_layers, num_relations):
    keys = jax.random.split(key, 3 + num_layers)

    def lin(k, din, dout):
        kw, kb = jax.random.split(k)
        scale = 1.0 / jnp.sqrt(din)
        w = jax.random.uniform(kw, (din, dout), jnp.float32, -scale, scale)
        b = jax.random.uniform(kb, (1, dout), jnp.float32, -scale, scale)
        return w, b

    params = {}
    params["in_w"], params["in_b"] = lin(keys[0], input_dim, hidden_dim)
    layers = []
    for i in range(num_layers):
        k1, k2, k3 = jax.random.split(keys[1 + i], 3)
        scale = 1.0 / jnp.sqrt(hidden_dim)
        layers.append(dict(
            w_rel=jax.random.uniform(
                k1, (num_relations, hidden_dim, hidden_dim), jnp.float32, -scale, scale),
            w_root=jax.random.uniform(
                k2, (hidden_dim, hidden_dim), jnp.float32, -scale, scale),
            b=jax.random.uniform(k3, (1, hidden_dim), jnp.float32, -scale, scale),
            gamma=jnp.ones((1, hidden_dim), jnp.float32),
            beta=jnp.zeros((1, hidden_dim), jnp.float32),
        ))
    params["layers"] = layers
    params["cls_w1"], params["cls_b1"] = lin(keys[1 + num_layers], hidden_dim, hidden_dim)
    params["cls_w2"], params["cls_b2"] = lin(keys[2 + num_layers], hidden_dim, output_dim)
    return params


def _derive_vmem_limit():
    """Device-derived VMEM limit with headroom; safe fallback if query fails."""
    try:
        info = pltpu.get_tpu_info()
        cap = getattr(info, "vmem_capacity_bytes", None)
        if cap:
            return int(min(cap * 3 // 4, 100 * 1024 * 1024))
    except Exception:
        pass
    return 64 * 1024 * 1024


# ----------------------------------------------------------------- forward --
def rgnn_forward(params, x, edge_index, edge_type, batch, num_relations, num_graphs):
    n, input_dim = x.shape
    hidden_dim = params["in_w"].shape[1]
    output_dim = params["cls_w2"].shape[1]
    num_layers = len(params["layers"])

    # Lane/sublane padding for MXU-friendly, unmasked loads/stores.
    n_pad = _round_up(n, LANES)
    in_dim_pad = _round_up(input_dim, LANES)
    g_pad = _round_up(num_graphs, SUBLANES)
    out_pad = _round_up(output_dim, LANES)

    # Dense relational adjacency with PyG RGCNConv 'mean' aggregation:
    # A[r, i, j] = 1/deg_r(i) for each edge j->i of relation r.
    # (bf16 cast of 1/deg loses ~3 decimal digits vs PyTorch's f32 mean; acceptable drift.)
    A = jnp.zeros((num_relations, n_pad, n_pad), jnp.float32)
    A = A.at[edge_type, edge_index[1], edge_index[0]].add(1.0)
    deg = A.sum(axis=2, keepdims=True)
    A = jnp.where(deg > 0, A / deg, 0.0).astype(jnp.bfloat16)

    # Graph-membership mask, TRANSPOSED to [n_pad, G_pad] so a graph's column
    # broadcasts over lanes inside the kernel without a relayout.
    batch_pad = jnp.concatenate([batch, -jnp.ones((n_pad - n,), batch.dtype)])
    mask_t = (batch_pad[:, None] == jnp.arange(g_pad)[None, :]).astype(jnp.float32)

    # Zero-pad node features to [n_pad, in_dim_pad]; bf16 MXU operands.
    x_pad = jnp.zeros((n_pad, in_dim_pad), jnp.float32).at[:n, :input_dim].set(x)
    x_pad = x_pad.astype(jnp.bfloat16)
    in_w = jnp.zeros((in_dim_pad, hidden_dim), jnp.float32).at[:input_dim].set(
        params["in_w"]).astype(jnp.bfloat16)
    in_b = params["in_b"]

    # Per layer: concat([W_root, W_r0, ..., W_r{R-1}], axis=1) -> [D, (R+1)*D]
    w_layers = jnp.stack([
        jnp.concatenate([lp["w_root"]] + [lp["w_rel"][r] for r in range(num_relations)],
                        axis=1)
        for lp in params["layers"]], axis=0).astype(jnp.bfloat16)
    b_layers = jnp.stack([lp["b"] for lp in params["layers"]], axis=0)        # [L, 1, D]
    g_layers = jnp.stack([lp["gamma"] for lp in params["layers"]], axis=0)    # [L, 1, D]
    beta_layers = jnp.stack([lp["beta"] for lp in params["layers"]], axis=0)  # [L, 1, D]

    cw1 = params["cls_w1"].astype(jnp.bfloat16)
    cb1 = params["cls_b1"]
    # Lane-dense classifier output: pad output_dim up to a full 128-lane slab.
    cw2 = jnp.zeros((hidden_dim, out_pad), jnp.float32).at[:, :output_dim].set(
        params["cls_w2"]).astype(jnp.bfloat16)
    cb2 = jnp.zeros((1, out_pad), jnp.float32).at[:, :output_dim].set(params["cls_b2"])

    inputs = (x_pad, A, mask_t, in_w, in_b,
              w_layers, b_layers, g_layers, beta_layers,
              cw1, cb1, cw2, cb2)

    # Cost hint so XLA schedules the scatter-add / mask build around this call.
    flops = (2 * n_pad * in_dim_pad * hidden_dim
             + num_layers * (2 * n_pad * hidden_dim * (num_relations + 1) * hidden_dim
                             + num_relations * 2 * n_pad * n_pad * hidden_dim)
             + 2 * g_pad * hidden_dim * hidden_dim
             + 2 * g_pad * hidden_dim * out_pad)
    bytes_accessed = (sum(int(a.size) * a.dtype.itemsize for a in inputs)
                      + g_pad * out_pad * 4)
    cost = pl.CostEstimate(flops=int(flops),
                           transcendentals=int(num_layers * n_pad),
                           bytes_accessed=int(bytes_accessed))

    kernel = functools.partial(_fused_rgnn_kernel, num_layers, num_relations,
                               num_graphs, g_pad, hidden_dim)
    vmem_specs = [pl.BlockSpec(memory_space=pltpu.MemorySpace.VMEM)
                  for _ in range(len(inputs))]
    logits_pad = pl.pallas_call(
        kernel,
        out_shape=jax.ShapeDtypeStruct((g_pad, out_pad), jnp.float32),
        in_specs=vmem_specs,
        out_specs=pl.BlockSpec(memory_space=pltpu.MemorySpace.VMEM),
        compiler_params=pltpu.CompilerParams(vmem_limit_bytes=_derive_vmem_limit()),
        cost_estimate=cost,
    )(*inputs)
    return logits_pad[:num_graphs, :output_dim]


# --------------------------------------------------------------------- main -
if __name__ == "__main__":
    INPUT_DIM, HIDDEN_DIM, OUTPUT_DIM = 64, 128, 4
    NUM_LAYERS, NUM_RELATIONS, NUM_GRAPHS = 3, 3, 2
    NUM_NODES, NUM_EDGES = 16, 40

    key = jax.random.PRNGKey(0)
    k_param, k_x, k_src, k_dst, k_rel = jax.random.split(key, 5)

    params = init_params(k_param, INPUT_DIM, HIDDEN_DIM, OUTPUT_DIM,
                         NUM_LAYERS, NUM_RELATIONS)

    x = jax.random.normal(k_x, (NUM_NODES, INPUT_DIM), jnp.float32)
    # Two graphs of 8 nodes each; edges stay within their own graph.
    half_e = NUM_EDGES // 2
    src0 = jax.random.randint(k_src, (half_e,), 0, 8)
    dst0 = jax.random.randint(k_dst, (half_e,), 0, 8)
    src1 = jax.random.randint(jax.random.fold_in(k_src, 1), (half_e,), 8, 16)
    dst1 = jax.random.randint(jax.random.fold_in(k_dst, 1), (half_e,), 8, 16)
    edge_index = jnp.stack([jnp.concatenate([src0, src1]),
                            jnp.concatenate([dst0, dst1])], axis=0).astype(jnp.int32)
    edge_type = jax.random.randint(k_rel, (NUM_EDGES,), 0, NUM_RELATIONS).astype(jnp.int32)
    batch = jnp.concatenate([jnp.zeros((8,), jnp.int32),
                             jnp.ones((8,), jnp.int32)])

    logits = rgnn_forward(params, x, edge_index, edge_type, batch,
                          NUM_RELATIONS, NUM_GRAPHS)
    jax.block_until_ready(logits)
    assert logits.shape == (NUM_GRAPHS, OUTPUT_DIM)
    assert bool(jnp.all(jnp.isfinite(logits)))
    print("KERNEL_OK")
</pallas_src>

<mosaic_0001>
module attributes {stable_mosaic.version = 11 : i64} {
  func.func @_fused_rgnn_kernel(%arg0: memref<128x128xbf16, #tpu.memory_space<vmem>>, %arg1: memref<3x128x128xbf16, #tpu.memory_space<vmem>>, %arg2: memref<128x8xf32, #tpu.memory_space<vmem>>, %arg3: memref<128x128xbf16, #tpu.memory_space<vmem>>, %arg4: memref<1x128xf32, #tpu.memory_space<vmem>>, %arg5: memref<3x128x512xbf16, #tpu.memory_space<vmem>>, %arg6: memref<3x1x128xf32, #tpu.memory_space<vmem>>, %arg7: memref<3x1x128xf32, #tpu.memory_space<vmem>>, %arg8: memref<3x1x128xf32, #tpu.memory_space<vmem>>, %arg9: memref<128x128xbf16, #tpu.memory_space<vmem>>, %arg10: memref<1x128xf32, #tpu.memory_space<vmem>>, %arg11: memref<128x128xbf16, #tpu.memory_space<vmem>>, %arg12: memref<1x128xf32, #tpu.memory_space<vmem>>, %arg13: memref<8x128xf32, #tpu.memory_space<vmem>>) attributes {dimension_semantics = [], scalar_prefetch = 0 : i64, scratch_operands = 0 : i64, tpu.core_type = #tpu.core_type<tc>} {
    %c0 = arith.constant 0 : index
    %c0_0 = arith.constant 0 : index
    %0 = vector.load %arg0[%c0, %c0_0] : memref<128x128xbf16, #tpu.memory_space<vmem>>, vector<128x128xbf16>
    %c0_1 = arith.constant 0 : index
    %c0_2 = arith.constant 0 : index
    %1 = vector.load %arg3[%c0_1, %c0_2] : memref<128x128xbf16, #tpu.memory_space<vmem>>, vector<128x128xbf16>
    %cst = arith.constant dense<0.000000e+00> : vector<128x128xf32>
    %2 = tpu.matmul %0, %1, %cst {dimension_numbers = #tpu.dot_dimension_numbers<[1], [0], [0], [1], [0, 0, 1, 1], [], []>} : vector<128x128xbf16>, vector<128x128xbf16>, vector<128x128xf32> -> vector<128x128xf32>
    %c0_3 = arith.constant 0 : index
    %c0_4 = arith.constant 0 : index
    %3 = vector.load %arg4[%c0_3, %c0_4] : memref<1x128xf32, #tpu.memory_space<vmem>>, vector<1x128xf32>
    %4 = vector.broadcast %3 : vector<1x128xf32> to vector<128x128xf32>
    %5 = arith.addf %2, %4 : vector<128x128xf32>
    %6 = arith.truncf %5 : vector<128x128xf32> to vector<128x128xbf16>
    %c0_5 = arith.constant 0 : index
    %c0_6 = arith.constant 0 : index
    %c0_7 = arith.constant 0 : index
    %7 = vector.load %arg5[%c0_5, %c0_6, %c0_7] : memref<3x128x512xbf16, #tpu.memory_space<vmem>>, vector<1x128x512xbf16>
    %8 = vector.shape_cast %7 : vector<1x128x512xbf16> to vector<128x512xbf16>
    %cst_8 = arith.constant dense<0.000000e+00> : vector<128x512xf32>
    %9 = tpu.matmul %6, %8, %cst_8 {dimension_numbers = #tpu.dot_dimension_numbers<[1], [0], [0], [1], [0, 0, 1, 1], [], []>} : vector<128x128xbf16>, vector<128x512xbf16>, vector<128x512xf32> -> vector<128x512xf32>
    %10 = vector.extract_strided_slice %9 {offsets = [0, 0], sizes = [128, 128], strides = [1, 1]} : vector<128x512xf32> to vector<128x128xf32>
    %c0_9 = arith.constant 0 : index
    %c0_10 = arith.constant 0 : index
    %c0_11 = arith.constant 0 : index
    %11 = vector.load %arg6[%c0_9, %c0_10, %c0_11] : memref<3x1x128xf32, #tpu.memory_space<vmem>>, vector<1x1x128xf32>
    %12 = vector.shape_cast %11 : vector<1x1x128xf32> to vector<1x128xf32>
    %13 = vector.broadcast %12 : vector<1x128xf32> to vector<128x128xf32>
    %14 = arith.addf %10, %13 : vector<128x128xf32>
    %15 = vector.extract_strided_slice %9 {offsets = [0, 128], sizes = [128, 384], strides = [1, 1]} : vector<128x512xf32> to vector<128x384xf32>
    %16 = arith.truncf %15 : vector<128x384xf32> to vector<128x384xbf16>
    %c0_12 = arith.constant 0 : index
    %c0_13 = arith.constant 0 : index
    %c0_14 = arith.constant 0 : index
    %17 = vector.load %arg1[%c0_12, %c0_13, %c0_14] : memref<3x128x128xbf16, #tpu.memory_space<vmem>>, vector<1x128x128xbf16>
    %18 = vector.shape_cast %17 : vector<1x128x128xbf16> to vector<128x128xbf16>
    %19 = vector.extract_strided_slice %16 {offsets = [0, 0], sizes = [128, 128], strides = [1, 1]} : vector<128x384xbf16> to vector<128x128xbf16>
    %cst_15 = arith.constant dense<0.000000e+00> : vector<128x128xf32>
    %20 = tpu.matmul %18, %19, %cst_15 {dimension_numbers = #tpu.dot_dimension_numbers<[1], [0], [0], [1], [0, 0, 1, 1], [], []>} : vector<128x128xbf16>, vector<128x128xbf16>, vector<128x128xf32> -> vector<128x128xf32>
    %21 = arith.addf %14, %20 : vector<128x128xf32>
    %c1 = arith.constant 1 : index
    %c0_16 = arith.constant 0 : index
    %c0_17 = arith.constant 0 : index
    %22 = vector.load %arg1[%c1, %c0_16, %c0_17] : memref<3x128x128xbf16, #tpu.memory_space<vmem>>, vector<1x128x128xbf16>
    %23 = vector.shape_cast %22 : vector<1x128x128xbf16> to vector<128x128xbf16>
    %24 = vector.extract_strided_slice %16 {offsets = [0, 128], sizes = [128, 128], strides = [1, 1]} : vector<128x384xbf16> to vector<128x128xbf16>
    %cst_18 = arith.constant dense<0.000000e+00> : vector<128x128xf32>
    %25 = tpu.matmul %23, %24, %cst_18 {dimension_numbers = #tpu.dot_dimension_numbers<[1], [0], [0], [1], [0, 0, 1, 1], [], []>} : vector<128x128xbf16>, vector<128x128xbf16>, vector<128x128xf32> -> vector<128x128xf32>
    %26 = arith.addf %21, %25 : vector<128x128xf32>
    %c2 = arith.constant 2 : index
    %c0_19 = arith.constant 0 : index
    %c0_20 = arith.constant 0 : index
    %27 = vector.load %arg1[%c2, %c0_19, %c0_20] : memref<3x128x128xbf16, #tpu.memory_space<vmem>>, vector<1x128x128xbf16>
    %28 = vector.shape_cast %27 : vector<1x128x128xbf16> to vector<128x128xbf16>
    %29 = vector.extract_strided_slice %16 {offsets = [0, 256], sizes = [128, 128], strides = [1, 1]} : vector<128x384xbf16> to vector<128x128xbf16>
    %cst_21 = arith.constant dense<0.000000e+00> : vector<128x128xf32>
    %30 = tpu.matmul %28, %29, %cst_21 {dimension_numbers = #tpu.dot_dimension_numbers<[1], [0], [0], [1], [0, 0, 1, 1], [], []>} : vector<128x128xbf16>, vector<128x128xbf16>, vector<128x128xf32> -> vector<128x128xf32>
    %31 = arith.addf %26, %30 : vector<128x128xf32>
    %32 = arith.addf %31, %5 : vector<128x128xf32>
    %cst_22 = arith.constant 0.000000e+00 : f32
    %33 = vector.broadcast %cst_22 : f32 to vector<128x128xf32>
    %34 = arith.maximumf %32, %33 : vector<128x128xf32>
    %cst_23 = arith.constant dense<0.000000e+00> : vector<128xf32>
    %35 = vector.multi_reduction <add>, %34, %cst_23 [1] : vector<128x128xf32> to vector<128xf32>
    %36 = vector.shape_cast %35 : vector<128xf32> to vector<128x1xf32>
    %cst_24 = arith.constant 7.812500e-03 : f32
    %37 = vector.broadcast %cst_24 : f32 to vector<128x1xf32>
    %38 = arith.mulf %36, %37 : vector<128x1xf32>
    %39 = vector.broadcast %38 : vector<128x1xf32> to vector<128x128xf32>
    %40 = arith.subf %34, %39 : vector<128x128xf32>
    %41 = arith.mulf %40, %40 : vector<128x128xf32>
    %cst_25 = arith.constant dense<0.000000e+00> : vector<128xf32>
    %42 = vector.multi_reduction <add>, %41, %cst_25 [1] : vector<128x128xf32> to vector<128xf32>
    %43 = vector.shape_cast %42 : vector<128xf32> to vector<128x1xf32>
    %cst_26 = arith.constant 7.812500e-03 : f32
    %44 = vector.broadcast %cst_26 : f32 to vector<128x1xf32>
    %45 = arith.mulf %43, %44 : vector<128x1xf32>
    %cst_27 = arith.constant 9.99999974E-6 : f32
    %46 = vector.broadcast %cst_27 : f32 to vector<128x1xf32>
    %47 = arith.addf %45, %46 : vector<128x1xf32>
    %48 = math.rsqrt %47 : vector<128x1xf32>
    %49 = vector.broadcast %48 : vector<128x1xf32> to vector<128x128xf32>
    %50 = arith.mulf %40, %49 : vector<128x128xf32>
    %c0_28 = arith.constant 0 : index
    %c0_29 = arith.constant 0 : index
    %c0_30 = arith.constant 0 : index
    %51 = vector.load %arg7[%c0_28, %c0_29, %c0_30] : memref<3x1x128xf32, #tpu.memory_space<vmem>>, vector<1x1x128xf32>
    %52 = vector.shape_cast %51 : vector<1x1x128xf32> to vector<1x128xf32>
    %53 = vector.broadcast %52 : vector<1x128xf32> to vector<128x128xf32>
    %54 = arith.mulf %50, %53 : vector<128x128xf32>
    %c0_31 = arith.constant 0 : index
    %c0_32 = arith.constant 0 : index
    %c0_33 = arith.constant 0 : index
    %55 = vector.load %arg8[%c0_31, %c0_32, %c0_33] : memref<3x1x128xf32, #tpu.memory_space<vmem>>, vector<1x1x128xf32>
    %56 = vector.shape_cast %55 : vector<1x1x128xf32> to vector<1x128xf32>
    %57 = vector.broadcast %56 : vector<1x128xf32> to vector<128x128xf32>
    %58 = arith.addf %54, %57 : vector<128x128xf32>
    %59 = arith.truncf %58 : vector<128x128xf32> to vector<128x128xbf16>
    %c1_34 = arith.constant 1 : index
    %c0_35 = arith.constant 0 : index
    %c0_36 = arith.constant 0 : index
    %60 = vector.load %arg5[%c1_34, %c0_35, %c0_36] : memref<3x128x512xbf16, #tpu.memory_space<vmem>>, vector<1x128x512xbf16>
    %61 = vector.shape_cast %60 : vector<1x128x512xbf16> to vector<128x512xbf16>
    %cst_37 = arith.constant dense<0.000000e+00> : vector<128x512xf32>
    %62 = tpu.matmul %59, %61, %cst_37 {dimension_numbers = #tpu.dot_dimension_numbers<[1], [0], [0], [1], [0, 0, 1, 1], [], []>} : vector<128x128xbf16>, vector<128x512xbf16>, vector<128x512xf32> -> vector<128x512xf32>
    %63 = vector.extract_strided_slice %62 {offsets = [0, 0], sizes = [128, 128], strides = [1, 1]} : vector<128x512xf32> to vector<128x128xf32>
    %c1_38 = arith.constant 1 : index
    %c0_39 = arith.constant 0 : index
    %c0_40 = arith.constant 0 : index
    %64 = vector.load %arg6[%c1_38, %c0_39, %c0_40] : memref<3x1x128xf32, #tpu.memory_space<vmem>>, vector<1x1x128xf32>
    %65 = vector.shape_cast %64 : vector<1x1x128xf32> to vector<1x128xf32>
    %66 = vector.broadcast %65 : vector<1x128xf32> to vector<128x128xf32>
    %67 = arith.addf %63, %66 : vector<128x128xf32>
    %68 = vector.extract_strided_slice %62 {offsets = [0, 128], sizes = [128, 384], strides = [1, 1]} : vector<128x512xf32> to vector<128x384xf32>
    %69 = arith.truncf %68 : vector<128x384xf32> to vector<128x384xbf16>
    %c0_41 = arith.constant 0 : index
    %c0_42 = arith.constant 0 : index
    %c0_43 = arith.constant 0 : index
    %70 = vector.load %arg1[%c0_41, %c0_42, %c0_43] : memref<3x128x128xbf16, #tpu.memory_space<vmem>>, vector<1x128x128xbf16>
    %71 = vector.shape_cast %70 : vector<1x128x128xbf16> to vector<128x128xbf16>
    %72 = vector.extract_strided_slice %69 {offsets = [0, 0], sizes = [128, 128], strides = [1, 1]} : vector<128x384xbf16> to vector<128x128xbf16>
    %cst_44 = arith.constant dense<0.000000e+00> : vector<128x128xf32>
    %73 = tpu.matmul %71, %72, %cst_44 {dimension_numbers = #tpu.dot_dimension_numbers<[1], [0], [0], [1], [0, 0, 1, 1], [], []>} : vector<128x128xbf16>, vector<128x128xbf16>, vector<128x128xf32> -> vector<128x128xf32>
    %74 = arith.addf %67, %73 : vector<128x128xf32>
    %c1_45 = arith.constant 1 : index
    %c0_46 = arith.constant 0 : index
    %c0_47 = arith.constant 0 : index
    %75 = vector.load %arg1[%c1_45, %c0_46, %c0_47] : memref<3x128x128xbf16, #tpu.memory_space<vmem>>, vector<1x128x128xbf16>
    %76 = vector.shape_cast %75 : vector<1x128x128xbf16> to vector<128x128xbf16>
    %77 = vector.extract_strided_slice %69 {offsets = [0, 128], sizes = [128, 128], strides = [1, 1]} : vector<128x384xbf16> to vector<128x128xbf16>
    %cst_48 = arith.constant dense<0.000000e+00> : vector<128x128xf32>
    %78 = tpu.matmul %76, %77, %cst_48 {dimension_numbers = #tpu.dot_dimension_numbers<[1], [0], [0], [1], [0, 0, 1, 1], [], []>} : vector<128x128xbf16>, vector<128x128xbf16>, vector<128x128xf32> -> vector<128x128xf32>
    %79 = arith.addf %74, %78 : vector<128x128xf32>
    %c2_49 = arith.constant 2 : index
    %c0_50 = arith.constant 0 : index
    %c0_51 = arith.constant 0 : index
    %80 = vector.load %arg1[%c2_49, %c0_50, %c0_51] : memref<3x128x128xbf16, #tpu.memory_space<vmem>>, vector<1x128x128xbf16>
    %81 = vector.shape_cast %80 : vector<1x128x128xbf16> to vector<128x128xbf16>
    %82 = vector.extract_strided_slice %69 {offsets = [0, 256], sizes = [128, 128], strides = [1, 1]} : vector<128x384xbf16> to vector<128x128xbf16>
    %cst_52 = arith.constant dense<0.000000e+00> : vector<128x128xf32>
    %83 = tpu.matmul %81, %82, %cst_52 {dimension_numbers = #tpu.dot_dimension_numbers<[1], [0], [0], [1], [0, 0, 1, 1], [], []>} : vector<128x128xbf16>, vector<128x128xbf16>, vector<128x128xf32> -> vector<128x128xf32>
    %84 = arith.addf %79, %83 : vector<128x128xf32>
    %85 = arith.addf %84, %58 : vector<128x128xf32>
    %cst_53 = arith.constant 0.000000e+00 : f32
    %86 = vector.broadcast %cst_53 : f32 to vector<128x128xf32>
    %87 = arith.maximumf %85, %86 : vector<128x128xf32>
    %cst_54 = arith.constant dense<0.000000e+00> : vector<128xf32>
    %88 = vector.multi_reduction <add>, %87, %cst_54 [1] : vector<128x128xf32> to vector<128xf32>
    %89 = vector.shape_cast %88 : vector<128xf32> to vector<128x1xf32>
    %cst_55 = arith.constant 7.812500e-03 : f32
    %90 = vector.broadcast %cst_55 : f32 to vector<128x1xf32>
    %91 = arith.mulf %89, %90 : vector<128x1xf32>
    %92 = vector.broadcast %91 : vector<128x1xf32> to vector<128x128xf32>
    %93 = arith.subf %87, %92 : vector<128x128xf32>
    %94 = arith.mulf %93, %93 : vector<128x128xf32>
    %cst_56 = arith.constant dense<0.000000e+00> : vector<128xf32>
    %95 = vector.multi_reduction <add>, %94, %cst_56 [1] : vector<128x128xf32> to vector<128xf32>
    %96 = vector.shape_cast %95 : vector<128xf32> to vector<128x1xf32>
    %cst_57 = arith.constant 7.812500e-03 : f32
    %97 = vector.broadcast %cst_57 : f32 to vector<128x1xf32>
    %98 = arith.mulf %96, %97 : vector<128x1xf32>
    %cst_58 = arith.constant 9.99999974E-6 : f32
    %99 = vector.broadcast %cst_58 : f32 to vector<128x1xf32>
    %100 = arith.addf %98, %99 : vector<128x1xf32>
    %101 = math.rsqrt %100 : vector<128x1xf32>
    %102 = vector.broadcast %101 : vector<128x1xf32> to vector<128x128xf32>
    %103 = arith.mulf %93, %102 : vector<128x128xf32>
    %c1_59 = arith.constant 1 : index
    %c0_60 = arith.constant 0 : index
    %c0_61 = arith.constant 0 : index
    %104 = vector.load %arg7[%c1_59, %c0_60, %c0_61] : memref<3x1x128xf32, #tpu.memory_space<vmem>>, vector<1x1x128xf32>
    %105 = vector.shape_cast %104 : vector<1x1x128xf32> to vector<1x128xf32>
    %106 = vector.broadcast %105 : vector<1x128xf32> to vector<128x128xf32>
    %107 = arith.mulf %103, %106 : vector<128x128xf32>
    %c1_62 = arith.constant 1 : index
    %c0_63 = arith.constant 0 : index
    %c0_64 = arith.constant 0 : index
    %108 = vector.load %arg8[%c1_62, %c0_63, %c0_64] : memref<3x1x128xf32, #tpu.memory_space<vmem>>, vector<1x1x128xf32>
    %109 = vector.shape_cast %108 : vector<1x1x128xf32> to vector<1x128xf32>
    %110 = vector.broadcast %109 : vector<1x128xf32> to vector<128x128xf32>
    %111 = arith.addf %107, %110 : vector<128x128xf32>
    %112 = arith.truncf %111 : vector<128x128xf32> to vector<128x128xbf16>
    %c2_65 = arith.constant 2 : index
    %c0_66 = arith.constant 0 : index
    %c0_67 = arith.constant 0 : index
    %113 = vector.load %arg5[%c2_65, %c0_66, %c0_67] : memref<3x128x512xbf16, #tpu.memory_space<vmem>>, vector<1x128x512xbf16>
    %114 = vector.shape_cast %113 : vector<1x128x512xbf16> to vector<128x512xbf16>
    %cst_68 = arith.constant dense<0.000000e+00> : vector<128x512xf32>
    %115 = tpu.matmul %112, %114, %cst_68 {dimension_numbers = #tpu.dot_dimension_numbers<[1], [0], [0], [1], [0, 0, 1, 1], [], []>} : vector<128x128xbf16>, vector<128x512xbf16>, vector<128x512xf32> -> vector<128x512xf32>
    %116 = vector.extract_strided_slice %115 {offsets = [0, 0], sizes = [128, 128], strides = [1, 1]} : vector<128x512xf32> to vector<128x128xf32>
    %c2_69 = arith.constant 2 : index
    %c0_70 = arith.constant 0 : index
    %c0_71 = arith.constant 0 : index
    %117 = vector.load %arg6[%c2_69, %c0_70, %c0_71] : memref<3x1x128xf32, #tpu.memory_space<vmem>>, vector<1x1x128xf32>
    %118 = vector.shape_cast %117 : vector<1x1x128xf32> to vector<1x128xf32>
    %119 = vector.broadcast %118 : vector<1x128xf32> to vector<128x128xf32>
    %120 = arith.addf %116, %119 : vector<128x128xf32>
    %121 = vector.extract_strided_slice %115 {offsets = [0, 128], sizes = [128, 384], strides = [1, 1]} : vector<128x512xf32> to vector<128x384xf32>
    %122 = arith.truncf %121 : vector<128x384xf32> to vector<128x384xbf16>
    %c0_72 = arith.constant 0 : index
    %c0_73 = arith.constant 0 : index
    %c0_74 = arith.constant 0 : index
    %123 = vector.load %arg1[%c0_72, %c0_73, %c0_74] : memref<3x128x128xbf16, #tpu.memory_space<vmem>>, vector<1x128x128xbf16>
    %124 = vector.shape_cast %123 : vector<1x128x128xbf16> to vector<128x128xbf16>
    %125 = vector.extract_strided_slice %122 {offsets = [0, 0], sizes = [128, 128], strides = [1, 1]} : vector<128x384xbf16> to vector<128x128xbf16>
    %cst_75 = arith.constant dense<0.000000e+00> : vector<128x128xf32>
    %126 = tpu.matmul %124, %125, %cst_75 {dimension_numbers = #tpu.dot_dimension_numbers<[1], [0], [0], [1], [0, 0, 1, 1], [], []>} : vector<128x128xbf16>, vector<128x128xbf16>, vector<128x128xf32> -> vector<128x128xf32>
    %127 = arith.addf %120, %126 : vector<128x128xf32>
    %c1_76 = arith.constant 1 : index
    %c0_77 = arith.constant 0 : index
    %c0_78 = arith.constant 0 : index
    %128 = vector.load %arg1[%c1_76, %c0_77, %c0_78] : memref<3x128x128xbf16, #tpu.memory_space<vmem>>, vector<1x128x128xbf16>
    %129 = vector.shape_cast %128 : vector<1x128x128xbf16> to vector<128x128xbf16>
    %130 = vector.extract_strided_slice %122 {offsets = [0, 128], sizes = [128, 128], strides = [1, 1]} : vector<128x384xbf16> to vector<128x128xbf16>
    %cst_79 = arith.constant dense<0.000000e+00> : vector<128x128xf32>
    %131 = tpu.matmul %129, %130, %cst_79 {dimension_numbers = #tpu.dot_dimension_numbers<[1], [0], [0], [1], [0, 0, 1, 1], [], []>} : vector<128x128xbf16>, vector<128x128xbf16>, vector<128x128xf32> -> vector<128x128xf32>
    %132 = arith.addf %127, %131 : vector<128x128xf32>
    %c2_80 = arith.constant 2 : index
    %c0_81 = arith.constant 0 : index
    %c0_82 = arith.constant 0 : index
    %133 = vector.load %arg1[%c2_80, %c0_81, %c0_82] : memref<3x128x128xbf16, #tpu.memory_space<vmem>>, vector<1x128x128xbf16>
    %134 = vector.shape_cast %133 : vector<1x128x128xbf16> to vector<128x128xbf16>
    %135 = vector.extract_strided_slice %122 {offsets = [0, 256], sizes = [128, 128], strides = [1, 1]} : vector<128x384xbf16> to vector<128x128xbf16>
    %cst_83 = arith.constant dense<0.000000e+00> : vector<128x128xf32>
    %136 = tpu.matmul %134, %135, %cst_83 {dimension_numbers = #tpu.dot_dimension_numbers<[1], [0], [0], [1], [0, 0, 1, 1], [], []>} : vector<128x128xbf16>, vector<128x128xbf16>, vector<128x128xf32> -> vector<128x128xf32>
    %137 = arith.addf %132, %136 : vector<128x128xf32>
    %138 = arith.addf %137, %111 : vector<128x128xf32>
    %cst_84 = arith.constant 0.000000e+00 : f32
    %139 = vector.broadcast %cst_84 : f32 to vector<128x128xf32>
    %140 = arith.maximumf %138, %139 : vector<128x128xf32>
    %cst_85 = arith.constant dense<0.000000e+00> : vector<128xf32>
    %141 = vector.multi_reduction <add>, %140, %cst_85 [1] : vector<128x128xf32> to vector<128xf32>
    %142 = vector.shape_cast %141 : vector<128xf32> to vector<128x1xf32>
    %cst_86 = arith.constant 7.812500e-03 : f32
    %143 = vector.broadcast %cst_86 : f32 to vector<128x1xf32>
    %144 = arith.mulf %142, %143 : vector<128x1xf32>
    %145 = vector.broadcast %144 : vector<128x1xf32> to vector<128x128xf32>
    %146 = arith.subf %140, %145 : vector<128x128xf32>
    %147 = arith.mulf %146, %146 : vector<128x128xf32>
    %cst_87 = arith.constant dense<0.000000e+00> : vector<128xf32>
    %148 = vector.multi_reduction <add>, %147, %cst_87 [1] : vector<128x128xf32> to vector<128xf32>
    %149 = vector.shape_cast %148 : vector<128xf32> to vector<128x1xf32>
    %cst_88 = arith.constant 7.812500e-03 : f32
    %150 = vector.broadcast %cst_88 : f32 to vector<128x1xf32>
    %151 = arith.mulf %149, %150 : vector<128x1xf32>
    %cst_89 = arith.constant 9.99999974E-6 : f32
    %152 = vector.broadcast %cst_89 : f32 to vector<128x1xf32>
    %153 = arith.addf %151, %152 : vector<128x1xf32>
    %154 = math.rsqrt %153 : vector<128x1xf32>
    %155 = vector.broadcast %154 : vector<128x1xf32> to vector<128x128xf32>
    %156 = arith.mulf %146, %155 : vector<128x128xf32>
    %c2_90 = arith.constant 2 : index
    %c0_91 = arith.constant 0 : index
    %c0_92 = arith.constant 0 : index
    %157 = vector.load %arg7[%c2_90, %c0_91, %c0_92] : memref<3x1x128xf32, #tpu.memory_space<vmem>>, vector<1x1x128xf32>
    %158 = vector.shape_cast %157 : vector<1x1x128xf32> to vector<1x128xf32>
    %159 = vector.broadcast %158 : vector<1x128xf32> to vector<128x128xf32>
    %160 = arith.mulf %156, %159 : vector<128x128xf32>
    %c2_93 = arith.constant 2 : index
    %c0_94 = arith.constant 0 : index
    %c0_95 = arith.constant 0 : index
    %161 = vector.load %arg8[%c2_93, %c0_94, %c0_95] : memref<3x1x128xf32, #tpu.memory_space<vmem>>, vector<1x1x128xf32>
    %162 = vector.shape_cast %161 : vector<1x1x128xf32> to vector<1x128xf32>
    %163 = vector.broadcast %162 : vector<1x128xf32> to vector<128x128xf32>
    %164 = arith.addf %160, %163 : vector<128x128xf32>
    %c0_96 = arith.constant 0 : index
    %c0_97 = arith.constant 0 : index
    %165 = vector.load %arg2[%c0_96, %c0_97] : memref<128x8xf32, #tpu.memory_space<vmem>>, vector<128x1xf32>
    %cst_98 = arith.constant 0.000000e+00 : f32
    %166 = vector.broadcast %cst_98 : f32 to vector<128x1xf32>
    %167 = arith.cmpf ogt, %165, %166 : vector<128x1xf32>
    %cst_99 = arith.constant -1.000000e+09 : f32
    %168 = vector.shape_cast %167 : vector<128x1xi1> to vector<128x1xi1>
    %169 = vector.broadcast %168 : vector<128x1xi1> to vector<128x128xi1>
    %170 = vector.broadcast %cst_99 : f32 to vector<128x128xf32>
    %171 = arith.select %169, %164, %170 : vector<128x128xi1>, vector<128x128xf32>
    %cst_100 = arith.constant dense<0xFF800000> : vector<128xf32>
    %172 = vector.multi_reduction <maximumf>, %171, %cst_100 [0] : vector<128x128xf32> to vector<128xf32>
    %173 = vector.shape_cast %172 : vector<128xf32> to vector<1x128xf32>
    %cst_101 = arith.constant -5.000000e+08 : f32
    %174 = vector.broadcast %cst_101 : f32 to vector<1x128xf32>
    %175 = arith.cmpf ogt, %173, %174 : vector<1x128xf32>
    %cst_102 = arith.constant 0.000000e+00 : f32
    %176 = vector.broadcast %cst_102 : f32 to vector<1x128xf32>
    %177 = arith.select %175, %173, %176 : vector<1x128xi1>, vector<1x128xf32>
    %c0_103 = arith.constant 0 : index
    %c1_104 = arith.constant 1 : index
    %178 = vector.load %arg2[%c0_103, %c1_104] : memref<128x8xf32, #tpu.memory_space<vmem>>, vector<128x1xf32>
    %cst_105 = arith.constant 0.000000e+00 : f32
    %179 = vector.broadcast %cst_105 : f32 to vector<128x1xf32>
    %180 = arith.cmpf ogt, %178, %179 : vector<128x1xf32>
    %cst_106 = arith.constant -1.000000e+09 : f32
    %181 = vector.shape_cast %180 : vector<128x1xi1> to vector<128x1xi1>
    %182 = vector.broadcast %181 : vector<128x1xi1> to vector<128x128xi1>
    %183 = vector.broadcast %cst_106 : f32 to vector<128x128xf32>
    %184 = arith.select %182, %164, %183 : vector<128x128xi1>, vector<128x128xf32>
    %cst_107 = arith.constant dense<0xFF800000> : vector<128xf32>
    %185 = vector.multi_reduction <maximumf>, %184, %cst_107 [0] : vector<128x128xf32> to vector<128xf32>
    %186 = vector.shape_cast %185 : vector<128xf32> to vector<1x128xf32>
    %cst_108 = arith.constant -5.000000e+08 : f32
    %187 = vector.broadcast %cst_108 : f32 to vector<1x128xf32>
    %188 = arith.cmpf ogt, %186, %187 : vector<1x128xf32>
    %cst_109 = arith.constant 0.000000e+00 : f32
    %189 = vector.broadcast %cst_109 : f32 to vector<1x128xf32>
    %190 = arith.select %188, %186, %189 : vector<1x128xi1>, vector<1x128xf32>
    %cst_110 = arith.constant 0.000000e+00 : f32
    %191 = vector.broadcast %cst_110 : f32 to vector<6x128xf32>
    %192 = tpu.concatenate %177, %190, %191 in 0 : vector<1x128xf32>, vector<1x128xf32>, vector<6x128xf32> -> vector<8x128xf32>
    %193 = arith.truncf %192 : vector<8x128xf32> to vector<8x128xbf16>
    %c0_111 = arith.constant 0 : index
    %c0_112 = arith.constant 0 : index
    %194 = vector.load %arg9[%c0_111, %c0_112] : memref<128x128xbf16, #tpu.memory_space<vmem>>, vector<128x128xbf16>
    %cst_113 = arith.constant dense<0.000000e+00> : vector<8x128xf32>
    %195 = tpu.matmul %193, %194, %cst_113 {dimension_numbers = #tpu.dot_dimension_numbers<[1], [0], [0], [1], [0, 0, 1, 1], [], []>} : vector<8x128xbf16>, vector<128x128xbf16>, vector<8x128xf32> -> vector<8x128xf32>
    %c0_114 = arith.constant 0 : index
    %c0_115 = arith.constant 0 : index
    %196 = vector.load %arg10[%c0_114, %c0_115] : memref<1x128xf32, #tpu.memory_space<vmem>>, vector<1x128xf32>
    %197 = vector.broadcast %196 : vector<1x128xf32> to vector<8x128xf32>
    %198 = arith.addf %195, %197 : vector<8x128xf32>
    %cst_116 = arith.constant 0.000000e+00 : f32
    %199 = vector.broadcast %cst_116 : f32 to vector<8x128xf32>
    %200 = arith.maximumf %198, %199 : vector<8x128xf32>
    %201 = arith.truncf %200 : vector<8x128xf32> to vector<8x128xbf16>
    %c0_117 = arith.constant 0 : index
    %c0_118 = arith.constant 0 : index
    %202 = vector.load %arg11[%c0_117, %c0_118] : memref<128x128xbf16, #tpu.memory_space<vmem>>, vector<128x128xbf16>
    %cst_119 = arith.constant dense<0.000000e+00> : vector<8x128xf32>
    %203 = tpu.matmul %201, %202, %cst_119 {dimension_numbers = #tpu.dot_dimension_numbers<[1], [0], [0], [1], [0, 0, 1, 1], [], []>} : vector<8x128xbf16>, vector<128x128xbf16>, vector<8x128xf32> -> vector<8x128xf32>
    %c0_120 = arith.constant 0 : index
    %c0_121 = arith.constant 0 : index
    %204 = vector.load %arg12[%c0_120, %c0_121] : memref<1x128xf32, #tpu.memory_space<vmem>>, vector<1x128xf32>
    %205 = vector.broadcast %204 : vector<1x128xf32> to vector<8x128xf32>
    %206 = arith.addf %203, %205 : vector<8x128xf32>
    %c0_122 = arith.constant 0 : index
    %c0_123 = arith.constant 0 : index
    %207 = vector.load %arg13[%c0_122, %c0_123] : memref<8x128xf32, #tpu.memory_space<vmem>>, vector<8x128xf32>
    tpu.vector_store %arg13[%c0_122, %c0_123], %206 {strides = array<i32>} : memref<8x128xf32, #tpu.memory_space<vmem>>, vector<8x128xf32>,
    return
  }
}

</mosaic_0001>

<bundles_post_ra>
// kernel: tpu_custom_call.1
= control target key start
LH: loop header
LB: loop body
LE: loop exit
PB: predicated region body
PF: predicated region fallthrough
CT: control target
= control target key end

     0   :  { %18 = vsyncpa [#allocation3], 0  ;;  %s7630_s0 = inlined_call_operand.hbm [shape: bf16[128,128], index: 0, kind: input, shape index: {}]   ;;  %s7631_s1 = inlined_call_operand.hbm [shape: bf16[3,128,128], index: 1, kind: input, shape index: {}]   ;;  %s7632_s2 = inlined_call_operand.hbm [shape: f32[128,8], index: 2, kind: input, shape index: {}]   ;;  %s7633_s3 = inlined_call_operand.hbm [shape: bf16[128,128], index: 3, kind: input, shape index: {}]   ;;  %s7634_s4 = inlined_call_operand.hbm [shape: f32[1,128], index: 4, kind: input, shape index: {}]   ;;  %s7635_s5 = inlined_call_operand.hbm [shape: bf16[3,128,512], index: 5, kind: input, shape index: {}]   ;;  %s7636_s6 = inlined_call_operand.hbm [shape: f32[3,1,128], index: 6, kind: input, shape index: {}]   ;;  %s7637_s7 = inlined_call_operand.hbm [shape: f32[3,1,128], index: 7, kind: input, shape index: {}]   ;;  %s7638_s8 = inlined_call_operand.hbm [shape: f32[3,1,128], index: 8, kind: input, shape index: {}]   ;;  %s7639_s9 = inlined_call_operand.hbm [shape: bf16[128,128], index: 9, kind: input, shape index: {}]   ;;  %s7640_s10 = inlined_call_operand.hbm [shape: f32[1,128], index: 10, kind: input, shape index: {}]   ;;  %s7641_s11 = inlined_call_operand.hbm [shape: bf16[128,128], index: 11, kind: input, shape index: {}]   ;;  %s7642_s12 = inlined_call_operand.hbm [shape: f32[1,128], index: 12, kind: input, shape index: {}]   ;;  %s7643_s13 = inlined_call_operand.hbm [shape: f32[8,128], index: 13, kind: output, shape index: {}]  }
   0x1   :  { %19 = vsyncpa [#allocation6], 0 }
   0x2   :  { %20 = vsyncpa [#allocation9], 0 }
   0x3   :  { %21 = vsyncpa [#allocation12], 0 }
   0x4   :  { %22 = vsyncpa [#allocation15], 0 }
   0x5   :  { %23 = vsyncpa [#allocation18], 0 }
   0x6   :  { %24 = vsyncpa [#allocation21], 0 }
   0x7   :  { %25 = vsyncpa [#allocation4], 0  ;;  %s5759_s25 = smov [#allocation5]   ;;  %s5760_s27 = smov [#allocation8]  }
   0x8   :  { %s43_s26 = sshll.u32 %s5759_s25, 4  ;;  %s67_s28 = sshll.u32 %s5760_s27, 4  ;;  %s44_s26 = int_to_ptr.vmem [resolvable:$true] %s43_s26  ;;  %s5854_s28 = int_to_ptr.vmem [resolvable:$true] %s67_s28 }
   0x9   :  { %s5435_s14 = scalar_lea.hbm %s7631_s1, 3072 }
   0xa   :  { %p5436_p0 = scmp.ne.s32.totalorder %s7631_s1, %s5435_s14  ;;  %p5439_p1 = scmp.lt.u32.totalorder %s5435_s14, %s7631_s1 }
   0xc   :  { %p5441_p2 = pnand %p5439_p1, %p5436_p0 }
   0xe   :  { %5444 = shalt.err (!%p5441_p2)
}
   0xf   :  { %s5445_s19 = scalar_lea.vmem %s44_s26, 3072  ;;  %p5450_p4 = scmp.lt.s32.totalorder %s44_s26, %s44_s26 }
  0x10   :  { %p5446_p3 = scmp.ne.s32.totalorder %s44_s26, %s5445_s19  ;;  %p5451_p5 = scmp.lt.s32.totalorder %s5445_s19, %s5445_s19 }
  0x12   :  { %p5452_p6 = por %p5451_p5, %p5450_p4 }
  0x14   :  { %p5453_p7 = pnand %p5452_p6, %p5446_p3 }
  0x16   :  { %5456 = shalt.err (!%p5453_p7)
}
  0x17   :  { %s5761_s20 = smov 64   ;;  %s5762_s21 = smov 4  }
  0x18   :  { %49 = dma.hbm_to_vmem [thread:$0]  %s7631_s1, 3072, %s44_s26, [#allocation6], %s5761_s20, %s5761_s20, %s5762_s21  }
  0x19   :  { %s5457_s27 = scalar_lea.hbm %s7633_s3, 1024 }
  0x1a   :  { %p5458_p8 = scmp.ne.s32.totalorder %s7633_s3, %s5457_s27  ;;  %p5461_p9 = scmp.lt.u32.totalorder %s5457_s27, %s7633_s3 }
  0x1c   :  { %p5463_p10 = pnand %p5461_p9, %p5458_p8 }
  0x1e   :  { %5466 = shalt.err (!%p5463_p10)
}
  0x1f   :  { %s5467_s16 = scalar_lea.vmem %s5854_s28, 1024  ;;  %p5472_p12 = scmp.lt.s32.totalorder %s5854_s28, %s5854_s28 }
  0x20   :  { %p5468_p11 = scmp.ne.s32.totalorder %s5854_s28, %s5467_s16  ;;  %p5473_p13 = scmp.lt.s32.totalorder %s5467_s16, %s5467_s16 }
  0x22   :  { %p5474_p0 = por %p5473_p13, %p5472_p12 }
  0x24   :  { %p5475_p1 = pnand %p5474_p0, %p5468_p11 }
  0x26   :  { %5478 = shalt.err (!%p5475_p1)
}
  0x27   :  { %73 = dma.hbm_to_vmem [thread:$0]  %s7633_s3, 1024, %s5854_s28, [#allocation9], %s5761_s20, %s5761_s20, %s5762_s21  }
  0x28   :  { %s5763_s17 = smov [#allocation11]   ;;  %s5479_s23 = scalar_lea.hbm %s7635_s5, 12288 }
  0x29   :  { %s89_s18 = sshll.u32 %s5763_s17, 4  ;;  %p5480_p2 = scmp.ne.s32.totalorder %s7635_s5, %s5479_s23  ;;  %s90_s18 = int_to_ptr.vmem [resolvable:$true] %s89_s18 }
  0x2a   :  { %p5483_p3 = scmp.lt.u32.totalorder %s5479_s23, %s7635_s5 }
  0x2c   :  { %p5485_p4 = pnand %p5483_p3, %p5480_p2 }
  0x2e   :  { %5488 = shalt.err (!%p5485_p4)
}
  0x2f   :  { %s5489_s30 = scalar_lea.vmem %s90_s18, 12288  ;;  %p5494_p6 = scmp.lt.s32.totalorder %s90_s18, %s90_s18 }
  0x30   :  { %p5490_p5 = scmp.ne.s32.totalorder %s90_s18, %s5489_s30  ;;  %p5495_p7 = scmp.lt.s32.totalorder %s5489_s30, %s5489_s30 }
  0x32   :  { %p5496_p8 = por %p5495_p7, %p5494_p6 }
  0x34   :  { %p5497_p9 = pnand %p5496_p8, %p5490_p5 }
  0x36   :  { %5500 = shalt.err (!%p5497_p9)
}
  0x37   :  { %s5764_s3 = smov 256   ;;  %s5765_s28 = smov 16  }
  0x38   :  { %95 = dma.hbm_to_vmem [thread:$0]  %s7635_s5, 12288, %s90_s18, [#allocation12], %s5764_s3, %s5764_s3, %s5765_s28  }
  0x39   :  { %s5766_s16 = smov [#allocation14]   ;;  %s5767_s26 = smov [#allocation17]  }
  0x3a   :  { %s113_s1 = sshll.u32 %s5766_s16, 4  ;;  %s137_s17 = sshll.u32 %s5767_s26, 4  ;;  %s114_s1 = int_to_ptr.vmem [resolvable:$true] %s113_s1  ;;  %s5904_s17 = int_to_ptr.vmem [resolvable:$true] %s137_s17 }
  0x3b   :  { %s5501_s23 = scalar_lea.hbm %s7637_s7, 48 }
  0x3c   :  { %p5502_p10 = scmp.ne.s32.totalorder %s7637_s7, %s5501_s23  ;;  %p5505_p11 = scmp.lt.u32.totalorder %s5501_s23, %s7637_s7 }
  0x3e   :  { %p5507_p12 = pnand %p5505_p11, %p5502_p10 }
  0x40   :  { %5510 = shalt.err (!%p5507_p12)
}
  0x41   :  { %s5511_s5 = scalar_lea.vmem %s114_s1, 48  ;;  %s5515_s18 = scalar_lea.vmem %s114_s1, 64 }
  0x42   :  { %p5512_p13 = scmp.ne.s32.totalorder %s114_s1, %s5511_s5  ;;  %p5516_p0 = scmp.lt.s32.totalorder %s114_s1, %s114_s1 }
  0x43   :  { %p5517_p1 = scmp.lt.s32.totalorder %s5515_s18, %s5511_s5 }
  0x45   :  { %p5518_p2 = por %p5517_p1, %p5516_p0 }
  0x47   :  { %p5519_p3 = pnand %p5518_p2, %p5512_p13 }
  0x49   :  { %5522 = shalt.err (!%p5519_p3)
}
  0x4a   :  { %s5768_s30 = smov 1   ;;  %s5523_s26 = scalar_lea.hbm %s7639_s9, 1024 }
  0x4b   :  { %119 = dma.hbm_to_vmem [thread:$0]  %s7637_s7, 48, %s114_s1, [#allocation15], %s5765_s28, %s5765_s28, %s5768_s30  }
  0x4c   :  { %p5524_p4 = scmp.ne.s32.totalorder %s7639_s9, %s5523_s26  ;;  %p5527_p5 = scmp.lt.u32.totalorder %s5523_s26, %s7639_s9 }
  0x4e   :  { %p5529_p6 = pnand %p5527_p5, %p5524_p4 }
  0x50   :  { %5532 = shalt.err (!%p5529_p6)
}
  0x51   :  { %s5533_s25 = scalar_lea.vmem %s5904_s17, 1024  ;;  %p5538_p8 = scmp.lt.s32.totalorder %s5904_s17, %s5904_s17 }
  0x52   :  { %p5534_p7 = scmp.ne.s32.totalorder %s5904_s17, %s5533_s25  ;;  %p5539_p9 = scmp.lt.s32.totalorder %s5533_s25, %s5533_s25 }
  0x54   :  { %p5540_p10 = por %p5539_p9, %p5538_p8 }
  0x56   :  { %p5541_p11 = pnand %p5540_p10, %p5534_p7 }
  0x58   :  { %5544 = shalt.err (!%p5541_p11)
}
  0x59   :  { %143 = dma.hbm_to_vmem [thread:$0]  %s7639_s9, 1024, %s5904_s17, [#allocation18], %s5761_s20, %s5761_s20, %s5762_s21  }
  0x5a   :  { %s5769_s27 = smov [#allocation20]   ;;  %s5770_s5 = smov [#allocation2]  }
  0x5b   :  { %s159_s29 = sshll.u32 %s5769_s27, 4  ;;  %s31_s18 = sshll.u32 %s5770_s5, 4  ;;  %s160_s29 = int_to_ptr.vmem [resolvable:$true] %s159_s29  ;;  %s5941_s18 = int_to_ptr.vmem [resolvable:$true] %s31_s18 }
  0x5c   :  { %s5545_s15 = scalar_lea.hbm %s7641_s11, 1024 }
  0x5d   :  { %p5546_p12 = scmp.ne.s32.totalorder %s7641_s11, %s5545_s15  ;;  %p5549_p13 = scmp.lt.u32.totalorder %s5545_s15, %s7641_s11 }
  0x5f   :  { %p5551_p0 = pnand %p5549_p13, %p5546_p12 }
  0x61   :  { %5554 = shalt.err (!%p5551_p0)
}
  0x62   :  { %s5555_s9 = scalar_lea.vmem %s160_s29, 1024  ;;  %p5560_p2 = scmp.lt.s32.totalorder %s160_s29, %s160_s29 }
  0x63   :  { %p5556_p1 = scmp.ne.s32.totalorder %s160_s29, %s5555_s9  ;;  %p5561_p3 = scmp.lt.s32.totalorder %s5555_s9, %s5555_s9 }
  0x65   :  { %p5562_p4 = por %p5561_p3, %p5560_p2 }
  0x67   :  { %p5563_p5 = pnand %p5562_p4, %p5556_p1 }
  0x69   :  { %5566 = shalt.err (!%p5563_p5)
}
  0x6a   :  { %165 = dma.hbm_to_vmem [thread:$0]  %s7641_s11, 1024, %s160_s29, [#allocation21], %s5761_s20, %s5761_s20, %s5762_s21  }
  0x6b   :  { %s5567_s7 = scalar_lea.hbm %s7630_s0, 1024 }
  0x6c   :  { %p5568_p6 = scmp.ne.s32.totalorder %s7630_s0, %s5567_s7  ;;  %p5571_p7 = scmp.lt.u32.totalorder %s5567_s7, %s7630_s0 }
  0x6e   :  { %p5573_p8 = pnand %p5571_p7, %p5568_p6 }
  0x70   :  { %5576 = shalt.err (!%p5573_p8)
}
  0x71   :  { %s5577_s14 = scalar_lea.vmem %s5941_s18, 1024  ;;  %p5582_p10 = scmp.lt.s32.totalorder %s5941_s18, %s5941_s18 }
  0x72   :  { %p5578_p9 = scmp.ne.s32.totalorder %s5941_s18, %s5577_s14  ;;  %p5583_p11 = scmp.lt.s32.totalorder %s5577_s14, %s5577_s14 }
  0x74   :  { %p5584_p12 = por %p5583_p11, %p5582_p10 }
  0x76   :  { %p5585_p13 = pnand %p5584_p12, %p5578_p9 }
  0x78   :  { %5588 = shalt.err (!%p5585_p13)
}
  0x79   :  { %37 = dma.hbm_to_vmem [thread:$0]  %s7630_s0, 1024, %s5941_s18, [#allocation3], %s5761_s20, %s5761_s20, %s5762_s21  }
  0x7a   :  { %s5771_s15 = smov [#allocation7]   ;;  %s5589_s22 = scalar_lea.hbm %s7632_s2, 2048 }
  0x7b   :  { %s55_s16 = sshll.u32 %s5771_s15, 4  ;;  %p5590_p0 = scmp.ne.s32.totalorder %s7632_s2, %s5589_s22  ;;  %s56_s16 = int_to_ptr.vmem [resolvable:$true] %s55_s16 }
  0x7c   :  { %p5593_p1 = scmp.lt.u32.totalorder %s5589_s22, %s7632_s2 }
  0x7e   :  { %p5595_p2 = pnand %p5593_p1, %p5590_p0 }
  0x80   :  { %5598 = shalt.err (!%p5595_p2)
}
  0x81   :  { %s5599_s25 = scalar_lea.vmem %s56_s16, 2048  ;;  %p5604_p4 = scmp.lt.s32.totalorder %s56_s16, %s56_s16 }
  0x82   :  { %p5600_p3 = scmp.ne.s32.totalorder %s56_s16, %s5599_s25  ;;  %p5605_p5 = scmp.lt.s32.totalorder %s5599_s25, %s5599_s25 }
  0x84   :  { %p5606_p6 = por %p5605_p5, %p5604_p4 }
  0x86   :  { %p5607_p7 = pnand %p5606_p6, %p5600_p3 }
  0x88   :  { %5610 = shalt.err (!%p5607_p7)
}
  0x89   :  { %s5772_s0 = smov 128   ;;  %s5773_s20 = smov 8  }
  0x8a   :  { %61 = dma.hbm_to_vmem [thread:$0]  %s7632_s2, 2048, %s56_s16, [#allocation6], %s5772_s0, %s5772_s0, %s5773_s20  }
  0x8b   :  { %s5774_s7 = smov [#allocation10]   ;;  %s5775_s27 = smov [#allocation13]  }
  0x8c   :  { %s80_s1 = sshll.u32 %s5774_s7, 4  ;;  %s101_s5 = sshll.u32 %s5775_s27, 4  ;;  %s81_s1 = int_to_ptr.vmem [resolvable:$true] %s80_s1  ;;  %s102_s5 = int_to_ptr.vmem [resolvable:$true] %s101_s5 }
  0x8d   :  { %s5611_s11 = scalar_lea.hbm %s7634_s4, 16 }
  0x8e   :  { %p5612_p8 = scmp.ne.s32.totalorder %s7634_s4, %s5611_s11  ;;  %p5615_p9 = scmp.lt.u32.totalorder %s5611_s11, %s7634_s4 }
  0x90   :  { %p5617_p10 = pnand %p5615_p9, %p5612_p8 }
  0x92   :  { %5620 = shalt.err (!%p5617_p10)
}
  0x93   :  { %s5621_s2 = scalar_lea.vmem %s81_s1, 16  ;;  %s5625_s16 = scalar_lea.vmem %s81_s1, 32 }
  0x94   :  { %p5622_p11 = scmp.ne.s32.totalorder %s81_s1, %s5621_s2  ;;  %p5626_p12 = scmp.lt.s32.totalorder %s81_s1, %s81_s1 }
  0x95   :  { %p5627_p13 = scmp.lt.s32.totalorder %s5625_s16, %s5621_s2 }
  0x97   :  { %p5628_p0 = por %p5627_p13, %p5626_p12 }
  0x99   :  { %p5629_p1 = pnand %p5628_p0, %p5622_p11 }
  0x9b   :  { %5632 = shalt.err (!%p5629_p1)
}
  0x9c   :  { %83 = dma.hbm_to_vmem [thread:$0]  %s7634_s4, 16, %s81_s1, [#allocation9]  }
  0x9d   :  { %s5633_s24 = scalar_lea.hbm %s7636_s6, 48 }
  0x9e   :  { %p5634_p2 = scmp.ne.s32.totalorder %s7636_s6, %s5633_s24  ;;  %p5637_p3 = scmp.lt.u32.totalorder %s5633_s24, %s7636_s6 }
  0xa0   :  { %p5639_p4 = pnand %p5637_p3, %p5634_p2 }
  0xa2   :  { %5642 = shalt.err (!%p5639_p4)
}
  0xa3   :  { %s5643_s18 = scalar_lea.vmem %s102_s5, 48  ;;  %s5647_s7 = scalar_lea.vmem %s102_s5, 64 }
  0xa4   :  { %p5644_p5 = scmp.ne.s32.totalorder %s102_s5, %s5643_s18  ;;  %p5648_p6 = scmp.lt.s32.totalorder %s102_s5, %s102_s5 }
  0xa5   :  { %p5649_p7 = scmp.lt.s32.totalorder %s5647_s7, %s5643_s18 }
  0xa7   :  { %p5650_p8 = por %p5649_p7, %p5648_p6 }
  0xa9   :  { %p5651_p9 = pnand %p5650_p8, %p5644_p5 }
  0xab   :  { %5654 = shalt.err (!%p5651_p9)
}
  0xac   :  { %107 = dma.hbm_to_vmem [thread:$0]  %s7636_s6, 48, %s102_s5, [#allocation12], %s5765_s28, %s5765_s28, %s5768_s30  }
  0xad   :  { %s5776_s27 = smov [#allocation16]   ;;  %s5777_s14 = smov [#allocation19]  }
  0xae   :  { %s125_s3 = sshll.u32 %s5776_s27, 4  ;;  %s150_s11 = sshll.u32 %s5777_s14, 4  ;;  %s126_s3 = int_to_ptr.vmem [resolvable:$true] %s125_s3  ;;  %s151_s11 = int_to_ptr.vmem [resolvable:$true] %s150_s11 }
  0xaf   :  { %s5655_s26 = scalar_lea.hbm %s7638_s8, 48 }
  0xb0   :  { %p5656_p10 = scmp.ne.s32.totalorder %s7638_s8, %s5655_s26  ;;  %p5659_p11 = scmp.lt.u32.totalorder %s5655_s26, %s7638_s8 }
  0xb2   :  { %p5661_p12 = pnand %p5659_p11, %p5656_p10 }
  0xb4   :  { %5664 = shalt.err (!%p5661_p12)
}
  0xb5   :  { %s5665_s6 = scalar_lea.vmem %s126_s3, 48  ;;  %s5669_s5 = scalar_lea.vmem %s126_s3, 64 }
  0xb6   :  { %p5666_p13 = scmp.ne.s32.totalorder %s126_s3, %s5665_s6  ;;  %p5670_p0 = scmp.lt.s32.totalorder %s126_s3, %s126_s3 }
  0xb7   :  { %p5671_p1 = scmp.lt.s32.totalorder %s5669_s5, %s5665_s6 }
  0xb9   :  { %p5672_p2 = por %p5671_p1, %p5670_p0 }
  0xbb   :  { %p5673_p3 = pnand %p5672_p2, %p5666_p13 }
  0xbd   :  { %5676 = shalt.err (!%p5673_p3)
}
  0xbe   :  { %131 = dma.hbm_to_vmem [thread:$0]  %s7638_s8, 48, %s126_s3, [#allocation15], %s5765_s28, %s5765_s28, %s5768_s30  }
  0xbf   :  { %s5677_s25 = scalar_lea.hbm %s7640_s10, 16 }
  0xc0   :  { %p5678_p4 = scmp.ne.s32.totalorder %s7640_s10, %s5677_s25  ;;  %p5681_p5 = scmp.lt.u32.totalorder %s5677_s25, %s7640_s10 }
  0xc2   :  { %p5683_p6 = pnand %p5681_p5, %p5678_p4 }
  0xc4   :  { %5686 = shalt.err (!%p5683_p6)
}
  0xc5   :  { %s5687_s7 = scalar_lea.vmem %s151_s11, 16  ;;  %s5691_s4 = scalar_lea.vmem %s151_s11, 32 }
  0xc6   :  { %p5688_p7 = scmp.ne.s32.totalorder %s151_s11, %s5687_s7  ;;  %p5692_p8 = scmp.lt.s32.totalorder %s151_s11, %s151_s11 }
  0xc7   :  { %p5693_p9 = scmp.lt.s32.totalorder %s5691_s4, %s5687_s7 }
  0xc9   :  { %p5694_p10 = por %p5693_p9, %p5692_p8 }
  0xcb   :  { %p5695_p11 = pnand %p5694_p10, %p5688_p7 }
  0xcd   :  { %5698 = shalt.err (!%p5695_p11)
}
  0xce   :  { %153 = dma.hbm_to_vmem [thread:$0]  %s7640_s10, 16, %s151_s11, [#allocation18]  }
  0xcf   :  { %s5778_s30 = smov [#allocation22]   ;;  %s5699_s14 = scalar_lea.hbm %s7642_s12, 16 }
  0xd0   :  { %s172_s1 = sshll.u32 %s5778_s30, 4  ;;  %p5700_p12 = scmp.ne.s32.totalorder %s7642_s12, %s5699_s14  ;;  %s173_s1 = int_to_ptr.vmem [resolvable:$true] %s172_s1 }
  0xd1   :  { %p5703_p13 = scmp.lt.u32.totalorder %s5699_s14, %s7642_s12 }
  0xd3   :  { %p5705_p0 = pnand %p5703_p13, %p5700_p12 }
  0xd5   :  { %5708 = shalt.err (!%p5705_p0)
}
  0xd6   :  { %s5709_s2 = scalar_lea.vmem %s173_s1, 16  ;;  %s5713_s10 = scalar_lea.vmem %s173_s1, 32 }
  0xd7   :  { %p5710_p1 = scmp.ne.s32.totalorder %s173_s1, %s5709_s2  ;;  %p5714_p2 = scmp.lt.s32.totalorder %s173_s1, %s173_s1 }
  0xd8   :  { %p5715_p3 = scmp.lt.s32.totalorder %s5713_s10, %s5709_s2 }
  0xda   :  { %p5716_p4 = por %p5715_p3, %p5714_p2 }
  0xdc   :  { %p5717_p5 = pnand %p5716_p4, %p5710_p1 }
  0xde   :  { %5720 = shalt.err (!%p5717_p5)
}
  0xdf   :  { %175 = dma.hbm_to_vmem [thread:$0]  %s7642_s12, 16, %s173_s1, [#allocation21]  }
  0xe0   :  { %5743 = dma.done.wait [#allocation3], 1024  }
  0xe1   :  { %5744 = vsyncadd [#allocation3], 4294966272 }
  0xe2   :  { %5745 = dma.done.wait [#allocation6], 5120  }
  0xe3   :  { %5746 = vsyncadd [#allocation6], 4294962176 }
  0xe4   :  { %5747 = dma.done.wait [#allocation9], 1040  }
  0xe5   :  { %5748 = vsyncadd [#allocation9], 4294966256 }
  0xe6   :  { %5749 = dma.done.wait [#allocation12], 12336  }
  0xe7   :  { %5750 = vsyncadd [#allocation12], 4294954960 }
  0xe8   :  { %5751 = dma.done.wait [#allocation15], 96  }
  0xe9   :  { %5752 = vsyncadd [#allocation15], 4294967200 }
  0xea   :  { %5753 = dma.done.wait [#allocation18], 1040  }
  0xeb   :  { %5754 = vsyncadd [#allocation18], 4294966256 }
  0xec   :  { %5755 = dma.done.wait [#allocation21], 1040  }
  0xed   :  { %5756 = vsyncadd [#allocation21], 4294966256  ;;  %v5091_v0 = vld [vmem:[#allocation8] sm:$0xff]   ;;  %v5092_v1 = vld [vmem:[#allocation8 + $0x8] sm:$0xff]   ;;  %v5779_v48 = vmov 0   ;;  %s5783_s12 = smov [#allocation23]  }
  0xee   :  { %4698 = vmatprep.subr.bf16.mxu0 %v5091_v0  ;;  %v5093_v2 = vld [vmem:[#allocation8 + $0x10] sm:$0xff]   ;;  %v5094_v3 = vld [vmem:[#allocation8 + $0x18] sm:$0xff]   ;;  %v5099_v4 = vld [vmem:[#allocation2] sm:$0xff]   ;;  %680 = vmatprep.mubr.bf16.mxu1 %v5779_v48  ;;  %s4338_s22 = sshll.u32 %s5783_s12, 4  ;;  %s4339_s22 = int_to_ptr.vmem [resolvable:$true] %s4338_s22 }
  0xef   :  { %4699 = vmatpush3.bf16.msra.mxu0 %v5091_v0  ;;  %4714 = vmatprep.mubr.bf16.mxu0 %v5099_v4  ;;  %v5095_v5 = vld [vmem:[#allocation8 + $0x20] sm:$0xff]   ;;  %v5096_v6 = vld [vmem:[#allocation8 + $0x28] sm:$0xff]   ;;  %v5097_v10 = vld [vmem:[#allocation8 + $0x30] sm:$0xff]   ;;  %s5721_s6 = scalar_lea.vmem %s4339_s22, 128  ;;  %p5726_p7 = scmp.lt.s32.totalorder %s4339_s22, %s4339_s22 }
  0xf0   :  { %4700 = vmatprep.subr.bf16.mxu0 %v5092_v1  ;;  %v5107_v7 = vld [vmem:[#allocation11 + $0x4] ss:$16 sps:$4 sm:$0xff]   ;;  %v5112_v8 = vld [vmem:[#allocation11] ss:$16 sps:$4 sm:$0xff]   ;;  %v5111_v17 = vld [vmem:[#allocation11 + $0xc] ss:$16 sps:$4 sm:$0xff]   ;;  %5084 = vset.pattern.permute.xlu1 %v5779_v48  ;;  %p5722_p6 = scmp.ne.s32.totalorder %s4339_s22, %s5721_s6  ;;  %p5727_p8 = scmp.lt.s32.totalorder %s5721_s6, %s5721_s6 }
  0xf1   :  { %648 = vmatprep.subr.bf16.mxu1 %v5107_v7  ;;  %v5113_v9 = vld [vmem:[#allocation11 + $0x24] ss:$16 sps:$4 sm:$0xff]   ;;  %v5118_v11 = vld [vmem:[#allocation11 + $0x20] ss:$16 sps:$4 sm:$0xff]   ;;  %v5109_v21 = vld [vmem:[#allocation11 + $0x8] ss:$16 sps:$4 sm:$0xff]   ;;  %5083 = vset.pattern.permute.xlu0 %v5779_v48 }
  0xf2   :  { %649 = vmatpush1.bf16.msra.mxu1 %v5112_v8  ;;  %v5119_v12 = vld [vmem:[#allocation11 + $0x44] ss:$16 sps:$4 sm:$0xff]   ;;  %v5124_v14 = vld [vmem:[#allocation11 + $0x40] ss:$16 sps:$4 sm:$0xff]   ;;  %v5117_v22 = vld [vmem:[#allocation11 + $0x2c] ss:$16 sps:$4 sm:$0xff]   ;;  %p5728_p9 = por %p5727_p8, %p5726_p7 }
  0xf3   :  { %4701 = vmatpush3.bf16.msra.mxu0 %v5092_v1  ;;  %650 = vmatprep.subr.bf16.mxu1 %v5113_v9  ;;  %v5098_v13 = vld [vmem:[#allocation8 + $0x38] sm:$0xff]   ;;  %v5100_v16 = vld [vmem:[#allocation2 + $0x8] sm:$0xff]   ;;  %v5130_v18 = vld [vmem:[#allocation11 + $0x60] ss:$16 sps:$4 sm:$0xff]  }
  0xf4   :  { %4702 = vmatprep.subr.bf16.mxu0 %v5093_v2  ;;  %v5125_v15 = vld [vmem:[#allocation11 + $0x64] ss:$16 sps:$4 sm:$0xff]   ;;  %v5136_v23 = vld [vmem:[#allocation11 + $0x80] ss:$16 sps:$4 sm:$0xff]   ;;  %v5115_v25 = vld [vmem:[#allocation11 + $0x28] ss:$16 sps:$4 sm:$0xff]   ;;  %p5729_p10 = pnand %p5728_p9, %p5722_p6 }
  0xf5   :  { %v5101_v19 = vld [vmem:[#allocation2 + $0x10] sm:$0xff]   ;;  %v5102_v28 = vld [vmem:[#allocation2 + $0x18] sm:$0xff]   ;;  %v5103_v29 = vld [vmem:[#allocation2 + $0x20] sm:$0xff]  }
  0xf6   :  { %651 = vmatpush1.bf16.msra.mxu1 %v5118_v11  ;;  %v5131_v20 = vld [vmem:[#allocation11 + $0x84] ss:$16 sps:$4 sm:$0xff]   ;;  %v5123_v26 = vld [vmem:[#allocation11 + $0x4c] ss:$16 sps:$4 sm:$0xff]   ;;  %v5142_v27 = vld [vmem:[#allocation11 + $0xa0] ss:$16 sps:$4 sm:$0xff]  }
  0xf7   :  { %4703 = vmatpush3.bf16.msra.mxu0 %v5093_v2  ;;  %652 = vmatprep.subr.bf16.mxu1 %v5119_v12  ;;  %v5137_v24 = vld [vmem:[#allocation11 + $0xa4] ss:$16 sps:$4 sm:$0xff]   ;;  %v5121_v30 = vld [vmem:[#allocation11 + $0x48] ss:$16 sps:$4 sm:$0xff]   ;;  %v5129_v31 = vld [vmem:[#allocation11 + $0x6c] ss:$16 sps:$4 sm:$0xff]  }
  0xf8   :  { %4704 = vmatprep.subr.bf16.mxu0 %v5094_v3  ;;  %v5127_v32 = vld [vmem:[#allocation11 + $0x68] ss:$16 sps:$4 sm:$0xff]   ;;  %v5135_v33 = vld [vmem:[#allocation11 + $0x8c] ss:$16 sps:$4 sm:$0xff]   ;;  %v5143_v40 = vld [vmem:[#allocation11 + $0xc4] ss:$16 sps:$4 sm:$0xff]  }
  0xf9   :  { %v5104_v34 = vld [vmem:[#allocation2 + $0x28] sm:$0xff]   ;;  %v5105_v35 = vld [vmem:[#allocation2 + $0x30] sm:$0xff]   ;;  %v5106_v39 = vld [vmem:[#allocation2 + $0x38] sm:$0xff]  }
  0xfa   :  { %653 = vmatpush1.bf16.msra.mxu1 %v5124_v14  ;;  %v5133_v36 = vld [vmem:[#allocation11 + $0x88] ss:$16 sps:$4 sm:$0xff]   ;;  %v5141_v37 = vld [vmem:[#allocation11 + $0xac] ss:$16 sps:$4 sm:$0xff]   ;;  %v5148_v43 = vld [vmem:[#allocation11 + $0xc0] ss:$16 sps:$4 sm:$0xff]  }
  0xfb   :  { %4705 = vmatpush3.bf16.msra.mxu0 %v5094_v3  ;;  %654 = vmatprep.subr.bf16.mxu1 %v5125_v15  ;;  %v5139_v38 = vld [vmem:[#allocation11 + $0xa8] ss:$16 sps:$4 sm:$0xff]   ;;  %v5147_v41 = vld [vmem:[#allocation11 + $0xcc] ss:$16 sps:$4 sm:$0xff]   ;;  %v5149_v44 = vld [vmem:[#allocation11 + $0xe4] ss:$16 sps:$4 sm:$0xff]  }
  0xfc   :  { %4706 = vmatprep.subr.bf16.mxu0 %v5095_v5  ;;  %v5145_v42 = vld [vmem:[#allocation11 + $0xc8] ss:$16 sps:$4 sm:$0xff]   ;;  %v5153_v45 = vld [vmem:[#allocation11 + $0xec] ss:$16 sps:$4 sm:$0xff]   ;;  %v5154_v47 = vld [vmem:[#allocation11 + $0xe0] ss:$16 sps:$4 sm:$0xff]  }
  0xfd   :  { %v5151_v46 = vld [vmem:[#allocation11 + $0xe8] ss:$16 sps:$4 sm:$0xff]   ;;  %v6060_v50 = vld [vmem:[#allocation10] ss:$0 sm:$0xff] }
  0xfe   :  { %655 = vmatpush1.bf16.msra.mxu1 %v5130_v18 }
  0xff   :  { %4707 = vmatpush3.bf16.msra.mxu0 %v5095_v5  ;;  %656 = vmatprep.subr.bf16.mxu1 %v5131_v20 }
 0x100   :  { %4708 = vmatprep.subr.bf16.mxu0 %v5096_v6 }
 0x102   :  { %657 = vmatpush1.bf16.msra.mxu1 %v5136_v23 }
 0x103   :  { %4709 = vmatpush3.bf16.msra.mxu0 %v5096_v6  ;;  %658 = vmatprep.subr.bf16.mxu1 %v5137_v24 }
 0x104   :  { %4710 = vmatprep.subr.bf16.mxu0 %v5097_v10 }
 0x106   :  { %659 = vmatpush1.bf16.msra.mxu1 %v5142_v27  ;;  %v5157_v27 = vld [vmem:[#allocation5 + $0x40] sm:$0xff]  }
 0x107   :  { %4711 = vmatpush3.bf16.msra.mxu0 %v5097_v10  ;;  %660 = vmatprep.subr.bf16.mxu1 %v5143_v40 }
 0x108   :  { %4712 = vmatprep.subr.bf16.mxu0 %v5098_v13 }
 0x10a   :  { %661 = vmatpush1.bf16.msra.mxu1 %v5148_v43 }
 0x10b   :  { %4713 = vmatpush3.bf16.msra.mxu0 %v5098_v13  ;;  %662 = vmatprep.subr.bf16.mxu1 %v5149_v44 }
 0x10c   :  { %761 = vmatprep.subr.bf16.mxu0 %v5111_v17 }
 0x10e   :  { %4715 = vmatmul.mubr.bf16.vlgmr.msra.gmra.mrb[0].mxu0 %v5100_v16  ;;  %663 = vmatpush1.bf16.msra.mxu1 %v5154_v47 }
 0x10f   :  { %4718 = vmatprep.mubr.bf16.mxu0 %v5101_v19  ;;  %762 = vmatpush1.bf16.msra.mxu0 %v5109_v21 }
 0x110   :  { %763 = vmatprep.subr.bf16.mxu0 %v5117_v22 }
 0x113   :  { %764 = vmatpush1.bf16.msra.mxu0 %v5115_v25 }
 0x114   :  { %765 = vmatprep.subr.bf16.mxu0 %v5123_v26  ;;  %v5155_v26 = vld [vmem:[#allocation5] sm:$0xff]  }
 0x116   :  { %4719 = vmatmul.mubr.bf16.gmra.mrb[4].mxu0 %v5102_v28 }
 0x117   :  { %4722 = vmatprep.mubr.bf16.mxu0 %v5103_v29  ;;  %766 = vmatpush1.bf16.msra.mxu0 %v5121_v30 }
 0x118   :  { %767 = vmatprep.subr.bf16.mxu0 %v5129_v31 }
 0x11b   :  { %768 = vmatpush1.bf16.msra.mxu0 %v5127_v32 }
 0x11c   :  { %769 = vmatprep.subr.bf16.mxu0 %v5135_v33 }
 0x11e   :  { %4723 = vmatmul.mubr.bf16.gmra.mrb[8].mxu0 %v5104_v34 }
 0x11f   :  { %4726 = vmatprep.mubr.bf16.mxu0 %v5105_v35  ;;  %770 = vmatpush1.bf16.msra.mxu0 %v5133_v36 }
 0x120   :  { %771 = vmatprep.subr.bf16.mxu0 %v5141_v37 }
 0x123   :  { %772 = vmatpush1.bf16.msra.mxu0 %v5139_v38 }
 0x124   :  { %773 = vmatprep.subr.bf16.mxu0 %v5147_v41 }
 0x126   :  { %4727 = vmatmul.mubr.bf16.gmra.mrb[12].mxu0 %v5106_v39 }
 0x127   :  { %774 = vmatpush1.bf16.msra.mxu0 %v5145_v42  ;;  %793 = vmatprep.mubr.bf16.mxu0 %v5779_v48 }
 0x128   :  { %775 = vmatprep.subr.bf16.mxu0 %v5153_v45 }
 0x12b   :  { %776 = vmatpush1.bf16.msra.mxu0 %v5151_v46 }
 0x1e1   :  { %v4716_v49 = vpop.f32.mrb[0].mxu0 }
 0x1e2   :  { %v385_v51 = vpop.f32.mrb[1].mxu0  ;;  %v6076_v62 = vadd.f32 %v4716_v49, %v6060_v50 }
 0x1e3   :  { %v4717_v52 = vpop.f32.mrb[2].mxu0  ;;  %v6063_v54 = vadd.f32 %v6060_v50, %v385_v51 }
 0x1e4   :  { %v388_v53 = vpop.f32.mrb[3].mxu0  ;;  %v6073_v59 = vadd.f32 %v4717_v52, %v6060_v50 }
 0x1e5   :  { %v6066_v55 = vadd.f32 %v6060_v50, %v388_v53 }
 0x1e6   :  { %v449_v63 = vpack.c.bf16 %v6073_v59, %v6076_v62 }
 0x1e7   :  { %v448_v56 = vpack.c.bf16 %v6066_v55, %v6063_v54 }
 0x1e9   :  { %681 = vmatmul.mubr.bf16.vlgmr.msra.gmra.mrb[0].mxu1 %v448_v56  ;;  %794 = vmatmul.mubr.bf16.vlgmr.msra.gmra.mrb[16].mxu0 %v448_v56  ;;  %v4720_v57 = vpop.f32.mrb[4].mxu0 }
 0x1ea   :  { %v401_v58 = vpop.f32.mrb[5].mxu0  ;;  %690 = vmatprep.mubr.bf16.mxu1 %v5779_v48  ;;  %803 = vmatprep.mubr.bf16.mxu0 %v5779_v48  ;;  %v6093_v9 = vadd.f32 %v4720_v57, %v6060_v50 }
 0x1eb   :  { %v4721_v60 = vpop.f32.mrb[6].mxu0  ;;  %v6083_v2 = vadd.f32 %v6060_v50, %v401_v58 }
 0x1ec   :  { %v404_v61 = vpop.f32.mrb[7].mxu0  ;;  %v6096_v10 = vadd.f32 %v4721_v60, %v6060_v50 }
 0x1ed   :  { %v6086_v3 = vadd.f32 %v6060_v50, %v404_v61 }
 0x1ee   :  { %v451_v13 = vpack.c.bf16 %v6096_v10, %v6093_v9 }
 0x1ef   :  { %v450_v6 = vpack.c.bf16 %v6086_v3, %v6083_v2 }
 0x1f1   :  { %691 = vmatmul.mubr.bf16.gmra.mrb[4].mxu1 %v449_v63  ;;  %804 = vmatmul.mubr.bf16.gmra.mrb[20].mxu0 %v449_v63  ;;  %v4724_v0 = vpop.f32.mrb[8].mxu0 }
 0x1f2   :  { %700 = vmatprep.mubr.bf16.mxu1 %v5779_v48  ;;  %813 = vmatprep.mubr.bf16.mxu0 %v5779_v48  ;;  %v417_v1 = vpop.f32.mrb[9].mxu0  ;;  %v6113_v17 = vadd.f32 %v4724_v0, %v6060_v50 }
 0x1f3   :  { %v4725_v4 = vpop.f32.mrb[10].mxu0  ;;  %v6103_v14 = vadd.f32 %v6060_v50, %v417_v1 }
 0x1f4   :  { %v420_v5 = vpop.f32.mrb[11].mxu0  ;;  %v6116_v18 = vadd.f32 %v4725_v4, %v6060_v50 }
 0x1f5   :  { %v6106_v15 = vadd.f32 %v6060_v50, %v420_v5 }
 0x1f6   :  { %v453_v19 = vpack.c.bf16 %v6116_v18, %v6113_v17 }
 0x1f7   :  { %v452_v16 = vpack.c.bf16 %v6106_v15, %v6103_v14 }
 0x1f9   :  { %701 = vmatmul.mubr.bf16.gmra.mrb[8].mxu1 %v450_v6  ;;  %814 = vmatmul.mubr.bf16.gmra.mrb[24].mxu0 %v450_v6  ;;  %v4728_v7 = vpop.f32.mrb[12].mxu0 }
 0x1fa   :  { %710 = vmatprep.mubr.bf16.mxu1 %v5779_v48  ;;  %823 = vmatprep.mubr.bf16.mxu0 %v5779_v48  ;;  %v433_v8 = vpop.f32.mrb[13].mxu0  ;;  %v6133_v23 = vadd.f32 %v4728_v7, %v6060_v50 }
 0x1fb   :  { %v4729_v11 = vpop.f32.mrb[14].mxu0  ;;  %v6123_v20 = vadd.f32 %v6060_v50, %v433_v8 }
 0x1fc   :  { %v436_v12 = vpop.f32.mrb[15].mxu0  ;;  %v6136_v24 = vadd.f32 %v4729_v11, %v6060_v50 }
 0x1fd   :  { %v6126_v21 = vadd.f32 %v6060_v50, %v436_v12 }
 0x1fe   :  { %v455_v25 = vpack.c.bf16 %v6136_v24, %v6133_v23 }
 0x1ff   :  { %v454_v22 = vpack.c.bf16 %v6126_v21, %v6123_v20 }
 0x201   :  { %711 = vmatmul.mubr.bf16.gmra.mrb[12].mxu1 %v451_v13  ;;  %824 = vmatmul.mubr.bf16.gmra.mrb[28].mxu0 %v451_v13 }
 0x202   :  { %720 = vmatprep.mubr.bf16.mxu1 %v5779_v48  ;;  %833 = vmatprep.mubr.bf16.mxu0 %v5779_v48 }
 0x209   :  { %721 = vmatmul.mubr.bf16.gmra.mrb[16].mxu1 %v452_v16  ;;  %834 = vmatmul.mubr.bf16.gmra.mrb[32].mxu0 %v452_v16 }
 0x20a   :  { %730 = vmatprep.mubr.bf16.mxu1 %v5779_v48  ;;  %843 = vmatprep.mubr.bf16.mxu0 %v5779_v48 }
 0x211   :  { %731 = vmatmul.mubr.bf16.gmra.mrb[20].mxu1 %v453_v19  ;;  %844 = vmatmul.mubr.bf16.gmra.mrb[36].mxu0 %v453_v19 }
 0x212   :  { %740 = vmatprep.mubr.bf16.mxu1 %v5779_v48  ;;  %853 = vmatprep.mubr.bf16.mxu0 %v5779_v48 }
 0x219   :  { %741 = vmatmul.mubr.bf16.gmra.mrb[24].mxu1 %v454_v22  ;;  %854 = vmatmul.mubr.bf16.gmra.mrb[40].mxu0 %v454_v22 }
 0x21a   :  { %750 = vmatprep.mubr.bf16.mxu1 %v5779_v48  ;;  %863 = vmatprep.mubr.bf16.mxu0 %v5779_v48 }
 0x221   :  { %751 = vmatmul.mubr.bf16.gmra.mrb[28].mxu1 %v455_v25  ;;  %864 = vmatmul.mubr.bf16.gmra.mrb[44].mxu0 %v455_v25 }
 0x222   :  { %4746 = vmatprep.mubr.bf16.mxu1 %v5155_v26  ;;  %4778 = vmatprep.mubr.bf16.mxu0 %v5157_v27 }
 0x2bc   :  { %v6140_v28 = vpop.f32.mrb[0].mxu1  ;;  %v795_v29 = vpop.f32.mrb[16].mxu0 }
 0x2bd   :  { %v684_v30 = vpop.f32.mrb[1].mxu1  ;;  %v797_v31 = vpop.f32.mrb[17].mxu0 }
 0x2be   :  { %v6142_v32 = vpop.f32.mrb[2].mxu1  ;;  %v799_v33 = vpop.f32.mrb[18].mxu0 }
 0x2bf   :  { %v898_v34 = vpack.c.bf16 %v799_v33, %v795_v29  ;;  %v688_v35 = vpop.f32.mrb[3].mxu1  ;;  %v801_v36 = vpop.f32.mrb[19].mxu0 }
 0x2c0   :  { %v897_v37 = vpack.c.bf16 %v688_v35, %v684_v30  ;;  %v6144_v38 = vpack.c.bf16 %v801_v36, %v797_v31 }
 0x2c1   :  { %4762 = vmatprep.subr.bf16.mxu0 %v898_v34 }
 0x2c2   :  { %4730 = vmatprep.subr.bf16.mxu1 %v897_v37  ;;  %4763 = vmatpush3.bf16.msra.mxu0 %v898_v34 }
 0x2c3   :  { %4731 = vmatpush3.bf16.msra.mxu1 %v897_v37 }
 0x2c4   :  { %v6146_v39 = vpop.f32.mrb[4].mxu1  ;;  %v805_v40 = vpop.f32.mrb[20].mxu0 }
 0x2c5   :  { %v694_v41 = vpop.f32.mrb[5].mxu1  ;;  %v807_v42 = vpop.f32.mrb[21].mxu0 }
 0x2c6   :  { %v6148_v43 = vpop.f32.mrb[6].mxu1  ;;  %v809_v44 = vpop.f32.mrb[22].mxu0 }
 0x2c7   :  { %v901_v45 = vpack.c.bf16 %v809_v44, %v805_v40  ;;  %v698_v46 = vpop.f32.mrb[7].mxu1  ;;  %v811_v47 = vpop.f32.mrb[23].mxu0 }
 0x2c8   :  { %v900_v49 = vpack.c.bf16 %v698_v46, %v694_v41  ;;  %v6150_v50 = vpack.c.bf16 %v811_v47, %v807_v42 }
 0x2c9   :  { %4764 = vmatprep.subr.bf16.mxu0 %v901_v45 }
 0x2ca   :  { %4732 = vmatprep.subr.bf16.mxu1 %v900_v49  ;;  %4765 = vmatpush3.bf16.msra.mxu0 %v901_v45 }
 0x2cb   :  { %4733 = vmatpush3.bf16.msra.mxu1 %v900_v49 }
 0x2cc   :  { %v6152_v51 = vpop.f32.mrb[8].mxu1  ;;  %v815_v52 = vpop.f32.mrb[24].mxu0 }
 0x2cd   :  { %v704_v53 = vpop.f32.mrb[9].mxu1  ;;  %v817_v56 = vpop.f32.mrb[25].mxu0 }
 0x2ce   :  { %v6154_v57 = vpop.f32.mrb[10].mxu1  ;;  %v819_v58 = vpop.f32.mrb[26].mxu0 }
 0x2cf   :  { %v904_v60 = vpack.c.bf16 %v819_v58, %v815_v52  ;;  %v708_v61 = vpop.f32.mrb[11].mxu1  ;;  %v821_v63 = vpop.f32.mrb[27].mxu0 }
 0x2d0   :  { %v903_v0 = vpack.c.bf16 %v708_v61, %v704_v53  ;;  %v6156_v1 = vpack.c.bf16 %v821_v63, %v817_v56 }
 0x2d1   :  { %4766 = vmatprep.subr.bf16.mxu0 %v904_v60 }
 0x2d2   :  { %4734 = vmatprep.subr.bf16.mxu1 %v903_v0  ;;  %4767 = vmatpush3.bf16.msra.mxu0 %v904_v60 }
 0x2d3   :  { %4735 = vmatpush3.bf16.msra.mxu1 %v903_v0 }
 0x2d4   :  { %v6158_v4 = vpop.f32.mrb[12].mxu1  ;;  %v825_v5 = vpop.f32.mrb[28].mxu0 }
 0x2d5   :  { %v714_v6 = vpop.f32.mrb[13].mxu1  ;;  %v827_v7 = vpop.f32.mrb[29].mxu0 }
 0x2d6   :  { %v6160_v8 = vpop.f32.mrb[14].mxu1  ;;  %v829_v11 = vpop.f32.mrb[30].mxu0 }
 0x2d7   :  { %v907_v12 = vpack.c.bf16 %v829_v11, %v825_v5  ;;  %v718_v13 = vpop.f32.mrb[15].mxu1  ;;  %v831_v16 = vpop.f32.mrb[31].mxu0 }
 0x2d8   :  { %v906_v19 = vpack.c.bf16 %v718_v13, %v714_v6  ;;  %v6162_v22 = vpack.c.bf16 %v831_v16, %v827_v7 }
 0x2d9   :  { %4768 = vmatprep.subr.bf16.mxu0 %v907_v12 }
 0x2da   :  { %4736 = vmatprep.subr.bf16.mxu1 %v906_v19  ;;  %4769 = vmatpush3.bf16.msra.mxu0 %v907_v12 }
 0x2db   :  { %4737 = vmatpush3.bf16.msra.mxu1 %v906_v19 }
 0x2dc   :  { %v6164_v25 = vpop.f32.mrb[16].mxu1  ;;  %v835_v26 = vpop.f32.mrb[32].mxu0 }
 0x2dd   :  { %v724_v27 = vpop.f32.mrb[17].mxu1  ;;  %v837_v29 = vpop.f32.mrb[33].mxu0 }
 0x2de   :  { %v6166_v30 = vpop.f32.mrb[18].mxu1  ;;  %v839_v31 = vpop.f32.mrb[34].mxu0 }
 0x2df   :  { %v910_v33 = vpack.c.bf16 %v839_v31, %v835_v26  ;;  %v728_v34 = vpop.f32.mrb[19].mxu1  ;;  %v841_v35 = vpop.f32.mrb[35].mxu0 }
 0x2e0   :  { %v909_v36 = vpack.c.bf16 %v728_v34, %v724_v27  ;;  %v6168_v37 = vpack.c.bf16 %v841_v35, %v837_v29 }
 0x2e1   :  { %4770 = vmatprep.subr.bf16.mxu0 %v910_v33 }
 0x2e2   :  { %4738 = vmatprep.subr.bf16.mxu1 %v909_v36  ;;  %4771 = vmatpush3.bf16.msra.mxu0 %v910_v33 }
 0x2e3   :  { %4739 = vmatpush3.bf16.msra.mxu1 %v909_v36 }
 0x2e4   :  { %v6170_v40 = vpop.f32.mrb[20].mxu1  ;;  %v845_v41 = vpop.f32.mrb[36].mxu0 }
 0x2e5   :  { %v734_v42 = vpop.f32.mrb[21].mxu1  ;;  %v847_v44 = vpop.f32.mrb[37].mxu0 }
 0x2e6   :  { %v6172_v45 = vpop.f32.mrb[22].mxu1  ;;  %v849_v46 = vpop.f32.mrb[38].mxu0 }
 0x2e7   :  { %v913_v47 = vpack.c.bf16 %v849_v46, %v845_v41  ;;  %v738_v49 = vpop.f32.mrb[23].mxu1  ;;  %v851_v52 = vpop.f32.mrb[39].mxu0  ;;  %v5161_v46 = vld [vmem:[#allocation5 + $0x50] sm:$0xff]  }
 0x2e8   :  { %v912_v53 = vpack.c.bf16 %v738_v49, %v734_v42  ;;  %v6174_v56 = vpack.c.bf16 %v851_v52, %v847_v44  ;;  %v5158_v42 = vld [vmem:[#allocation5 + $0x48] sm:$0xff]   ;;  %v5162_v49 = vld [vmem:[#allocation5 + $0x58] sm:$0xff]  }
 0x2e9   :  { %4772 = vmatprep.subr.bf16.mxu0 %v913_v47  ;;  %v5156_v44 = vld [vmem:[#allocation5 + $0x8] sm:$0xff]   ;;  %v5160_v52 = vld [vmem:[#allocation5 + $0x18] sm:$0xff]  }
 0x2ea   :  { %4740 = vmatprep.subr.bf16.mxu1 %v912_v53  ;;  %4773 = vmatpush3.bf16.msra.mxu0 %v913_v47  ;;  %v5159_v47 = vld [vmem:[#allocation5 + $0x10] sm:$0xff]  }
 0x2eb   :  { %4741 = vmatpush3.bf16.msra.mxu1 %v912_v53  ;;  %v5165_v53 = vld [vmem:[#allocation5 + $0x60] sm:$0xff]  }
 0x2ec   :  { %v6176_v58 = vpop.f32.mrb[24].mxu1  ;;  %v855_v60 = vpop.f32.mrb[40].mxu0 }
 0x2ed   :  { %v744_v61 = vpop.f32.mrb[25].mxu1  ;;  %v857_v63 = vpop.f32.mrb[41].mxu0 }
 0x2ee   :  { %v6178_v0 = vpop.f32.mrb[26].mxu1  ;;  %v859_v5 = vpop.f32.mrb[42].mxu0 }
 0x2ef   :  { %v916_v6 = vpack.c.bf16 %v859_v5, %v855_v60  ;;  %v748_v7 = vpop.f32.mrb[27].mxu1  ;;  %v861_v11 = vpop.f32.mrb[43].mxu0  ;;  %v5163_v60 = vld [vmem:[#allocation5 + $0x20] sm:$0xff]   ;;  %v5167_v5 = vld [vmem:[#allocation5 + $0x30] sm:$0xff]  }
 0x2f0   :  { %v915_v12 = vpack.c.bf16 %v748_v7, %v744_v61  ;;  %v917_v13 = vpack.c.bf16 %v861_v11, %v857_v63  ;;  %v5164_v61 = vld [vmem:[#allocation5 + $0x28] sm:$0xff]   ;;  %v5169_v63 = vld [vmem:[#allocation5 + $0x70] sm:$0xff]   ;;  %v5175_v11 = vld [vmem:[#allocation5 + $0xa0] sm:$0xff]  }
 0x2f1   :  { %4774 = vmatprep.subr.bf16.mxu0 %v916_v6  ;;  %v5173_v7 = vld [vmem:[#allocation5 + $0x90] sm:$0xff]  }
 0x2f2   :  { %4742 = vmatprep.subr.bf16.mxu1 %v915_v12  ;;  %4775 = vmatpush3.bf16.msra.mxu0 %v916_v6  ;;  %v5171_v6 = vld [vmem:[#allocation5 + $0x80] sm:$0xff]  }
 0x2f3   :  { %4743 = vmatpush3.bf16.msra.mxu1 %v915_v12  ;;  %v5176_v12 = vld [vmem:[#allocation5 + $0xa8] sm:$0xff]  }
 0x2f4   :  { %v6180_v16 = vpop.f32.mrb[28].mxu1  ;;  %v865_v19 = vpop.f32.mrb[44].mxu0 }
 0x2f5   :  { %v754_v26 = vpop.f32.mrb[29].mxu1  ;;  %v867_v27 = vpop.f32.mrb[45].mxu0 }
 0x2f6   :  { %v6182_v29 = vpop.f32.mrb[30].mxu1  ;;  %v869_v31 = vpop.f32.mrb[46].mxu0 }
 0x2f7   :  { %v919_v33 = vpack.c.bf16 %v869_v31, %v865_v19  ;;  %v758_v34 = vpop.f32.mrb[31].mxu1  ;;  %v871_v35 = vpop.f32.mrb[47].mxu0  ;;  %v5178_v19 = vld [vmem:[#allocation5 + $0xb8] sm:$0xff]  }
 0x2f8   :  { %v918_v36 = vpack.c.bf16 %v758_v34, %v754_v26  ;;  %v920_v41 = vpack.c.bf16 %v871_v35, %v867_v27 }
 0x2f9   :  { %4776 = vmatprep.subr.bf16.mxu0 %v919_v33 }
 0x2fa   :  { %4744 = vmatprep.subr.bf16.mxu1 %v918_v36  ;;  %4777 = vmatpush3.bf16.msra.mxu0 %v919_v33 }
 0x2fb   :  { %4745 = vmatpush3.bf16.msra.mxu1 %v918_v36 }
 0x2fc   :  { %4794 = vmatprep.subr.bf16.mxu1 %v6144_v38 }
 0x2fd   :  { %4779 = vmatmul.mubr.bf16.vlgmr.msra.gmra.mrb[48].mxu0 %v5158_v42 }
 0x2fe   :  { %4747 = vmatmul.mubr.bf16.vlgmr.msra.gmra.mrb[32].mxu1 %v5156_v44  ;;  %4782 = vmatprep.mubr.bf16.mxu0 %v5161_v46 }
 0x2ff   :  { %4795 = vmatpush3.bf16.msra.mxu1 %v6144_v38  ;;  %4750 = vmatprep.mubr.bf16.mxu1 %v5159_v47  ;;  %v5166_v38 = vld [vmem:[#allocation5 + $0x68] sm:$0xff]  }
 0x300   :  { %4796 = vmatprep.subr.bf16.mxu1 %v6150_v50 }
 0x303   :  { %4797 = vmatpush3.bf16.msra.mxu1 %v6150_v50  ;;  %v5170_v50 = vld [vmem:[#allocation5 + $0x78] sm:$0xff]  }
 0x304   :  { %4798 = vmatprep.subr.bf16.mxu1 %v6156_v1 }
 0x305   :  { %4783 = vmatmul.mubr.bf16.gmra.mrb[52].mxu0 %v5162_v49 }
 0x306   :  { %4751 = vmatmul.mubr.bf16.gmra.mrb[36].mxu1 %v5160_v52  ;;  %4786 = vmatprep.mubr.bf16.mxu0 %v5165_v53 }
 0x307   :  { %4799 = vmatpush3.bf16.msra.mxu1 %v6156_v1  ;;  %4754 = vmatprep.mubr.bf16.mxu1 %v5163_v60  ;;  %v5168_v1 = vld [vmem:[#allocation5 + $0x38] sm:$0xff]  }
 0x308   :  { %4800 = vmatprep.subr.bf16.mxu1 %v6162_v22 }
 0x30b   :  { %4801 = vmatpush3.bf16.msra.mxu1 %v6162_v22  ;;  %v5172_v22 = vld [vmem:[#allocation5 + $0x88] sm:$0xff]  }
 0x30c   :  { %4802 = vmatprep.subr.bf16.mxu1 %v6168_v37 }
 0x30d   :  { %4787 = vmatmul.mubr.bf16.gmra.mrb[56].mxu0 %v5166_v38 }
 0x30e   :  { %4755 = vmatmul.mubr.bf16.gmra.mrb[40].mxu1 %v5164_v61  ;;  %4790 = vmatprep.mubr.bf16.mxu0 %v5169_v63 }
 0x30f   :  { %4803 = vmatpush3.bf16.msra.mxu1 %v6168_v37  ;;  %4758 = vmatprep.mubr.bf16.mxu1 %v5167_v5  ;;  %v5174_v37 = vld [vmem:[#allocation5 + $0x98] sm:$0xff]  }
 0x310   :  { %4804 = vmatprep.subr.bf16.mxu1 %v6174_v56 }
 0x313   :  { %4805 = vmatpush3.bf16.msra.mxu1 %v6174_v56  ;;  %v5177_v56 = vld [vmem:[#allocation5 + $0xb0] sm:$0xff]  }
 0x314   :  { %4806 = vmatprep.subr.bf16.mxu1 %v917_v13 }
 0x315   :  { %4791 = vmatmul.mubr.bf16.gmra.mrb[60].mxu0 %v5170_v50 }
 0x316   :  { %4759 = vmatmul.mubr.bf16.gmra.mrb[44].mxu1 %v5168_v1  ;;  %1941 = vmatprep.mubr.bf16.mxu0 %v5779_v48 }
 0x317   :  { %4807 = vmatpush3.bf16.msra.mxu1 %v917_v13  ;;  %4810 = vmatprep.mubr.bf16.mxu1 %v5171_v6  ;;  %v6198_v13 = vld [vmem:[#allocation13] ss:$0 sm:$0xff] }
 0x318   :  { %4808 = vmatprep.subr.bf16.mxu1 %v920_v41  ;;  %v883_v26 = vadd.f32 %v6198_v13, %v6146_v39  ;;  %v881_v31 = vadd.f32 %v6198_v13, %v6140_v28  ;;  %v884_v35 = vadd.f32 %v6198_v13, %v6148_v43  ;;  %v882_v44 = vadd.f32 %v6198_v13, %v6142_v32 }
 0x319   :  { %v887_v43 = vadd.f32 %v6198_v13, %v6158_v4  ;;  %v885_v32 = vadd.f32 %v6198_v13, %v6152_v51  ;;  %v888_v1 = vadd.f32 %v6198_v13, %v6160_v8  ;;  %v891_v8 = vadd.f32 %v6198_v13, %v6170_v40 }
 0x31b   :  { %4809 = vmatpush3.bf16.msra.mxu1 %v920_v41 }
 0x31e   :  { %4811 = vmatmul.mubr.bf16.vlgmr.msra.gmra.mrb[48].mxu1 %v5172_v22 }
 0x31f   :  { %4814 = vmatprep.mubr.bf16.mxu1 %v5173_v7 }
 0x326   :  { %4815 = vmatmul.mubr.bf16.gmra.mrb[52].mxu1 %v5174_v37  ;;  %v886_v37 = vadd.f32 %v6198_v13, %v6154_v57  ;;  %v889_v57 = vadd.f32 %v6198_v13, %v6164_v25 }
 0x327   :  { %4818 = vmatprep.mubr.bf16.mxu1 %v5175_v11 }
 0x32e   :  { %4819 = vmatmul.mubr.bf16.gmra.mrb[56].mxu1 %v5176_v12 }
 0x32f   :  { %4822 = vmatprep.mubr.bf16.mxu1 %v5177_v56 }
 0x336   :  { %4823 = vmatmul.mubr.bf16.gmra.mrb[60].mxu1 %v5178_v19 }
 0x337   :  { %2054 = vmatprep.mubr.bf16.mxu1 %v5779_v48 }
 0x3d0   :  { %v4780_v27 = vpop.f32.mrb[48].mxu0 }
 0x3d1   :  { %v4748_v33 = vpop.f32.mrb[32].mxu1  ;;  %v1197_v34 = vpop.f32.mrb[49].mxu0 }
 0x3d2   :  { %v1084_v36 = vadd.f32 %v4748_v33, %v883_v26  ;;  %v1019_v41 = vpop.f32.mrb[33].mxu1  ;;  %v4781_v42 = vpop.f32.mrb[50].mxu0 }
 0x3d3   :  { %v1082_v46 = vadd.f32 %v1019_v41, %v881_v31  ;;  %v4749_v47 = vpop.f32.mrb[34].mxu1  ;;  %v1200_v49 = vpop.f32.mrb[51].mxu0  ;;  %v892_v41 = vadd.f32 %v6198_v13, %v6172_v45  ;;  %v895_v45 = vadd.f32 %v6198_v13, %v6180_v16 }
 0x3d4   :  { %v1085_v52 = vadd.f32 %v4749_v47, %v884_v35  ;;  %v6208_v39 = vadd.f32 %v4780_v27, %v1084_v36  ;;  %v1022_v53 = vpop.f32.mrb[35].mxu1  ;;  %v890_v47 = vadd.f32 %v6198_v13, %v6166_v30 }
 0x3d5   :  { %v1083_v60 = vadd.f32 %v1022_v53, %v882_v44  ;;  %v6210_v28 = vadd.f32 %v1197_v34, %v1082_v46 }
 0x3d6   :  { %v6212_v38 = vadd.f32 %v4781_v42, %v1085_v52 }
 0x3d7   :  { %v6214_v61 = vadd.f32 %v1200_v49, %v1083_v60 }
 0x3d8   :  { %v4784_v63 = vpop.f32.mrb[52].mxu0 }
 0x3d9   :  { %v4752_v5 = vpop.f32.mrb[36].mxu1  ;;  %v1213_v50 = vpop.f32.mrb[53].mxu0 }
 0x3da   :  { %v1088_v6 = vadd.f32 %v4752_v5, %v887_v43  ;;  %v1035_v22 = vpop.f32.mrb[37].mxu1  ;;  %v4785_v7 = vpop.f32.mrb[54].mxu0 }
 0x3db   :  { %v1086_v11 = vadd.f32 %v1035_v22, %v885_v32  ;;  %v4753_v12 = vpop.f32.mrb[38].mxu1  ;;  %v1216_v56 = vpop.f32.mrb[55].mxu0  ;;  %v896_v22 = vadd.f32 %v6198_v13, %v6182_v29 }
 0x3dc   :  { %v1089_v19 = vadd.f32 %v4753_v12, %v888_v1  ;;  %v6224_v4 = vadd.f32 %v4784_v63, %v1088_v6  ;;  %v1038_v26 = vpop.f32.mrb[39].mxu1  ;;  %v893_v1 = vadd.f32 %v6198_v13, %v6176_v58  ;;  %v894_v12 = vadd.f32 %v6198_v13, %v6178_v0 }
 0x3dd   :  { %v1087_v27 = vadd.f32 %v1038_v26, %v886_v37  ;;  %v6226_v51 = vadd.f32 %v1213_v50, %v1086_v11 }
 0x3de   :  { %v6228_v31 = vadd.f32 %v4785_v7, %v1089_v19 }
 0x3df   :  { %v6230_v33 = vadd.f32 %v1216_v56, %v1087_v27 }
 0x3e0   :  { %v4788_v34 = vpop.f32.mrb[56].mxu0 }
 0x3e1   :  { %v4756_v35 = vpop.f32.mrb[40].mxu1  ;;  %v1229_v36 = vpop.f32.mrb[57].mxu0 }
 0x3e2   :  { %v1092_v42 = vadd.f32 %v4756_v35, %v891_v8  ;;  %v1051_v44 = vpop.f32.mrb[41].mxu1  ;;  %v4789_v46 = vpop.f32.mrb[58].mxu0 }
 0x3e3   :  { %v1090_v49 = vadd.f32 %v1051_v44, %v889_v57  ;;  %v4757_v52 = vpop.f32.mrb[42].mxu1  ;;  %v1232_v53 = vpop.f32.mrb[59].mxu0 }
 0x3e4   :  { %v1093_v60 = vadd.f32 %v4757_v52, %v892_v41  ;;  %v1270_v40 = vadd.f32 %v4788_v34, %v1092_v42  ;;  %v1054_v43 = vpop.f32.mrb[43].mxu1 }
 0x3e5   :  { %v1091_v63 = vadd.f32 %v1054_v43, %v890_v47  ;;  %v1268_v32 = vadd.f32 %v1229_v36, %v1090_v49 }
 0x3e6   :  { %v6240_v25 = vadd.f32 %v4789_v46, %v1093_v60 }
 0x3e7   :  { %v6242_v5 = vadd.f32 %v1232_v53, %v1091_v63 }
 0x3e8   :  { %v4792_v50 = vpop.f32.mrb[60].mxu0 }
 0x3e9   :  { %v4760_v30 = vpop.f32.mrb[44].mxu1  ;;  %v1245_v6 = vpop.f32.mrb[61].mxu0 }
 0x3ea   :  { %v1096_v7 = vadd.f32 %v4760_v30, %v895_v45  ;;  %v1067_v37 = vpop.f32.mrb[45].mxu1  ;;  %v4793_v11 = vpop.f32.mrb[62].mxu0 }
 0x3eb   :  { %v1094_v56 = vadd.f32 %v1067_v37, %v893_v1  ;;  %v4761_v19 = vpop.f32.mrb[46].mxu1  ;;  %v1248_v26 = vpop.f32.mrb[63].mxu0 }
 0x3ec   :  { %v1097_v27 = vadd.f32 %v4761_v19, %v896_v22  ;;  %v1274_v16 = vadd.f32 %v4792_v50, %v1096_v7  ;;  %v1070_v8 = vpop.f32.mrb[47].mxu1 }
 0x3ed   :  { %v1095_v34 = vadd.f32 %v1070_v8, %v894_v12  ;;  %v1272_v57 = vadd.f32 %v1245_v6, %v1094_v56 }
 0x3ee   :  { %v6252_v58 = vadd.f32 %v4793_v11, %v1097_v27 }
 0x3ef   :  { %v6254_v35 = vadd.f32 %v1248_v26, %v1095_v34 }
 0x3f1   :  { %v4812_v36 = vpop.f32.mrb[48].mxu1 }
 0x3f2   :  { %v1440_v29 = vadd.f32 %v4812_v36, %v6208_v39  ;;  %v1375_v41 = vpop.f32.mrb[49].mxu1 }
 0x3f3   :  { %v1438_v42 = vadd.f32 %v1375_v41, %v6210_v28  ;;  %v4813_v44 = vpop.f32.mrb[50].mxu1 }
 0x3f4   :  { %v1441_v0 = vadd.f32 %v4813_v44, %v6212_v38  ;;  %v1378_v13 = vpop.f32.mrb[51].mxu1  ;;  %v6260_v46 = vadd.f32 %v1440_v29, %v6076_v62  ;;  %v5182_v44 = vld [vmem:[#allocation11 + $0x108] ss:$16 sps:$4 sm:$0xff]  }
 0x3f5   :  { %v1439_v47 = vadd.f32 %v1378_v13, %v6214_v61  ;;  %v6264_v49 = vadd.f32 %v1438_v42, %v6063_v54  ;;  %v5181_v42 = vld [vmem:[#allocation11 + $0x104] ss:$16 sps:$4 sm:$0xff]  }
 0x3f6   :  { %v1472_v52 = vmax.f32 %v6260_v46, 0.0  ;;  %v6268_v53 = vadd.f32 %v1441_v0, %v6073_v59  ;;  %v5184_v0 = vld [vmem:[#allocation11 + $0x10c] ss:$16 sps:$4 sm:$0xff]   ;;  %v5187_v13 = vld [vmem:[#allocation11 + $0x124] ss:$16 sps:$4 sm:$0xff]   ;;  %1909 = vmatprep.subr.bf16.mxu0 %v5181_v42 }
 0x3f7   :  { %v1470_v39 = vmax.f32 %v6264_v49, 0.0  ;;  %v6272_v28 = vadd.f32 %v1439_v47, %v6066_v55  ;;  %2022 = vmatprep.subr.bf16.mxu1 %v5184_v0  ;;  %v5185_v47 = vld [vmem:[#allocation11 + $0x120] ss:$16 sps:$4 sm:$0xff]   ;;  %v5193_v0 = vld [vmem:[#allocation11 + $0x144] ss:$16 sps:$4 sm:$0xff]  }
 0x3f8   :  { %1490 = vadd.xlane.f32.xlu1 %v1472_v52  ;;  %v1473_v61 = vmax.f32 %v6268_v53, 0.0  ;;  %2023 = vmatpush1.bf16.msra.mxu1 %v5182_v44 }
 0x3f9   :  { %1486 = vadd.xlane.f32.xlu0 %v1470_v39  ;;  %v4816_v62 = vpop.f32.mrb[52].mxu1  ;;  %v1471_v43 = vmax.f32 %v6272_v28, 0.0 }
 0x3fa   :  { %v1444_v54 = vadd.f32 %v4816_v62, %v6224_v4  ;;  %v1391_v38 = vpop.f32.mrb[53].mxu1  ;;  %v5188_v62 = vld [vmem:[#allocation11 + $0x128] ss:$16 sps:$4 sm:$0xff]  }
 0x3fb   :  { %v1442_v59 = vadd.f32 %v1391_v38, %v6226_v51  ;;  %v4817_v60 = vpop.f32.mrb[54].mxu1 }
 0x3fc   :  { %v1445_v55 = vadd.f32 %v4817_v60, %v6228_v31  ;;  %1492 = vadd.xlane.f32.xlu1 %v1473_v61  ;;  %v1394_v63 = vpop.f32.mrb[55].mxu1  ;;  %v6296_v1 = vadd.f32 %v1444_v54, %v6093_v9 }
 0x3fd   :  { %v1443_v45 = vadd.f32 %v1394_v63, %v6230_v33  ;;  %1488 = vadd.xlane.f32.xlu0 %v1471_v43  ;;  %v6289_v4 = vadd.f32 %v1442_v59, %v6083_v2 }
 0x3fe   :  { %v6302_v30 = vadd.f32 %v1445_v55, %v6096_v10  ;;  %v1476_v7 = vmax.f32 %v6296_v1, 0.0 }
 0x3ff   :  { %v1474_v50 = vmax.f32 %v6289_v4, 0.0  ;;  %v6293_v51 = vadd.f32 %v1443_v45, %v6086_v3 }
 0x400   :  { %v1477_v10 = vmax.f32 %v6302_v30, 0.0 }
 0x401   :  { %1494 = vadd.xlane.f32.xlu0 %v1474_v50  ;;  %v4820_v31 = vpop.f32.mrb[56].mxu1  ;;  %v1475_v33 = vmax.f32 %v6293_v51, 0.0 }
 0x402   :  { %v1448_v6 = vadd.f32 %v4820_v31, %v1270_v40  ;;  %v1407_v2 = vpop.f32.mrb[57].mxu1 }
 0x403   :  { %v1446_v22 = vadd.f32 %v1407_v2, %v1268_v32  ;;  %1496 = vadd.xlane.f32.xlu1 %v1475_v33  ;;  %v4821_v3 = vpop.f32.mrb[58].mxu1 }
 0x404   :  { %v1449_v9 = vadd.f32 %v4821_v3, %v6240_v25  ;;  %v1410_v37 = vpop.f32.mrb[59].mxu1  ;;  %v6322_v25 = vadd.f32 %v1448_v6, %v6113_v17 }
 0x405   :  { %v1447_v11 = vadd.f32 %v1410_v37, %v6242_v5  ;;  %1498 = vadd.xlane.f32.xlu0 %v1476_v7  ;;  %v6313_v40 = vadd.f32 %v1446_v22, %v6103_v14 }
 0x406   :  { %v6328_v14 = vadd.f32 %v1449_v9, %v6116_v18  ;;  %v1480_v8 = vmax.f32 %v6322_v25, 0.0 }
 0x407   :  { %1500 = vadd.xlane.f32.xlu1 %v1477_v10  ;;  %v1478_v32 = vmax.f32 %v6313_v40, 0.0  ;;  %v6319_v12 = vadd.f32 %v1447_v11, %v6106_v15 }
 0x408   :  { %v1481_v18 = vmax.f32 %v6328_v14, 0.0 }
 0x409   :  { %1502 = vadd.xlane.f32.xlu0 %v1478_v32  ;;  %v4824_v5 = vpop.f32.mrb[60].mxu1  ;;  %v1479_v56 = vmax.f32 %v6319_v12, 0.0 }
 0x40a   :  { %v1452_v19 = vadd.f32 %v4824_v5, %v1274_v16  ;;  %v1423_v26 = vpop.f32.mrb[61].mxu1 }
 0x40b   :  { %v1450_v27 = vadd.f32 %v1423_v26, %v1272_v57  ;;  %1504 = vadd.xlane.f32.xlu1 %v1479_v56  ;;  %v4825_v15 = vpop.f32.mrb[62].mxu1 }
 0x40c   :  { %v1453_v17 = vadd.f32 %v4825_v15, %v6252_v58  ;;  %v1426_v34 = vpop.f32.mrb[63].mxu1  ;;  %v6348_v58 = vadd.f32 %v1452_v19, %v6133_v23  ;;  %v5179_v23 = vld [vmem:[#allocation11 + $0x100] ss:$16 sps:$4 sm:$0xff]  }
 0x40d   :  { %v1451_v36 = vadd.f32 %v1426_v34, %v6254_v35  ;;  %1506 = vadd.xlane.f32.xlu0 %v1480_v8  ;;  %v6339_v16 = vadd.f32 %v1450_v27, %v6123_v20  ;;  %1910 = vmatpush1.bf16.msra.mxu0 %v5179_v23 }
 0x40e   :  { %v6354_v41 = vadd.f32 %v1453_v17, %v6136_v24  ;;  %v1484_v20 = vmax.f32 %v6348_v58, 0.0  ;;  %v5190_v24 = vld [vmem:[#allocation11 + $0x12c] ss:$16 sps:$4 sm:$0xff]   ;;  %1911 = vmatprep.subr.bf16.mxu0 %v5187_v13  ;;  %v5211_v58 = vld [vmem:[#allocation11 + $0x1a4] ss:$16 sps:$4 sm:$0xff]  }
 0x40f   :  { %1508 = vadd.xlane.f32.xlu1 %v1481_v18  ;;  %v1482_v57 = vmax.f32 %v6339_v16, 0.0  ;;  %v6345_v29 = vadd.f32 %v1451_v36, %v6126_v21  ;;  %2024 = vmatprep.subr.bf16.mxu1 %v5190_v24  ;;  %v5196_v13 = vld [vmem:[#allocation11 + $0x14c] ss:$16 sps:$4 sm:$0xff]  }
 0x410   :  { %v1485_v21 = vmax.f32 %v6354_v41, 0.0  ;;  %2025 = vmatpush1.bf16.msra.mxu1 %v5188_v62  ;;  %v5217_v41 = vld [vmem:[#allocation11 + $0x1c4] ss:$16 sps:$4 sm:$0xff]  }
 0x411   :  { %1510 = vadd.xlane.f32.xlu0 %v1482_v57  ;;  %v1483_v35 = vmax.f32 %v6345_v29, 0.0  ;;  %1912 = vmatpush1.bf16.msra.mxu0 %v5185_v47  ;;  %v5194_v47 = vld [vmem:[#allocation11 + $0x148] ss:$16 sps:$4 sm:$0xff]  }
 0x412   :  { %1913 = vmatprep.subr.bf16.mxu0 %v5193_v0  ;;  %2026 = vmatprep.subr.bf16.mxu1 %v5196_v13 }
 0x413   :  { %1512 = vadd.xlane.f32.xlu1 %v1483_v35 }
 0x414   :  { %2027 = vmatpush1.bf16.msra.mxu1 %v5194_v47 }
 0x415   :  { %1514 = vadd.xlane.f32.xlu0 %v1484_v20 }
 0x417   :  { %1516 = vadd.xlane.f32.xlu1 %v1485_v21 }
 0x485   :  { %v1491_v54 = vpop.xlane.xlu1 %1490 }
 0x486   :  { %v1487_v38 = vpop.xlane.xlu0 %1486  ;;  %v1520_v59 = vmul.f32 0.0078125, %v1491_v54 }
 0x487   :  { %v1518_v60 = vmul.f32 0.0078125, %v1487_v38 }
 0x488   :  { %v6372_v22 = vsub.f32 %v1472_v52, %v1520_v59 }
 0x489   :  { %v1493_v55 = vpop.xlane.xlu1 %1492  ;;  %v6366_v63 = vsub.f32 %v1470_v39, %v1518_v60  ;;  %v5199_v60 = vld [vmem:[#allocation11 + $0x164] ss:$16 sps:$4 sm:$0xff]  }
 0x48a   :  { %v1489_v45 = vpop.xlane.xlu0 %1488  ;;  %v1521_v31 = vmul.f32 0.0078125, %v1493_v55  ;;  %v1552_v49 = vmul.f32 %v6372_v22, %v6372_v22  ;;  %v5202_v55 = vld [vmem:[#allocation11 + $0x16c] ss:$16 sps:$4 sm:$0xff]  }
 0x48b   :  { %v1519_v6 = vmul.f32 0.0078125, %v1489_v45  ;;  %v1550_v2 = vmul.f32 %v6366_v63, %v6366_v63  ;;  %2028 = vmatprep.subr.bf16.mxu1 %v5202_v55 }
 0x48c   :  { %v6384_v11 = vsub.f32 %v1473_v61, %v1521_v31  ;;  %v5197_v31 = vld [vmem:[#allocation11 + $0x160] ss:$16 sps:$4 sm:$0xff]  }
 0x48d   :  { %1566 = vadd.xlane.f32.xlu0 %v1550_v2  ;;  %v6376_v3 = vsub.f32 %v1471_v43, %v1519_v6  ;;  %v5200_v6 = vld [vmem:[#allocation11 + $0x168] ss:$16 sps:$4 sm:$0xff]  }
 0x48e   :  { %v1495_v9 = vpop.xlane.xlu0 %1494  ;;  %v1553_v26 = vmul.f32 %v6384_v11, %v6384_v11  ;;  %2029 = vmatpush1.bf16.msra.mxu1 %v5200_v6  ;;  %v6461_v6 = vld [vmem:[#allocation14] ss:$0 sm:$0xff] }
 0x48f   :  { %v1522_v37 = vmul.f32 0.0078125, %v1495_v9  ;;  %v1551_v39 = vmul.f32 %v6376_v3, %v6376_v3 }
 0x490   :  { %v1497_v46 = vpop.xlane.xlu1 %1496 }
 0x491   :  { %v1523_v52 = vmul.f32 0.0078125, %v1497_v46  ;;  %1570 = vadd.xlane.f32.xlu0 %v1552_v49  ;;  %1568 = vadd.xlane.f32.xlu1 %v1551_v39  ;;  %v6388_v28 = vsub.f32 %v1474_v50, %v1522_v37  ;;  %v5205_v49 = vld [vmem:[#allocation11 + $0x184] ss:$16 sps:$4 sm:$0xff]   ;;  %v5208_v39 = vld [vmem:[#allocation11 + $0x18c] ss:$16 sps:$4 sm:$0xff]  }
 0x492   :  { %v1499_v43 = vpop.xlane.xlu0 %1498  ;;  %v5203_v46 = vld [vmem:[#allocation11 + $0x180] ss:$16 sps:$4 sm:$0xff]   ;;  %2030 = vmatprep.subr.bf16.mxu1 %v5208_v39 }
 0x493   :  { %v1524_v5 = vmul.f32 0.0078125, %v1499_v43  ;;  %v1554_v19 = vmul.f32 %v6388_v28, %v6388_v28  ;;  %v6396_v53 = vsub.f32 %v1475_v33, %v1523_v52  ;;  %v5206_v52 = vld [vmem:[#allocation11 + $0x188] ss:$16 sps:$4 sm:$0xff]  }
 0x494   :  { %v1501_v61 = vpop.xlane.xlu1 %1500  ;;  %2031 = vmatpush1.bf16.msra.mxu1 %v5206_v52 }
 0x495   :  { %v1525_v27 = vmul.f32 0.0078125, %v1501_v61  ;;  %1574 = vadd.xlane.f32.xlu0 %v1554_v19  ;;  %1572 = vadd.xlane.f32.xlu1 %v1553_v26  ;;  %v6400_v4 = vsub.f32 %v1476_v7, %v1524_v5  ;;  %v1555_v34 = vmul.f32 %v6396_v53, %v6396_v53  ;;  %v5209_v5 = vld [vmem:[#allocation11 + $0x1a0] ss:$16 sps:$4 sm:$0xff]   ;;  %v5212_v19 = vld [vmem:[#allocation11 + $0x1a8] ss:$16 sps:$4 sm:$0xff]  }
 0x496   :  { %v1503_v50 = vpop.xlane.xlu0 %1502  ;;  %v5215_v61 = vld [vmem:[#allocation11 + $0x1c0] ss:$16 sps:$4 sm:$0xff]  }
 0x497   :  { %v1526_v15 = vmul.f32 0.0078125, %v1503_v50  ;;  %v1556_v17 = vmul.f32 %v6400_v4, %v6400_v4  ;;  %v6408_v51 = vsub.f32 %v1477_v10, %v1525_v27  ;;  %v5218_v27 = vld [vmem:[#allocation11 + $0x1c8] ss:$16 sps:$4 sm:$0xff]   ;;  %v5223_v50 = vld [vmem:[#allocation11 + $0x1e4] ss:$16 sps:$4 sm:$0xff]  }
 0x498   :  { %v1505_v33 = vpop.xlane.xlu1 %1504 }
 0x499   :  { %v1527_v36 = vmul.f32 0.0078125, %v1505_v33  ;;  %1578 = vadd.xlane.f32.xlu0 %v1556_v17  ;;  %1576 = vadd.xlane.f32.xlu1 %v1555_v34  ;;  %v6412_v1 = vsub.f32 %v1478_v32, %v1526_v15  ;;  %v1557_v44 = vmul.f32 %v6408_v51, %v6408_v51  ;;  %v5191_v32 = vld [vmem:[#allocation11 + $0x140] ss:$16 sps:$4 sm:$0xff]   ;;  %v5226_v15 = vld [vmem:[#allocation11 + $0x1ec] ss:$16 sps:$4 sm:$0xff]  }
 0x49a   :  { %v1507_v7 = vpop.xlane.xlu0 %1506  ;;  %1914 = vmatpush1.bf16.msra.mxu0 %v5191_v32  ;;  %v5221_v17 = vld [vmem:[#allocation11 + $0x1e0] ss:$16 sps:$4 sm:$0xff]   ;;  %v5224_v34 = vld [vmem:[#allocation11 + $0x1e8] ss:$16 sps:$4 sm:$0xff]  }
 0x49b   :  { %v1528_v23 = vmul.f32 0.0078125, %v1507_v7  ;;  %v1558_v42 = vmul.f32 %v6412_v1, %v6412_v1  ;;  %v6420_v30 = vsub.f32 %v1479_v56, %v1527_v36  ;;  %1915 = vmatprep.subr.bf16.mxu0 %v5199_v60 }
 0x49c   :  { %v1509_v10 = vpop.xlane.xlu1 %1508 }
 0x49d   :  { %v1529_v24 = vmul.f32 0.0078125, %v1509_v10  ;;  %1582 = vadd.xlane.f32.xlu0 %v1558_v42  ;;  %1580 = vadd.xlane.f32.xlu1 %v1557_v44  ;;  %v6424_v40 = vsub.f32 %v1480_v8, %v1528_v23  ;;  %v1559_v56 = vmul.f32 %v6420_v30, %v6420_v30 }
 0x49e   :  { %v1511_v62 = vpop.xlane.xlu0 %1510  ;;  %1916 = vmatpush1.bf16.msra.mxu0 %v5197_v31 }
 0x49f   :  { %v1530_v54 = vmul.f32 0.0078125, %v1511_v62  ;;  %v1560_v12 = vmul.f32 %v6424_v40, %v6424_v40  ;;  %v6432_v38 = vsub.f32 %v1481_v18, %v1529_v24  ;;  %1917 = vmatprep.subr.bf16.mxu0 %v5205_v49 }
 0x4a0   :  { %v1513_v25 = vpop.xlane.xlu1 %1512 }
 0x4a1   :  { %v1531_v8 = vmul.f32 0.0078125, %v1513_v25  ;;  %1586 = vadd.xlane.f32.xlu0 %v1560_v12  ;;  %1584 = vadd.xlane.f32.xlu1 %v1559_v56  ;;  %v6436_v59 = vsub.f32 %v1482_v57, %v1530_v54  ;;  %v1561_v18 = vmul.f32 %v6432_v38, %v6432_v38 }
 0x4a2   :  { %v1515_v45 = vpop.xlane.xlu0 %1514  ;;  %1918 = vmatpush1.bf16.msra.mxu0 %v5203_v46  ;;  %v6465_v46 = vld [vmem:[#allocation16] ss:$0 sm:$0xff] }
 0x4a3   :  { %v1532_v2 = vmul.f32 0.0078125, %v1515_v45  ;;  %v1562_v14 = vmul.f32 %v6436_v59, %v6436_v59  ;;  %v6444_v9 = vsub.f32 %v1483_v35, %v1531_v8  ;;  %1919 = vmatprep.subr.bf16.mxu0 %v5211_v58 }
 0x4a4   :  { %v1517_v16 = vpop.xlane.xlu1 %1516 }
 0x4a5   :  { %v1533_v57 = vmul.f32 0.0078125, %v1517_v16  ;;  %1590 = vadd.xlane.f32.xlu0 %v1562_v14  ;;  %1588 = vadd.xlane.f32.xlu1 %v1561_v18  ;;  %v6448_v37 = vsub.f32 %v1484_v20, %v1532_v2  ;;  %v1563_v35 = vmul.f32 %v6444_v9, %v6444_v9  ;;  %v5214_v20 = vld [vmem:[#allocation11 + $0x1ac] ss:$16 sps:$4 sm:$0xff]  }
 0x4a6   :  { %2032 = vmatprep.subr.bf16.mxu1 %v5214_v20  ;;  %1920 = vmatpush1.bf16.msra.mxu0 %v5209_v5 }
 0x4a7   :  { %v1564_v29 = vmul.f32 %v6448_v37, %v6448_v37  ;;  %v6456_v43 = vsub.f32 %v1485_v21, %v1533_v57  ;;  %2033 = vmatpush1.bf16.msra.mxu1 %v5212_v19  ;;  %v5220_v21 = vld [vmem:[#allocation11 + $0x1cc] ss:$16 sps:$4 sm:$0xff]   ;;  %1921 = vmatprep.subr.bf16.mxu0 %v5217_v41 }
 0x4a8   :  { %2034 = vmatprep.subr.bf16.mxu1 %v5220_v21 }
 0x4a9   :  { %1594 = vadd.xlane.f32.xlu0 %v1564_v29  ;;  %1592 = vadd.xlane.f32.xlu1 %v1563_v35  ;;  %v1565_v26 = vmul.f32 %v6456_v43, %v6456_v43 }
 0x4aa   :  { %1922 = vmatpush1.bf16.msra.mxu0 %v5215_v61 }
 0x4ab   :  { %2035 = vmatpush1.bf16.msra.mxu1 %v5218_v27  ;;  %1923 = vmatprep.subr.bf16.mxu0 %v5223_v50 }
 0x4ac   :  { %2036 = vmatprep.subr.bf16.mxu1 %v5226_v15 }
 0x4ad   :  { %1596 = vadd.xlane.f32.xlu1 %v1565_v26 }
 0x4ae   :  { %1924 = vmatpush1.bf16.msra.mxu0 %v5221_v17 }
 0x4af   :  { %2037 = vmatpush1.bf16.msra.mxu1 %v5224_v34 }
 0x51a   :  { %v1567_v33 = vpop.xlane.xlu0 %1566 }
 0x51b   :  { %v1598_v36 = vmul.f32 0.0078125, %v1567_v33 }
 0x51d   :  { %v1614_v7 = vadd.f32 1e-05, %v1598_v36 }
 0x51e   :  { %v1571_v23 = vpop.xlane.xlu0 %1570  ;;  %v1569_v42 = vpop.xlane.xlu1 %1568 }
 0x51f   :  { %5291 = vrsqrt.f32 %v1614_v7  ;;  %v1600_v44 = vmul.f32 0.0078125, %v1571_v23  ;;  %v1599_v10 = vmul.f32 0.0078125, %v1569_v42 }
 0x521   :  { %v1615_v0 = vadd.f32 1e-05, %v1599_v10  ;;  %v1616_v13 = vadd.f32 1e-05, %v1600_v44 }
 0x522   :  { %v1573_v24 = vpop.xlane.xlu1 %1572  ;;  %v1575_v32 = vpop.xlane.xlu0 %1574 }
 0x523   :  { %v1601_v47 = vmul.f32 0.0078125, %v1573_v24  ;;  %5293 = vrsqrt.f32 %v1615_v0  ;;  %v1602_v54 = vmul.f32 0.0078125, %v1575_v32 }
 0x524   :  { %5295 = vrsqrt.f32 %v1616_v13 }
 0x525   :  { %v1617_v62 = vadd.f32 1e-05, %v1601_v47  ;;  %v1618_v60 = vadd.f32 1e-05, %v1602_v54 }
 0x526   :  { %v1577_v12 = vpop.xlane.xlu1 %1576  ;;  %v1579_v31 = vpop.xlane.xlu0 %1578 }
 0x527   :  { %v1603_v56 = vmul.f32 0.0078125, %v1577_v12  ;;  %5297 = vrsqrt.f32 %v1617_v62  ;;  %v1604_v18 = vmul.f32 0.0078125, %v1579_v31 }
 0x529   :  { %v5292_v25 = vpop.eup %5291  ;;  %v1619_v8 = vadd.f32 1e-05, %v1603_v56  ;;  %v1620_v35 = vadd.f32 1e-05, %v1604_v18 }
 0x52a   :  { %v1581_v55 = vpop.xlane.xlu1 %1580  ;;  %v1646_v45 = vmul.f32 %v5292_v25, %v6366_v63  ;;  %v1583_v58 = vpop.xlane.xlu0 %1582 }
 0x52b   :  { %5299 = vrsqrt.f32 %v1619_v8  ;;  %v1605_v2 = vmul.f32 0.0078125, %v1581_v55  ;;  %v1606_v61 = vmul.f32 0.0078125, %v1583_v58 }
 0x52c   :  { %5301 = vrsqrt.f32 %v1618_v60  ;;  %v1669_v16 = vmul.f32 %v6461_v6, %v1646_v45 }
 0x52d   :  { %v5294_v14 = vpop.eup %5293  ;;  %v1621_v39 = vadd.f32 1e-05, %v1605_v2  ;;  %v1622_v33 = vadd.f32 1e-05, %v1606_v61 }
 0x52e   :  { %v1647_v57 = vmul.f32 %v5294_v14, %v6376_v3  ;;  %v5296_v49 = vpop.eup %5295  ;;  %v1585_v29 = vpop.xlane.xlu1 %1584  ;;  %v6469_v20 = vadd.f32 %v6465_v46, %v1669_v16 }
 0x52f   :  { %v1648_v19 = vmul.f32 %v5296_v49, %v6372_v22  ;;  %5303 = vrsqrt.f32 %v1621_v39  ;;  %v1607_v3 = vmul.f32 0.0078125, %v1585_v29  ;;  %v1587_v36 = vpop.xlane.xlu0 %1586 }
 0x530   :  { %v1670_v52 = vmul.f32 %v6461_v6, %v1647_v57  ;;  %5305 = vrsqrt.f32 %v1620_v35  ;;  %v1608_v13 = vmul.f32 0.0078125, %v1587_v36 }
 0x531   :  { %v5298_v63 = vpop.eup %5297  ;;  %v1671_v50 = vmul.f32 %v6461_v6, %v1648_v19  ;;  %v1623_v17 = vadd.f32 1e-05, %v1607_v3 }
 0x532   :  { %v6472_v5 = vadd.f32 %v6465_v46, %v1670_v52  ;;  %v1649_v26 = vmul.f32 %v5298_v63, %v6384_v11  ;;  %v1589_v22 = vpop.xlane.xlu1 %1588  ;;  %v1624_v54 = vadd.f32 1e-05, %v1608_v13 }
 0x533   :  { %v6487_v7 = vadd.f32 %v6465_v46, %v1671_v50  ;;  %5307 = vrsqrt.f32 %v1623_v17  ;;  %v1609_v42 = vmul.f32 0.0078125, %v1589_v22  ;;  %v1591_v12 = vpop.xlane.xlu0 %1590 }
 0x534   :  { %v1708_v41 = vpack.c.bf16 %v6472_v5, %v6469_v20  ;;  %v1672_v27 = vmul.f32 %v6461_v6, %v1649_v26  ;;  %5309 = vrsqrt.f32 %v1622_v33  ;;  %v1610_v31 = vmul.f32 0.0078125, %v1591_v12  ;;  %v5388_v12 = vld [vmem:[#allocation5 + $0x40] sm:$0xff]  }
 0x535   :  { %v5300_v21 = vpop.eup %5299  ;;  %v1625_v32 = vadd.f32 1e-05, %v1609_v42 }
 0x536   :  { %1942 = vmatmul.mubr.bf16.vlgmr.msra.gmra.mrb[64].mxu0 %v1708_v41  ;;  %2055 = vmatmul.mubr.bf16.vlgmr.msra.gmra.mrb[64].mxu1 %v1708_v41  ;;  %v5302_v15 = vpop.eup %5301  ;;  %v6483_v11 = vadd.f32 %v6465_v46, %v1672_v27  ;;  %v1651_v34 = vmul.f32 %v5300_v21, %v6396_v53  ;;  %v1626_v57 = vadd.f32 1e-05, %v1610_v31 }
 0x537   :  { %1951 = vmatprep.mubr.bf16.mxu0 %v5779_v48  ;;  %2064 = vmatprep.mubr.bf16.mxu1 %v5779_v48  ;;  %v1650_v23 = vmul.f32 %v5302_v15, %v6388_v28  ;;  %v1593_v28 = vpop.xlane.xlu1 %1592  ;;  %5311 = vrsqrt.f32 %v1625_v32  ;;  %v1595_v49 = vpop.xlane.xlu0 %1594 }
 0x538   :  { %v1709_v44 = vpack.c.bf16 %v6483_v11, %v6487_v7  ;;  %v1674_v10 = vmul.f32 %v6461_v6, %v1651_v34  ;;  %v1611_v8 = vmul.f32 0.0078125, %v1593_v28  ;;  %5313 = vrsqrt.f32 %v1624_v54  ;;  %v5387_v54 = vld [vmem:[#allocation5] sm:$0xff]  }
 0x539   :  { %v5304_v0 = vpop.eup %5303  ;;  %v1673_v53 = vmul.f32 %v6461_v6, %v1650_v23  ;;  %v1612_v19 = vmul.f32 0.0078125, %v1595_v49 }
 0x53a   :  { %v5306_v24 = vpop.eup %5305  ;;  %v6497_v47 = vadd.f32 %v6465_v46, %v1674_v10  ;;  %v1653_v62 = vmul.f32 %v5304_v0, %v6408_v51  ;;  %v1627_v14 = vadd.f32 1e-05, %v1611_v8 }
 0x53b   :  { %v6501_v56 = vadd.f32 %v6465_v46, %v1673_v53  ;;  %v1652_v25 = vmul.f32 %v5306_v24, %v6400_v4  ;;  %v1597_v4 = vpop.xlane.xlu1 %1596  ;;  %v1628_v21 = vadd.f32 1e-05, %v1612_v19 }
 0x53c   :  { %v1676_v55 = vmul.f32 %v6461_v6, %v1653_v62  ;;  %5315 = vrsqrt.f32 %v1627_v14  ;;  %v1613_v29 = vmul.f32 0.0078125, %v1597_v4 }
 0x53d   :  { %v1710_v60 = vpack.c.bf16 %v6497_v47, %v6501_v56  ;;  %v5308_v45 = vpop.eup %5307  ;;  %v1675_v51 = vmul.f32 %v6461_v6, %v1652_v25  ;;  %5317 = vrsqrt.f32 %v1626_v57 }
 0x53e   :  { %1952 = vmatmul.mubr.bf16.gmra.mrb[68].mxu0 %v1709_v44  ;;  %2065 = vmatmul.mubr.bf16.gmra.mrb[68].mxu1 %v1709_v44  ;;  %v5310_v2 = vpop.eup %5309  ;;  %v6511_v18 = vadd.f32 %v6465_v46, %v1676_v55  ;;  %v1655_v16 = vmul.f32 %v5308_v45, %v6420_v30  ;;  %v1629_v26 = vadd.f32 1e-05, %v1613_v29 }
 0x53f   :  { %1961 = vmatprep.mubr.bf16.mxu0 %v5779_v48  ;;  %2074 = vmatprep.mubr.bf16.mxu1 %v5779_v48  ;;  %v6515_v39 = vadd.f32 %v6465_v46, %v1675_v51  ;;  %v1654_v52 = vmul.f32 %v5310_v2, %v6412_v1 }
 0x540   :  { %v1678_v35 = vmul.f32 %v6461_v6, %v1655_v16  ;;  %5319 = vrsqrt.f32 %v1629_v26 }
 0x541   :  { %v1711_v63 = vpack.c.bf16 %v6511_v18, %v6515_v39  ;;  %v5312_v58 = vpop.eup %5311  ;;  %v1677_v30 = vmul.f32 %v6461_v6, %v1654_v52  ;;  %5321 = vrsqrt.f32 %v1628_v21 }
 0x542   :  { %v5314_v3 = vpop.eup %5313  ;;  %v6525_v1 = vadd.f32 %v6465_v46, %v1678_v35  ;;  %v1657_v41 = vmul.f32 %v5312_v58, %v6432_v38 }
 0x543   :  { %v6529_v61 = vadd.f32 %v6465_v46, %v1677_v30  ;;  %v1656_v27 = vmul.f32 %v5314_v3, %v6424_v40 }
 0x544   :  { %v1680_v15 = vmul.f32 %v6461_v6, %v1657_v41 }
 0x545   :  { %v1712_v50 = vpack.c.bf16 %v6525_v1, %v6529_v61  ;;  %v1679_v22 = vmul.f32 %v6461_v6, %v1656_v27 }
 0x546   :  { %1962 = vmatmul.mubr.bf16.gmra.mrb[72].mxu0 %v1710_v60  ;;  %2075 = vmatmul.mubr.bf16.gmra.mrb[72].mxu1 %v1710_v60  ;;  %v5316_v17 = vpop.eup %5315  ;;  %v6539_v38 = vadd.f32 %v6465_v46, %v1680_v15 }
 0x547   :  { %1971 = vmatprep.mubr.bf16.mxu0 %v5779_v48  ;;  %2084 = vmatprep.mubr.bf16.mxu1 %v5779_v48  ;;  %v5318_v34 = vpop.eup %5317  ;;  %v1659_v40 = vmul.f32 %v5316_v17, %v6444_v9  ;;  %v6543_v33 = vadd.f32 %v6465_v46, %v1679_v22 }
 0x548   :  { %v1658_v36 = vmul.f32 %v5318_v34, %v6436_v59 }
 0x549   :  { %v1713_v23 = vpack.c.bf16 %v6539_v38, %v6543_v33  ;;  %v1682_v42 = vmul.f32 %v6461_v6, %v1659_v40 }
 0x54a   :  { %v5320_v44 = vpop.eup %5319  ;;  %v1681_v10 = vmul.f32 %v6461_v6, %v1658_v36 }
 0x54b   :  { %v5322_v0 = vpop.eup %5321  ;;  %v6553_v9 = vadd.f32 %v6465_v46, %v1682_v42  ;;  %v1661_v59 = vmul.f32 %v5320_v44, %v6456_v43 }
 0x54c   :  { %v6557_v13 = vadd.f32 %v6465_v46, %v1681_v10  ;;  %v1660_v53 = vmul.f32 %v5322_v0, %v6448_v37 }
 0x54d   :  { %v1684_v32 = vmul.f32 %v6461_v6, %v1661_v59 }
 0x54e   :  { %1972 = vmatmul.mubr.bf16.gmra.mrb[76].mxu0 %v1711_v63  ;;  %2085 = vmatmul.mubr.bf16.gmra.mrb[76].mxu1 %v1711_v63  ;;  %v1714_v24 = vpack.c.bf16 %v6553_v9, %v6557_v13  ;;  %v1683_v28 = vmul.f32 %v6461_v6, %v1660_v53 }
 0x54f   :  { %1981 = vmatprep.mubr.bf16.mxu0 %v5779_v48  ;;  %2094 = vmatprep.mubr.bf16.mxu1 %v5779_v48  ;;  %v6567_v43 = vadd.f32 %v6465_v46, %v1684_v32 }
 0x550   :  { %v6570_v62 = vadd.f32 %v6465_v46, %v1683_v28 }
 0x552   :  { %v1715_v37 = vpack.c.bf16 %v6567_v43, %v6570_v62 }
 0x556   :  { %1982 = vmatmul.mubr.bf16.gmra.mrb[80].mxu0 %v1712_v50  ;;  %2095 = vmatmul.mubr.bf16.gmra.mrb[80].mxu1 %v1712_v50 }
 0x557   :  { %1991 = vmatprep.mubr.bf16.mxu0 %v5779_v48  ;;  %2104 = vmatprep.mubr.bf16.mxu1 %v5779_v48 }
 0x55e   :  { %1992 = vmatmul.mubr.bf16.gmra.mrb[84].mxu0 %v1713_v23  ;;  %2105 = vmatmul.mubr.bf16.gmra.mrb[84].mxu1 %v1713_v23 }
 0x55f   :  { %2001 = vmatprep.mubr.bf16.mxu0 %v5779_v48  ;;  %2114 = vmatprep.mubr.bf16.mxu1 %v5779_v48 }
 0x566   :  { %2002 = vmatmul.mubr.bf16.gmra.mrb[88].mxu0 %v1714_v24  ;;  %2115 = vmatmul.mubr.bf16.gmra.mrb[88].mxu1 %v1714_v24 }
 0x567   :  { %2011 = vmatprep.mubr.bf16.mxu0 %v5779_v48  ;;  %2124 = vmatprep.mubr.bf16.mxu1 %v5779_v48 }
 0x56e   :  { %2012 = vmatmul.mubr.bf16.gmra.mrb[92].mxu0 %v1715_v37  ;;  %2125 = vmatmul.mubr.bf16.gmra.mrb[92].mxu1 %v1715_v37 }
 0x56f   :  { %4842 = vmatprep.mubr.bf16.mxu0 %v5387_v54  ;;  %4874 = vmatprep.mubr.bf16.mxu1 %v5388_v12 }
 0x609   :  { %v6574_v6 = vpop.f32.mrb[64].mxu0  ;;  %v2056_v25 = vpop.f32.mrb[64].mxu1 }
 0x60a   :  { %v1945_v8 = vpop.f32.mrb[65].mxu0  ;;  %v2058_v60 = vpop.f32.mrb[65].mxu1 }
 0x60b   :  { %v6576_v55 = vpop.f32.mrb[66].mxu0  ;;  %v2060_v45 = vpop.f32.mrb[66].mxu1 }
 0x60c   :  { %v2160_v31 = vpack.c.bf16 %v2060_v45, %v2056_v25  ;;  %v1949_v46 = vpop.f32.mrb[67].mxu0  ;;  %v2062_v51 = vpop.f32.mrb[67].mxu1 }
 0x60d   :  { %v2159_v2 = vpack.c.bf16 %v1949_v46, %v1945_v8  ;;  %v6578_v14 = vpack.c.bf16 %v2062_v51, %v2058_v60 }
 0x60e   :  { %4858 = vmatprep.subr.bf16.mxu1 %v2160_v31 }
 0x60f   :  { %4826 = vmatprep.subr.bf16.mxu0 %v2159_v2  ;;  %4859 = vmatpush3.bf16.msra.mxu1 %v2160_v31 }
 0x610   :  { %4827 = vmatpush3.bf16.msra.mxu0 %v2159_v2 }
 0x611   :  { %v6580_v4 = vpop.f32.mrb[68].mxu0  ;;  %v2066_v16 = vpop.f32.mrb[68].mxu1 }
 0x612   :  { %v1955_v57 = vpop.f32.mrb[69].mxu0  ;;  %v2068_v49 = vpop.f32.mrb[69].mxu1 }
 0x613   :  { %v6582_v52 = vpop.f32.mrb[70].mxu0  ;;  %v2070_v29 = vpop.f32.mrb[70].mxu1 }
 0x614   :  { %v2163_v63 = vpack.c.bf16 %v2070_v29, %v2066_v16  ;;  %v1959_v35 = vpop.f32.mrb[71].mxu0  ;;  %v2072_v58 = vpop.f32.mrb[71].mxu1 }
 0x615   :  { %v2162_v19 = vpack.c.bf16 %v1959_v35, %v1955_v57  ;;  %v6584_v30 = vpack.c.bf16 %v2072_v58, %v2068_v49 }
 0x616   :  { %4860 = vmatprep.subr.bf16.mxu1 %v2163_v63 }
 0x617   :  { %4828 = vmatprep.subr.bf16.mxu0 %v2162_v19  ;;  %4861 = vmatpush3.bf16.msra.mxu1 %v2163_v63 }
 0x618   :  { %4829 = vmatpush3.bf16.msra.mxu0 %v2162_v19 }
 0x619   :  { %v6586_v3 = vpop.f32.mrb[72].mxu0  ;;  %v2076_v26 = vpop.f32.mrb[72].mxu1 }
 0x61a   :  { %v1965_v41 = vpop.f32.mrb[73].mxu0  ;;  %v2078_v21 = vpop.f32.mrb[73].mxu1 }
 0x61b   :  { %v6588_v27 = vpop.f32.mrb[74].mxu0  ;;  %v2080_v50 = vpop.f32.mrb[74].mxu1 }
 0x61c   :  { %v2166_v15 = vpack.c.bf16 %v2080_v50, %v2076_v26  ;;  %v1969_v17 = vpop.f32.mrb[75].mxu0  ;;  %v2082_v22 = vpop.f32.mrb[75].mxu1 }
 0x61d   :  { %v2165_v34 = vpack.c.bf16 %v1969_v17, %v1965_v41  ;;  %v6590_v40 = vpack.c.bf16 %v2082_v22, %v2078_v21 }
 0x61e   :  { %4862 = vmatprep.subr.bf16.mxu1 %v2166_v15 }
 0x61f   :  { %4830 = vmatprep.subr.bf16.mxu0 %v2165_v34  ;;  %4863 = vmatpush3.bf16.msra.mxu1 %v2166_v15 }
 0x620   :  { %4831 = vmatpush3.bf16.msra.mxu0 %v2165_v34 }
 0x621   :  { %v6592_v36 = vpop.f32.mrb[76].mxu0  ;;  %v2086_v23 = vpop.f32.mrb[76].mxu1 }
 0x622   :  { %v1975_v42 = vpop.f32.mrb[77].mxu0  ;;  %v2088_v44 = vpop.f32.mrb[77].mxu1 }
 0x623   :  { %v6594_v10 = vpop.f32.mrb[78].mxu0  ;;  %v2090_v0 = vpop.f32.mrb[78].mxu1 }
 0x624   :  { %v2169_v59 = vpack.c.bf16 %v2090_v0, %v2086_v23  ;;  %v1979_v53 = vpop.f32.mrb[79].mxu0  ;;  %v2092_v24 = vpop.f32.mrb[79].mxu1 }
 0x625   :  { %v2168_v32 = vpack.c.bf16 %v1979_v53, %v1975_v42  ;;  %v6596_v28 = vpack.c.bf16 %v2092_v24, %v2088_v44 }
 0x626   :  { %4864 = vmatprep.subr.bf16.mxu1 %v2169_v59 }
 0x627   :  { %4832 = vmatprep.subr.bf16.mxu0 %v2168_v32  ;;  %4865 = vmatpush3.bf16.msra.mxu1 %v2169_v59 }
 0x628   :  { %4833 = vmatpush3.bf16.msra.mxu0 %v2168_v32 }
 0x629   :  { %v6598_v37 = vpop.f32.mrb[80].mxu0  ;;  %v2096_v54 = vpop.f32.mrb[80].mxu1 }
 0x62a   :  { %v1985_v12 = vpop.f32.mrb[81].mxu0  ;;  %v2098_v25 = vpop.f32.mrb[81].mxu1 }
 0x62b   :  { %v6600_v8 = vpop.f32.mrb[82].mxu0  ;;  %v2100_v60 = vpop.f32.mrb[82].mxu1 }
 0x62c   :  { %v2172_v45 = vpack.c.bf16 %v2100_v60, %v2096_v54  ;;  %v1989_v31 = vpop.f32.mrb[83].mxu0  ;;  %v2102_v46 = vpop.f32.mrb[83].mxu1 }
 0x62d   :  { %v2171_v51 = vpack.c.bf16 %v1989_v31, %v1985_v12  ;;  %v6602_v2 = vpack.c.bf16 %v2102_v46, %v2098_v25 }
 0x62e   :  { %4866 = vmatprep.subr.bf16.mxu1 %v2172_v45 }
 0x62f   :  { %4834 = vmatprep.subr.bf16.mxu0 %v2171_v51  ;;  %4867 = vmatpush3.bf16.msra.mxu1 %v2172_v45 }
 0x630   :  { %4835 = vmatpush3.bf16.msra.mxu0 %v2171_v51 }
 0x631   :  { %v6604_v16 = vpop.f32.mrb[84].mxu0  ;;  %v2106_v57 = vpop.f32.mrb[84].mxu1 }
 0x632   :  { %v1995_v49 = vpop.f32.mrb[85].mxu0  ;;  %v2108_v29 = vpop.f32.mrb[85].mxu1 }
 0x633   :  { %v6606_v63 = vpop.f32.mrb[86].mxu0  ;;  %v2110_v35 = vpop.f32.mrb[86].mxu1 }
 0x634   :  { %v2175_v58 = vpack.c.bf16 %v2110_v35, %v2106_v57  ;;  %v1999_v19 = vpop.f32.mrb[87].mxu0  ;;  %v2112_v26 = vpop.f32.mrb[87].mxu1  ;;  %v5391_v35 = vld [vmem:[#allocation5 + $0x50] sm:$0xff]  }
 0x635   :  { %v2174_v41 = vpack.c.bf16 %v1999_v19, %v1995_v49  ;;  %v6608_v21 = vpack.c.bf16 %v2112_v26, %v2108_v29  ;;  %v5389_v49 = vld [vmem:[#allocation5 + $0x48] sm:$0xff]   ;;  %v5393_v19 = vld [vmem:[#allocation5 + $0x58] sm:$0xff]  }
 0x636   :  { %4868 = vmatprep.subr.bf16.mxu1 %v2175_v58  ;;  %v5390_v29 = vld [vmem:[#allocation5 + $0x8] sm:$0xff]   ;;  %v5394_v26 = vld [vmem:[#allocation5 + $0x18] sm:$0xff]  }
 0x637   :  { %4836 = vmatprep.subr.bf16.mxu0 %v2174_v41  ;;  %4869 = vmatpush3.bf16.msra.mxu1 %v2175_v58  ;;  %v5392_v58 = vld [vmem:[#allocation5 + $0x10] sm:$0xff]  }
 0x638   :  { %4837 = vmatpush3.bf16.msra.mxu0 %v2174_v41  ;;  %v5395_v41 = vld [vmem:[#allocation5 + $0x60] sm:$0xff]  }
 0x639   :  { %v6610_v50 = vpop.f32.mrb[88].mxu0  ;;  %v2116_v15 = vpop.f32.mrb[88].mxu1 }
 0x63a   :  { %v2005_v17 = vpop.f32.mrb[89].mxu0  ;;  %v2118_v22 = vpop.f32.mrb[89].mxu1 }
 0x63b   :  { %v6612_v34 = vpop.f32.mrb[90].mxu0  ;;  %v2120_v23 = vpop.f32.mrb[90].mxu1 }
 0x63c   :  { %v2178_v42 = vpack.c.bf16 %v2120_v23, %v2116_v15  ;;  %v2009_v44 = vpop.f32.mrb[91].mxu0  ;;  %v2122_v0 = vpop.f32.mrb[91].mxu1  ;;  %v5396_v15 = vld [vmem:[#allocation5 + $0x20] sm:$0xff]  }
 0x63d   :  { %v2177_v59 = vpack.c.bf16 %v2009_v44, %v2005_v17  ;;  %v2179_v53 = vpack.c.bf16 %v2122_v0, %v2118_v22  ;;  %v5399_v17 = vld [vmem:[#allocation5 + $0x70] sm:$0xff]   ;;  %v5403_v23 = vld [vmem:[#allocation5 + $0x80] sm:$0xff]   ;;  %v5406_v44 = vld [vmem:[#allocation5 + $0x98] sm:$0xff]  }
 0x63e   :  { %4870 = vmatprep.subr.bf16.mxu1 %v2178_v42  ;;  %v5400_v22 = vld [vmem:[#allocation5 + $0x30] sm:$0xff]   ;;  %v5407_v0 = vld [vmem:[#allocation5 + $0xa0] sm:$0xff]  }
 0x63f   :  { %4838 = vmatprep.subr.bf16.mxu0 %v2177_v59  ;;  %4871 = vmatpush3.bf16.msra.mxu1 %v2178_v42  ;;  %v5404_v42 = vld [vmem:[#allocation5 + $0x88] sm:$0xff]  }
 0x640   :  { %4839 = vmatpush3.bf16.msra.mxu0 %v2177_v59  ;;  %v5409_v59 = vld [vmem:[#allocation5 + $0xb0] sm:$0xff]  }
 0x641   :  { %v6614_v24 = vpop.f32.mrb[92].mxu0  ;;  %v2126_v32 = vpop.f32.mrb[92].mxu1 }
 0x642   :  { %v2015_v54 = vpop.f32.mrb[93].mxu0  ;;  %v2128_v12 = vpop.f32.mrb[93].mxu1 }
 0x643   :  { %v6616_v25 = vpop.f32.mrb[94].mxu0  ;;  %v2130_v60 = vpop.f32.mrb[94].mxu1 }
 0x644   :  { %v2181_v45 = vpack.c.bf16 %v2130_v60, %v2126_v32  ;;  %v2019_v31 = vpop.f32.mrb[95].mxu0  ;;  %v2132_v46 = vpop.f32.mrb[95].mxu1  ;;  %v5410_v32 = vld [vmem:[#allocation5 + $0xb8] sm:$0xff]  }
 0x645   :  { %v2180_v51 = vpack.c.bf16 %v2019_v31, %v2015_v54  ;;  %v2182_v57 = vpack.c.bf16 %v2132_v46, %v2128_v12 }
 0x646   :  { %4872 = vmatprep.subr.bf16.mxu1 %v2181_v45 }
 0x647   :  { %4840 = vmatprep.subr.bf16.mxu0 %v2180_v51  ;;  %4873 = vmatpush3.bf16.msra.mxu1 %v2181_v45 }
 0x648   :  { %4841 = vmatpush3.bf16.msra.mxu0 %v2180_v51 }
 0x649   :  { %4890 = vmatprep.subr.bf16.mxu0 %v6578_v14 }
 0x64a   :  { %4875 = vmatmul.mubr.bf16.vlgmr.msra.gmra.mrb[96].mxu1 %v5389_v49 }
 0x64b   :  { %4843 = vmatmul.mubr.bf16.vlgmr.msra.gmra.mrb[96].mxu0 %v5390_v29  ;;  %4878 = vmatprep.mubr.bf16.mxu1 %v5391_v35 }
 0x64c   :  { %4891 = vmatpush3.bf16.msra.mxu0 %v6578_v14  ;;  %4846 = vmatprep.mubr.bf16.mxu0 %v5392_v58  ;;  %v5397_v14 = vld [vmem:[#allocation5 + $0x68] sm:$0xff]  }
 0x64d   :  { %4892 = vmatprep.subr.bf16.mxu0 %v6584_v30 }
 0x650   :  { %4893 = vmatpush3.bf16.msra.mxu0 %v6584_v30  ;;  %v5398_v30 = vld [vmem:[#allocation5 + $0x28] sm:$0xff]  }
 0x651   :  { %4894 = vmatprep.subr.bf16.mxu0 %v6590_v40 }
 0x652   :  { %4879 = vmatmul.mubr.bf16.gmra.mrb[100].mxu1 %v5393_v19 }
 0x653   :  { %4847 = vmatmul.mubr.bf16.gmra.mrb[100].mxu0 %v5394_v26  ;;  %4882 = vmatprep.mubr.bf16.mxu1 %v5395_v41 }
 0x654   :  { %4895 = vmatpush3.bf16.msra.mxu0 %v6590_v40  ;;  %4850 = vmatprep.mubr.bf16.mxu0 %v5396_v15  ;;  %v5401_v40 = vld [vmem:[#allocation5 + $0x78] sm:$0xff]  }
 0x655   :  { %4896 = vmatprep.subr.bf16.mxu0 %v6596_v28 }
 0x658   :  { %4897 = vmatpush3.bf16.msra.mxu0 %v6596_v28  ;;  %v5402_v28 = vld [vmem:[#allocation5 + $0x38] sm:$0xff]  }
 0x659   :  { %4898 = vmatprep.subr.bf16.mxu0 %v6602_v2 }
 0x65a   :  { %4883 = vmatmul.mubr.bf16.gmra.mrb[104].mxu1 %v5397_v14 }
 0x65b   :  { %4851 = vmatmul.mubr.bf16.gmra.mrb[104].mxu0 %v5398_v30  ;;  %4886 = vmatprep.mubr.bf16.mxu1 %v5399_v17 }
 0x65c   :  { %4899 = vmatpush3.bf16.msra.mxu0 %v6602_v2  ;;  %4854 = vmatprep.mubr.bf16.mxu0 %v5400_v22  ;;  %v5405_v2 = vld [vmem:[#allocation5 + $0x90] sm:$0xff]  }
 0x65d   :  { %4900 = vmatprep.subr.bf16.mxu0 %v6608_v21 }
 0x660   :  { %4901 = vmatpush3.bf16.msra.mxu0 %v6608_v21  ;;  %v5408_v21 = vld [vmem:[#allocation5 + $0xa8] sm:$0xff]  }
 0x661   :  { %4902 = vmatprep.subr.bf16.mxu0 %v2179_v53 }
 0x662   :  { %4887 = vmatmul.mubr.bf16.gmra.mrb[108].mxu1 %v5401_v40 }
 0x663   :  { %4855 = vmatmul.mubr.bf16.gmra.mrb[108].mxu0 %v5402_v28  ;;  %3011 = vmatprep.mubr.bf16.mxu1 %v5779_v48 }
 0x664   :  { %4903 = vmatpush3.bf16.msra.mxu0 %v2179_v53  ;;  %4906 = vmatprep.mubr.bf16.mxu0 %v5403_v23  ;;  %v6632_v53 = vld [vmem:[#allocation13 + $0x1] ss:$0 sm:$0xff] }
 0x665   :  { %4904 = vmatprep.subr.bf16.mxu0 %v2182_v57  ;;  %v2145_v54 = vadd.f32 %v6632_v53, %v6580_v4  ;;  %v2143_v60 = vadd.f32 %v6632_v53, %v6574_v6  ;;  %v2146_v46 = vadd.f32 %v6632_v53, %v6582_v52  ;;  %v2144_v29 = vadd.f32 %v6632_v53, %v6576_v55 }
 0x666   :  { %v2149_v52 = vadd.f32 %v6632_v53, %v6592_v36  ;;  %v2147_v55 = vadd.f32 %v6632_v53, %v6586_v3  ;;  %v2150_v28 = vadd.f32 %v6632_v53, %v6594_v10  ;;  %v2153_v10 = vadd.f32 %v6632_v53, %v6604_v16 }
 0x668   :  { %4905 = vmatpush3.bf16.msra.mxu0 %v2182_v57 }
 0x66b   :  { %4907 = vmatmul.mubr.bf16.vlgmr.msra.gmra.mrb[112].mxu0 %v5404_v42 }
 0x66c   :  { %4910 = vmatprep.mubr.bf16.mxu0 %v5405_v2 }
 0x673   :  { %4911 = vmatmul.mubr.bf16.gmra.mrb[116].mxu0 %v5406_v44  ;;  %v2148_v44 = vadd.f32 %v6632_v53, %v6588_v27 }
 0x674   :  { %4914 = vmatprep.mubr.bf16.mxu0 %v5407_v0 }
 0x67b   :  { %4915 = vmatmul.mubr.bf16.gmra.mrb[120].mxu0 %v5408_v21 }
 0x67c   :  { %4918 = vmatprep.mubr.bf16.mxu0 %v5409_v59 }
 0x683   :  { %4919 = vmatmul.mubr.bf16.gmra.mrb[124].mxu0 %v5410_v32 }
 0x684   :  { %3124 = vmatprep.mubr.bf16.mxu0 %v5779_v48 }
 0x71d   :  { %v4876_v12 = vpop.f32.mrb[96].mxu1 }
 0x71e   :  { %v4844_v45 = vpop.f32.mrb[96].mxu0  ;;  %v2330_v31 = vpop.f32.mrb[97].mxu1 }
 0x71f   :  { %v2282_v51 = vadd.f32 %v4844_v45, %v2145_v54  ;;  %v2217_v57 = vpop.f32.mrb[97].mxu0  ;;  %v4877_v49 = vpop.f32.mrb[98].mxu1 }
 0x720   :  { %v2280_v35 = vadd.f32 %v2217_v57, %v2143_v60  ;;  %v4845_v58 = vpop.f32.mrb[98].mxu0  ;;  %v2333_v19 = vpop.f32.mrb[99].mxu1  ;;  %v2154_v57 = vadd.f32 %v6632_v53, %v6606_v63  ;;  %v2157_v63 = vadd.f32 %v6632_v53, %v6614_v24 }
 0x721   :  { %v2283_v26 = vadd.f32 %v4845_v58, %v2146_v46  ;;  %v6642_v4 = vadd.f32 %v4876_v12, %v2282_v51  ;;  %v2220_v41 = vpop.f32.mrb[99].mxu0  ;;  %v2151_v46 = vadd.f32 %v6632_v53, %v6598_v37  ;;  %v2152_v58 = vadd.f32 %v6632_v53, %v6600_v8 }
 0x722   :  { %v2281_v15 = vadd.f32 %v2220_v41, %v2144_v29  ;;  %v6644_v6 = vadd.f32 %v2330_v31, %v2280_v35 }
 0x723   :  { %v6646_v14 = vadd.f32 %v4877_v49, %v2283_v26 }
 0x724   :  { %v6648_v30 = vadd.f32 %v2333_v19, %v2281_v15 }
 0x725   :  { %v4880_v17 = vpop.f32.mrb[100].mxu1 }
 0x726   :  { %v4848_v22 = vpop.f32.mrb[100].mxu0  ;;  %v2346_v40 = vpop.f32.mrb[101].mxu1 }
 0x727   :  { %v2286_v23 = vadd.f32 %v4848_v22, %v2149_v52  ;;  %v2233_v42 = vpop.f32.mrb[101].mxu0  ;;  %v4881_v2 = vpop.f32.mrb[102].mxu1 }
 0x728   :  { %v2284_v0 = vadd.f32 %v2233_v42, %v2147_v55  ;;  %v4849_v21 = vpop.f32.mrb[102].mxu0  ;;  %v2349_v59 = vpop.f32.mrb[103].mxu1  ;;  %v2158_v42 = vadd.f32 %v6632_v53, %v6616_v25 }
 0x729   :  { %v2287_v32 = vadd.f32 %v4849_v21, %v2150_v28  ;;  %v2399_v36 = vadd.f32 %v4880_v17, %v2286_v23  ;;  %v2236_v54 = vpop.f32.mrb[103].mxu0  ;;  %v2155_v28 = vadd.f32 %v6632_v53, %v6610_v50  ;;  %v2156_v21 = vadd.f32 %v6632_v53, %v6612_v34 }
 0x72a   :  { %v2285_v12 = vadd.f32 %v2236_v54, %v2148_v44  ;;  %v2397_v60 = vadd.f32 %v2346_v40, %v2284_v0 }
 0x72b   :  { %v6658_v3 = vadd.f32 %v4881_v2, %v2287_v32 }
 0x72c   :  { %v6660_v45 = vadd.f32 %v2349_v59, %v2285_v12 }
 0x72d   :  { %v4884_v31 = vpop.f32.mrb[104].mxu1 }
 0x72e   :  { %v4852_v27 = vpop.f32.mrb[104].mxu0  ;;  %v2362_v51 = vpop.f32.mrb[105].mxu1 }
 0x72f   :  { %v2290_v49 = vadd.f32 %v4852_v27, %v2153_v10  ;;  %v2249_v29 = vpop.f32.mrb[105].mxu0  ;;  %v4885_v35 = vpop.f32.mrb[106].mxu1 }
 0x730   :  { %v2288_v19 = vadd.f32 %v2249_v29, %v2151_v46  ;;  %v4853_v26 = vpop.f32.mrb[106].mxu0  ;;  %v2365_v41 = vpop.f32.mrb[107].mxu1 }
 0x731   :  { %v2291_v15 = vadd.f32 %v4853_v26, %v2154_v57  ;;  %v2403_v16 = vadd.f32 %v4884_v31, %v2290_v49  ;;  %v2252_v52 = vpop.f32.mrb[107].mxu0 }
 0x732   :  { %v2289_v17 = vadd.f32 %v2252_v52, %v2152_v58  ;;  %v2401_v55 = vadd.f32 %v2362_v51, %v2288_v19 }
 0x733   :  { %v6670_v37 = vadd.f32 %v4885_v35, %v2291_v15 }
 0x734   :  { %v6672_v22 = vadd.f32 %v2365_v41, %v2289_v17 }
 0x735   :  { %v4888_v40 = vpop.f32.mrb[108].mxu1 }
 0x736   :  { %v4856_v8 = vpop.f32.mrb[108].mxu0  ;;  %v2378_v23 = vpop.f32.mrb[109].mxu1 }
 0x737   :  { %v2294_v2 = vadd.f32 %v4856_v8, %v2157_v63  ;;  %v2265_v44 = vpop.f32.mrb[109].mxu0  ;;  %v4889_v0 = vpop.f32.mrb[110].mxu1 }
 0x738   :  { %v2292_v59 = vadd.f32 %v2265_v44, %v2155_v28  ;;  %v4857_v32 = vpop.f32.mrb[110].mxu0  ;;  %v2381_v54 = vpop.f32.mrb[111].mxu1 }
 0x739   :  { %v2295_v12 = vadd.f32 %v4857_v32, %v2158_v42  ;;  %v2407_v24 = vadd.f32 %v4888_v40, %v2294_v2  ;;  %v2268_v10 = vpop.f32.mrb[111].mxu0 }
 0x73a   :  { %v2293_v31 = vadd.f32 %v2268_v10, %v2156_v21  ;;  %v2405_v46 = vadd.f32 %v2378_v23, %v2292_v59 }
 0x73b   :  { %v6682_v50 = vadd.f32 %v4889_v0, %v2295_v12 }
 0x73c   :  { %v6684_v27 = vadd.f32 %v2381_v54, %v2293_v31 }
 0x73e   :  { %v4908_v51 = vpop.f32.mrb[112].mxu0 }
 0x73f   :  { %v2508_v25 = vadd.f32 %v4908_v51, %v6642_v4  ;;  %v2443_v57 = vpop.f32.mrb[113].mxu0 }
 0x740   :  { %v2506_v49 = vadd.f32 %v2443_v57, %v6644_v6  ;;  %v4909_v29 = vpop.f32.mrb[114].mxu0 }
 0x741   :  { %v2509_v34 = vadd.f32 %v4909_v29, %v6646_v14  ;;  %v2446_v53 = vpop.f32.mrb[115].mxu0  ;;  %v6698_v41 = vadd.f32 %v2508_v25, %v6487_v7  ;;  %v5230_v29 = vld [vmem:[#allocation11 + $0x208] ss:$16 sps:$4 sm:$0xff]  }
 0x742   :  { %v2507_v35 = vadd.f32 %v2446_v53, %v6648_v30  ;;  %v6691_v58 = vadd.f32 %v2506_v49, %v6469_v20  ;;  %v5229_v49 = vld [vmem:[#allocation11 + $0x204] ss:$16 sps:$4 sm:$0xff]  }
 0x743   :  { %v6704_v14 = vadd.f32 %v2509_v34, %v6483_v11  ;;  %v2540_v52 = vmax.f32 %v6698_v41, 0.0  ;;  %v5232_v34 = vld [vmem:[#allocation11 + $0x20c] ss:$16 sps:$4 sm:$0xff]   ;;  %v5235_v53 = vld [vmem:[#allocation11 + $0x224] ss:$16 sps:$4 sm:$0xff]   ;;  %2979 = vmatprep.subr.bf16.mxu1 %v5229_v49 }
 0x744   :  { %v2538_v19 = vmax.f32 %v6691_v58, 0.0  ;;  %v6695_v26 = vadd.f32 %v2507_v35, %v6472_v5  ;;  %3092 = vmatprep.subr.bf16.mxu0 %v5232_v34  ;;  %v5233_v35 = vld [vmem:[#allocation11 + $0x220] ss:$16 sps:$4 sm:$0xff]   ;;  %v5244_v34 = vld [vmem:[#allocation11 + $0x24c] ss:$16 sps:$4 sm:$0xff]  }
 0x745   :  { %v2541_v11 = vmax.f32 %v6704_v14, 0.0  ;;  %3093 = vmatpush1.bf16.msra.mxu0 %v5230_v29 }
 0x746   :  { %2554 = vadd.xlane.f32.xlu0 %v2538_v19  ;;  %v4912_v4 = vpop.f32.mrb[116].mxu0  ;;  %v2539_v6 = vmax.f32 %v6695_v26, 0.0 }
 0x747   :  { %v2512_v30 = vadd.f32 %v4912_v4, %v2399_v36  ;;  %v2459_v20 = vpop.f32.mrb[117].mxu0  ;;  %v5236_v4 = vld [vmem:[#allocation11 + $0x228] ss:$16 sps:$4 sm:$0xff]  }
 0x748   :  { %v2510_v15 = vadd.f32 %v2459_v20, %v2397_v60  ;;  %2556 = vadd.xlane.f32.xlu1 %v2539_v6  ;;  %v4913_v5 = vpop.f32.mrb[118].mxu0 }
 0x749   :  { %v2513_v7 = vadd.f32 %v4913_v5, %v6658_v3  ;;  %v2462_v17 = vpop.f32.mrb[119].mxu0  ;;  %v6724_v3 = vadd.f32 %v2512_v30, %v6515_v39 }
 0x74a   :  { %v2511_v63 = vadd.f32 %v2462_v17, %v6660_v45  ;;  %2558 = vadd.xlane.f32.xlu0 %v2540_v52  ;;  %v6715_v36 = vadd.f32 %v2510_v15, %v6501_v56 }
 0x74b   :  { %v6730_v56 = vadd.f32 %v2513_v7, %v6511_v18  ;;  %v2544_v2 = vmax.f32 %v6724_v3, 0.0 }
 0x74c   :  { %2560 = vadd.xlane.f32.xlu1 %v2541_v11  ;;  %v2542_v60 = vmax.f32 %v6715_v36, 0.0  ;;  %v6721_v40 = vadd.f32 %v2511_v63, %v6497_v47 }
 0x74d   :  { %v2545_v18 = vmax.f32 %v6730_v56, 0.0 }
 0x74e   :  { %2562 = vadd.xlane.f32.xlu0 %v2542_v60  ;;  %v4916_v45 = vpop.f32.mrb[120].mxu0  ;;  %v2543_v28 = vmax.f32 %v6721_v40, 0.0 }
 0x74f   :  { %v2516_v8 = vadd.f32 %v4916_v45, %v2403_v16  ;;  %v2475_v23 = vpop.f32.mrb[121].mxu0 }
 0x750   :  { %v2514_v42 = vadd.f32 %v2475_v23, %v2401_v55  ;;  %2564 = vadd.xlane.f32.xlu1 %v2543_v28  ;;  %v4917_v47 = vpop.f32.mrb[122].mxu0 }
 0x751   :  { %v2517_v39 = vadd.f32 %v4917_v47, %v6670_v37  ;;  %v2478_v44 = vpop.f32.mrb[123].mxu0  ;;  %v6750_v37 = vadd.f32 %v2516_v8, %v6543_v33 }
 0x752   :  { %v2515_v0 = vadd.f32 %v2478_v44, %v6672_v22  ;;  %2566 = vadd.xlane.f32.xlu0 %v2544_v2  ;;  %v6741_v16 = vadd.f32 %v2514_v42, %v6529_v61 }
 0x753   :  { %v6756_v61 = vadd.f32 %v2517_v39, %v6539_v38  ;;  %v2548_v10 = vmax.f32 %v6750_v37, 0.0 }
 0x754   :  { %2568 = vadd.xlane.f32.xlu1 %v2545_v18  ;;  %v2546_v55 = vmax.f32 %v6741_v16, 0.0  ;;  %v6747_v21 = vadd.f32 %v2515_v0, %v6525_v1 }
 0x755   :  { %v2549_v38 = vmax.f32 %v6756_v61, 0.0 }
 0x756   :  { %2570 = vadd.xlane.f32.xlu0 %v2546_v55  ;;  %v4920_v22 = vpop.f32.mrb[124].mxu0  ;;  %v2547_v59 = vmax.f32 %v6747_v21, 0.0 }
 0x757   :  { %v2520_v32 = vadd.f32 %v4920_v22, %v2407_v24  ;;  %v2491_v54 = vpop.f32.mrb[125].mxu0 }
 0x758   :  { %v2518_v12 = vadd.f32 %v2491_v54, %v2405_v46  ;;  %2572 = vadd.xlane.f32.xlu1 %v2547_v59  ;;  %v4921_v1 = vpop.f32.mrb[126].mxu0 }
 0x759   :  { %v2521_v33 = vadd.f32 %v4921_v1, %v6682_v50  ;;  %v2494_v31 = vpop.f32.mrb[127].mxu0  ;;  %v6776_v50 = vadd.f32 %v2520_v32, %v6570_v62  ;;  %v5227_v62 = vld [vmem:[#allocation11 + $0x200] ss:$16 sps:$4 sm:$0xff]  }
 0x75a   :  { %v2519_v51 = vadd.f32 %v2494_v31, %v6684_v27  ;;  %2574 = vadd.xlane.f32.xlu0 %v2548_v10  ;;  %v6767_v24 = vadd.f32 %v2518_v12, %v6557_v13  ;;  %2980 = vmatpush1.bf16.msra.mxu1 %v5227_v62 }
 0x75b   :  { %v6782_v57 = vadd.f32 %v2521_v33, %v6567_v43  ;;  %v2552_v13 = vmax.f32 %v6776_v50, 0.0  ;;  %v5238_v43 = vld [vmem:[#allocation11 + $0x22c] ss:$16 sps:$4 sm:$0xff]   ;;  %2981 = vmatprep.subr.bf16.mxu1 %v5235_v53  ;;  %v5242_v53 = vld [vmem:[#allocation11 + $0x248] ss:$16 sps:$4 sm:$0xff]  }
 0x75c   :  { %2576 = vadd.xlane.f32.xlu1 %v2549_v38  ;;  %v2550_v46 = vmax.f32 %v6767_v24, 0.0  ;;  %v6773_v25 = vadd.f32 %v2519_v51, %v6553_v9  ;;  %3094 = vmatprep.subr.bf16.mxu0 %v5238_v43  ;;  %v5259_v50 = vld [vmem:[#allocation11 + $0x2a4] ss:$16 sps:$4 sm:$0xff]  }
 0x75d   :  { %v2553_v9 = vmax.f32 %v6782_v57, 0.0  ;;  %3095 = vmatpush1.bf16.msra.mxu0 %v5236_v4  ;;  %v5265_v57 = vld [vmem:[#allocation11 + $0x2c4] ss:$16 sps:$4 sm:$0xff]  }
 0x75e   :  { %2578 = vadd.xlane.f32.xlu0 %v2550_v46  ;;  %v2551_v27 = vmax.f32 %v6773_v25, 0.0  ;;  %2982 = vmatpush1.bf16.msra.mxu1 %v5233_v35 }
 0x75f   :  { %3096 = vmatprep.subr.bf16.mxu0 %v5244_v34 }
 0x760   :  { %2580 = vadd.xlane.f32.xlu1 %v2551_v27 }
 0x761   :  { %3097 = vmatpush1.bf16.msra.mxu0 %v5242_v53 }
 0x762   :  { %2582 = vadd.xlane.f32.xlu0 %v2552_v13 }
 0x764   :  { %2584 = vadd.xlane.f32.xlu1 %v2553_v9 }
 0x7d3   :  { %v2555_v30 = vpop.xlane.xlu0 %2554 }
 0x7d4   :  { %v2586_v20 = vmul.f32 0.0078125, %v2555_v30 }
 0x7d5   :  { %v2557_v15 = vpop.xlane.xlu1 %2556 }
 0x7d6   :  { %v6794_v5 = vsub.f32 %v2538_v19, %v2586_v20  ;;  %v2587_v7 = vmul.f32 0.0078125, %v2557_v15  ;;  %v5250_v20 = vld [vmem:[#allocation11 + $0x26c] ss:$16 sps:$4 sm:$0xff]  }
 0x7d7   :  { %v2559_v17 = vpop.xlane.xlu0 %2558  ;;  %3098 = vmatprep.subr.bf16.mxu0 %v5250_v20 }
 0x7d8   :  { %v2588_v63 = vmul.f32 0.0078125, %v2559_v17  ;;  %v2618_v45 = vmul.f32 %v6794_v5, %v6794_v5  ;;  %v6800_v8 = vsub.f32 %v2539_v6, %v2587_v7  ;;  %v5245_v7 = vld [vmem:[#allocation11 + $0x260] ss:$16 sps:$4 sm:$0xff]   ;;  %v5248_v17 = vld [vmem:[#allocation11 + $0x268] ss:$16 sps:$4 sm:$0xff]  }
 0x7d9   :  { %v2561_v23 = vpop.xlane.xlu1 %2560  ;;  %3099 = vmatpush1.bf16.msra.mxu0 %v5248_v17 }
 0x7da   :  { %v6804_v42 = vsub.f32 %v2540_v52, %v2588_v63  ;;  %v2589_v47 = vmul.f32 0.0078125, %v2561_v23  ;;  %2634 = vadd.xlane.f32.xlu0 %v2618_v45  ;;  %v2619_v58 = vmul.f32 %v6800_v8, %v6800_v8 }
 0x7db   :  { %v2563_v19 = vpop.xlane.xlu0 %2562 }
 0x7dc   :  { %v2590_v39 = vmul.f32 0.0078125, %v2563_v19  ;;  %2636 = vadd.xlane.f32.xlu1 %v2619_v58  ;;  %v2620_v44 = vmul.f32 %v6804_v42, %v6804_v42  ;;  %v6812_v26 = vsub.f32 %v2541_v11, %v2589_v47  ;;  %v5256_v58 = vld [vmem:[#allocation11 + $0x28c] ss:$16 sps:$4 sm:$0xff]  }
 0x7dd   :  { %v2565_v6 = vpop.xlane.xlu1 %2564  ;;  %3100 = vmatprep.subr.bf16.mxu0 %v5256_v58 }
 0x7de   :  { %v6816_v41 = vsub.f32 %v2542_v60, %v2590_v39  ;;  %v2591_v52 = vmul.f32 0.0078125, %v2565_v6  ;;  %2638 = vadd.xlane.f32.xlu0 %v2620_v44  ;;  %v2621_v0 = vmul.f32 %v6812_v26, %v6812_v26  ;;  %v5251_v39 = vld [vmem:[#allocation11 + $0x280] ss:$16 sps:$4 sm:$0xff]   ;;  %v5254_v44 = vld [vmem:[#allocation11 + $0x288] ss:$16 sps:$4 sm:$0xff]  }
 0x7df   :  { %v2567_v22 = vpop.xlane.xlu0 %2566  ;;  %3101 = vmatpush1.bf16.msra.mxu0 %v5254_v44  ;;  %v6893_v44 = vld [vmem:[#allocation16 + $0x1] ss:$0 sm:$0xff] }
 0x7e0   :  { %v2592_v32 = vmul.f32 0.0078125, %v2567_v22  ;;  %2640 = vadd.xlane.f32.xlu1 %v2621_v0  ;;  %v2622_v54 = vmul.f32 %v6816_v41, %v6816_v41  ;;  %v6824_v14 = vsub.f32 %v2543_v28, %v2591_v52  ;;  %v5257_v22 = vld [vmem:[#allocation11 + $0x2a0] ss:$16 sps:$4 sm:$0xff]  }
 0x7e1   :  { %v2569_v11 = vpop.xlane.xlu1 %2568 }
 0x7e2   :  { %v6828_v36 = vsub.f32 %v2544_v2, %v2592_v32  ;;  %v2593_v60 = vmul.f32 0.0078125, %v2569_v11  ;;  %2642 = vadd.xlane.f32.xlu0 %v2622_v54  ;;  %v2623_v12 = vmul.f32 %v6824_v14, %v6824_v14  ;;  %v5260_v32 = vld [vmem:[#allocation11 + $0x2a8] ss:$16 sps:$4 sm:$0xff]   ;;  %v5263_v11 = vld [vmem:[#allocation11 + $0x2c0] ss:$16 sps:$4 sm:$0xff]  }
 0x7e3   :  { %v2571_v1 = vpop.xlane.xlu0 %2570 }
 0x7e4   :  { %v2594_v33 = vmul.f32 0.0078125, %v2571_v1  ;;  %2644 = vadd.xlane.f32.xlu1 %v2623_v12  ;;  %v2624_v31 = vmul.f32 %v6828_v36, %v6828_v36  ;;  %v6836_v40 = vsub.f32 %v2545_v18, %v2593_v60  ;;  %v5241_v18 = vld [vmem:[#allocation11 + $0x244] ss:$16 sps:$4 sm:$0xff]   ;;  %v5266_v60 = vld [vmem:[#allocation11 + $0x2c8] ss:$16 sps:$4 sm:$0xff]  }
 0x7e5   :  { %v2573_v28 = vpop.xlane.xlu1 %2572  ;;  %2983 = vmatprep.subr.bf16.mxu1 %v5241_v18  ;;  %v5271_v12 = vld [vmem:[#allocation11 + $0x2e4] ss:$16 sps:$4 sm:$0xff]   ;;  %v5274_v1 = vld [vmem:[#allocation11 + $0x2ec] ss:$16 sps:$4 sm:$0xff]  }
 0x7e6   :  { %v6840_v3 = vsub.f32 %v2546_v55, %v2594_v33  ;;  %v2595_v2 = vmul.f32 0.0078125, %v2573_v28  ;;  %2646 = vadd.xlane.f32.xlu0 %v2624_v31  ;;  %v2625_v51 = vmul.f32 %v6836_v40, %v6836_v40  ;;  %v5239_v55 = vld [vmem:[#allocation11 + $0x240] ss:$16 sps:$4 sm:$0xff]   ;;  %v5272_v31 = vld [vmem:[#allocation11 + $0x2e8] ss:$16 sps:$4 sm:$0xff]  }
 0x7e7   :  { %v2575_v62 = vpop.xlane.xlu0 %2574  ;;  %2984 = vmatpush1.bf16.msra.mxu1 %v5239_v55  ;;  %v5269_v33 = vld [vmem:[#allocation11 + $0x2e0] ss:$16 sps:$4 sm:$0xff]  }
 0x7e8   :  { %v2596_v49 = vmul.f32 0.0078125, %v2575_v62  ;;  %2648 = vadd.xlane.f32.xlu1 %v2625_v51  ;;  %v2626_v29 = vmul.f32 %v6840_v3, %v6840_v3  ;;  %v6848_v56 = vsub.f32 %v2547_v59, %v2595_v2 }
 0x7e9   :  { %v2577_v16 = vpop.xlane.xlu1 %2576 }
 0x7ea   :  { %v6852_v43 = vsub.f32 %v2548_v10, %v2596_v49  ;;  %v2597_v35 = vmul.f32 0.0078125, %v2577_v16  ;;  %2650 = vadd.xlane.f32.xlu0 %v2626_v29  ;;  %v2627_v4 = vmul.f32 %v6848_v56, %v6848_v56  ;;  %v5247_v10 = vld [vmem:[#allocation11 + $0x264] ss:$16 sps:$4 sm:$0xff]  }
 0x7eb   :  { %v2579_v30 = vpop.xlane.xlu0 %2578  ;;  %2985 = vmatprep.subr.bf16.mxu1 %v5247_v10 }
 0x7ec   :  { %v6858_v21 = vsub.f32 %v2549_v38, %v2597_v35  ;;  %v2598_v59 = vmul.f32 0.0078125, %v2579_v30  ;;  %2652 = vadd.xlane.f32.xlu1 %v2627_v4  ;;  %v2628_v37 = vmul.f32 %v6852_v43, %v6852_v43  ;;  %2986 = vmatpush1.bf16.msra.mxu1 %v5245_v7 }
 0x7ed   :  { %v2581_v15 = vpop.xlane.xlu1 %2580 }
 0x7ee   :  { %v6864_v63 = vsub.f32 %v2550_v46, %v2598_v59  ;;  %v2599_v45 = vmul.f32 0.0078125, %v2581_v15  ;;  %2654 = vadd.xlane.f32.xlu0 %v2628_v37  ;;  %v2629_v61 = vmul.f32 %v6858_v21, %v6858_v21  ;;  %v5253_v46 = vld [vmem:[#allocation11 + $0x284] ss:$16 sps:$4 sm:$0xff]  }
 0x7ef   :  { %v2583_v38 = vpop.xlane.xlu0 %2582  ;;  %2987 = vmatprep.subr.bf16.mxu1 %v5253_v46 }
 0x7f0   :  { %v6870_v23 = vsub.f32 %v2551_v27, %v2599_v45  ;;  %v2600_v47 = vmul.f32 0.0078125, %v2583_v38  ;;  %2656 = vadd.xlane.f32.xlu1 %v2629_v61  ;;  %v2630_v24 = vmul.f32 %v6864_v63, %v6864_v63  ;;  %2988 = vmatpush1.bf16.msra.mxu1 %v5251_v39  ;;  %v6888_v45 = vld [vmem:[#allocation14 + $0x1] ss:$0 sm:$0xff] }
 0x7f1   :  { %v2585_v19 = vpop.xlane.xlu1 %2584  ;;  %2989 = vmatprep.subr.bf16.mxu1 %v5259_v50 }
 0x7f2   :  { %v6876_v6 = vsub.f32 %v2552_v13, %v2600_v47  ;;  %v2601_v52 = vmul.f32 0.0078125, %v2585_v19  ;;  %2658 = vadd.xlane.f32.xlu0 %v2630_v24  ;;  %v2631_v25 = vmul.f32 %v6870_v23, %v6870_v23  ;;  %v5262_v13 = vld [vmem:[#allocation11 + $0x2ac] ss:$16 sps:$4 sm:$0xff]  }
 0x7f3   :  { %3102 = vmatprep.subr.bf16.mxu0 %v5262_v13 }
 0x7f4   :  { %v6882_v27 = vsub.f32 %v2553_v9, %v2601_v52  ;;  %2660 = vadd.xlane.f32.xlu1 %v2631_v25  ;;  %v2632_v0 = vmul.f32 %v6876_v6, %v6876_v6  ;;  %2990 = vmatpush1.bf16.msra.mxu1 %v5257_v22  ;;  %v5268_v9 = vld [vmem:[#allocation11 + $0x2cc] ss:$16 sps:$4 sm:$0xff]  }
 0x7f5   :  { %3103 = vmatpush1.bf16.msra.mxu0 %v5260_v32  ;;  %2991 = vmatprep.subr.bf16.mxu1 %v5265_v57 }
 0x7f6   :  { %2662 = vadd.xlane.f32.xlu0 %v2632_v0  ;;  %v2633_v54 = vmul.f32 %v6882_v27, %v6882_v27  ;;  %3104 = vmatprep.subr.bf16.mxu0 %v5268_v9 }
 0x7f8   :  { %2664 = vadd.xlane.f32.xlu1 %v2633_v54  ;;  %2992 = vmatpush1.bf16.msra.mxu1 %v5263_v11 }
 0x7f9   :  { %3105 = vmatpush1.bf16.msra.mxu0 %v5266_v60  ;;  %2993 = vmatprep.subr.bf16.mxu1 %v5271_v12 }
 0x7fa   :  { %3106 = vmatprep.subr.bf16.mxu0 %v5274_v1 }
 0x7fc   :  { %2994 = vmatpush1.bf16.msra.mxu1 %v5269_v33 }
 0x7fd   :  { %3107 = vmatpush1.bf16.msra.mxu0 %v5272_v31 }
 0x867   :  { %v2635_v28 = vpop.xlane.xlu0 %2634 }
 0x868   :  { %v2666_v2 = vmul.f32 0.0078125, %v2635_v28 }
 0x869   :  { %v2637_v51 = vpop.xlane.xlu1 %2636 }
 0x86a   :  { %v2682_v62 = vadd.f32 1e-05, %v2666_v2  ;;  %v2667_v49 = vmul.f32 0.0078125, %v2637_v51 }
 0x86b   :  { %v2639_v29 = vpop.xlane.xlu0 %2638 }
 0x86c   :  { %5323 = vrsqrt.f32 %v2682_v62  ;;  %v2683_v18 = vadd.f32 1e-05, %v2667_v49  ;;  %v2668_v34 = vmul.f32 0.0078125, %v2639_v29 }
 0x86d   :  { %v2641_v16 = vpop.xlane.xlu1 %2640 }
 0x86e   :  { %5325 = vrsqrt.f32 %v2683_v18  ;;  %v2684_v55 = vadd.f32 1e-05, %v2668_v34  ;;  %v2669_v53 = vmul.f32 0.0078125, %v2641_v16 }
 0x86f   :  { %v2643_v35 = vpop.xlane.xlu0 %2642 }
 0x870   :  { %5327 = vrsqrt.f32 %v2684_v55  ;;  %v2685_v4 = vadd.f32 1e-05, %v2669_v53  ;;  %v2670_v30 = vmul.f32 0.0078125, %v2643_v35 }
 0x871   :  { %v2645_v59 = vpop.xlane.xlu1 %2644 }
 0x872   :  { %5329 = vrsqrt.f32 %v2685_v4  ;;  %v2671_v37 = vmul.f32 0.0078125, %v2645_v59  ;;  %v2686_v10 = vadd.f32 1e-05, %v2670_v30 }
 0x873   :  { %v2647_v15 = vpop.xlane.xlu0 %2646 }
 0x874   :  { %v2687_v20 = vadd.f32 1e-05, %v2671_v37  ;;  %v2672_v24 = vmul.f32 0.0078125, %v2647_v15 }
 0x875   :  { %v2649_v7 = vpop.xlane.xlu1 %2648 }
 0x876   :  { %v5324_v17 = vpop.eup %5323  ;;  %5331 = vrsqrt.f32 %v2687_v20  ;;  %v2673_v61 = vmul.f32 0.0078125, %v2649_v7  ;;  %v2688_v50 = vadd.f32 1e-05, %v2672_v24 }
 0x877   :  { %v2714_v38 = vmul.f32 %v5324_v17, %v6794_v5  ;;  %5333 = vrsqrt.f32 %v2686_v10  ;;  %v2651_v13 = vpop.xlane.xlu0 %2650 }
 0x878   :  { %v5326_v47 = vpop.eup %5325  ;;  %v2689_v39 = vadd.f32 1e-05, %v2673_v61  ;;  %v2674_v60 = vmul.f32 0.0078125, %v2651_v13 }
 0x879   :  { %v2738_v46 = vmul.f32 %v6888_v45, %v2714_v38  ;;  %v2715_v58 = vmul.f32 %v5326_v47, %v6800_v8  ;;  %v2653_v25 = vpop.xlane.xlu1 %2652 }
 0x87a   :  { %v5328_v19 = vpop.eup %5327  ;;  %5335 = vrsqrt.f32 %v2689_v39  ;;  %v2675_v54 = vmul.f32 0.0078125, %v2653_v25  ;;  %v2690_v28 = vadd.f32 1e-05, %v2674_v60 }
 0x87b   :  { %v2739_v52 = vmul.f32 %v6888_v45, %v2715_v58  ;;  %v6897_v22 = vadd.f32 %v6893_v44, %v2738_v46  ;;  %v2716_v32 = vmul.f32 %v5328_v19, %v6804_v42  ;;  %5337 = vrsqrt.f32 %v2688_v50  ;;  %v2655_v2 = vpop.xlane.xlu0 %2654 }
 0x87c   :  { %v5330_v0 = vpop.eup %5329  ;;  %v2691_v33 = vadd.f32 1e-05, %v2675_v54  ;;  %v2676_v16 = vmul.f32 0.0078125, %v2655_v2 }
 0x87d   :  { %v6900_v5 = vadd.f32 %v6893_v44, %v2739_v52  ;;  %v2717_v8 = vmul.f32 %v5330_v0, %v6812_v26  ;;  %v2740_v12 = vmul.f32 %v6888_v45, %v2716_v32  ;;  %v2657_v42 = vpop.xlane.xlu1 %2656 }
 0x87e   :  { %5339 = vrsqrt.f32 %v2691_v33  ;;  %v2677_v49 = vmul.f32 0.0078125, %v2657_v42  ;;  %v2692_v30 = vadd.f32 1e-05, %v2676_v16 }
 0x87f   :  { %v2778_v57 = vpack.c.bf16 %v6900_v5, %v6897_v22  ;;  %v2741_v9 = vmul.f32 %v6888_v45, %v2717_v8  ;;  %v6915_v51 = vadd.f32 %v6893_v44, %v2740_v12  ;;  %5341 = vrsqrt.f32 %v2690_v28  ;;  %v2659_v59 = vpop.xlane.xlu0 %2658 }
 0x880   :  { %v5332_v11 = vpop.eup %5331  ;;  %v2693_v53 = vadd.f32 1e-05, %v2677_v49  ;;  %v2678_v61 = vmul.f32 0.0078125, %v2659_v59  ;;  %v5412_v59 = vld [vmem:[#allocation5 + $0x40] sm:$0xff]  }
 0x881   :  { %3012 = vmatmul.mubr.bf16.vlgmr.msra.gmra.mrb[112].mxu1 %v2778_v57  ;;  %3125 = vmatmul.mubr.bf16.vlgmr.msra.gmra.mrb[128].mxu0 %v2778_v57  ;;  %v5334_v1 = vpop.eup %5333  ;;  %v6911_v26 = vadd.f32 %v6893_v44, %v2741_v9  ;;  %v2719_v31 = vmul.f32 %v5332_v11, %v6824_v14 }
 0x882   :  { %3021 = vmatprep.mubr.bf16.mxu1 %v5779_v48  ;;  %3134 = vmatprep.mubr.bf16.mxu0 %v5779_v48  ;;  %v2718_v62 = vmul.f32 %v5334_v1, %v6816_v41  ;;  %v2661_v41 = vpop.xlane.xlu1 %2660  ;;  %5343 = vrsqrt.f32 %v2693_v53  ;;  %v2694_v58 = vadd.f32 1e-05, %v2678_v61 }
 0x883   :  { %v2779_v29 = vpack.c.bf16 %v6911_v26, %v6915_v51  ;;  %v2743_v18 = vmul.f32 %v6888_v45, %v2719_v31  ;;  %v2679_v20 = vmul.f32 0.0078125, %v2661_v41  ;;  %5345 = vrsqrt.f32 %v2692_v30  ;;  %v2663_v19 = vpop.xlane.xlu0 %2662  ;;  %v5411_v30 = vld [vmem:[#allocation5] sm:$0xff]  }
 0x884   :  { %v5336_v34 = vpop.eup %5335  ;;  %v2742_v14 = vmul.f32 %v6888_v45, %v2718_v62  ;;  %v2680_v32 = vmul.f32 0.0078125, %v2663_v19 }
 0x885   :  { %v5338_v55 = vpop.eup %5337  ;;  %v6925_v35 = vadd.f32 %v6893_v44, %v2743_v18  ;;  %v2721_v4 = vmul.f32 %v5336_v34, %v6836_v40  ;;  %v2695_v47 = vadd.f32 1e-05, %v2679_v20 }
 0x886   :  { %v6929_v37 = vadd.f32 %v6893_v44, %v2742_v14  ;;  %v2720_v10 = vmul.f32 %v5338_v55, %v6828_v36  ;;  %v2665_v36 = vpop.xlane.xlu1 %2664  ;;  %v2696_v9 = vadd.f32 1e-05, %v2680_v32 }
 0x887   :  { %v2745_v7 = vmul.f32 %v6888_v45, %v2721_v4  ;;  %5347 = vrsqrt.f32 %v2695_v47  ;;  %v2681_v25 = vmul.f32 0.0078125, %v2665_v36  ;;  %v3852_v36 = vld [vmem:[#allocation7 + $0x20] sm:$0xff] }
 0x888   :  { %v2780_v15 = vpack.c.bf16 %v6925_v35, %v6929_v37  ;;  %v5340_v17 = vpop.eup %5339  ;;  %v2744_v40 = vmul.f32 %v6888_v45, %v2720_v10  ;;  %5349 = vrsqrt.f32 %v2694_v58  ;;  %v3850_v10 = vld [vmem:[#allocation7 + $0x10] sm:$0xff]  ;;  %vm3868_vm6 = vcmp.gt.f32.partialorder %v3852_v36, 0.0 }
 0x889   :  { %3022 = vmatmul.mubr.bf16.gmra.mrb[116].mxu1 %v2779_v29  ;;  %3135 = vmatmul.mubr.bf16.gmra.mrb[132].mxu0 %v2779_v29  ;;  %v5342_v38 = vpop.eup %5341  ;;  %v6939_v24 = vadd.f32 %v6893_v44, %v2745_v7  ;;  %v2723_v46 = vmul.f32 %v5340_v17, %v6848_v56  ;;  %v2697_v54 = vadd.f32 1e-05, %v2681_v25  ;;  %vm3866_vm1 = vcmp.gt.f32.partialorder %v3850_v10, 0.0  ;;  %v3848_v7 = vld [vmem:[#allocation7] sm:$0xff] }
 0x88a   :  { %3031 = vmatprep.mubr.bf16.mxu1 %v5779_v48  ;;  %3144 = vmatprep.mubr.bf16.mxu0 %v5779_v48  ;;  %v6943_v39 = vadd.f32 %v6893_v44, %v2744_v40  ;;  %v2722_v52 = vmul.f32 %v5342_v38, %v6840_v3  ;;  %vm3864_vm2 = vcmp.gt.f32.partialorder %v3848_v7, 0.0  ;;  %v3856_v17 = vld [vmem:[#allocation7 + $0x40] sm:$0xff]  ;;  %v3859_v40 = vld [vmem:[#allocation7 + $0x58] sm:$0xff] }
 0x88b   :  { %v2747_v50 = vmul.f32 %v6888_v45, %v2723_v46  ;;  %5351 = vrsqrt.f32 %v2697_v54  ;;  %v7010_v61 = vsel %vm3864_vm2, 1, %v5779_v48  ;;  %vm3872_vm4 = vcmp.gt.f32.partialorder %v3856_v17, 0.0 }
 0x88c   :  { %v2781_v0 = vpack.c.bf16 %v6939_v24, %v6943_v39  ;;  %v5344_v13 = vpop.eup %5343  ;;  %v2746_v56 = vmul.f32 %v6888_v45, %v2722_v52  ;;  %5353 = vrsqrt.f32 %v2696_v9  ;;  %3897 = vperm.xlu0 %5083, %v7010_v61   ;;  %vm3875_vm5 = vcmp.gt.f32.partialorder %v3859_v40, 0.0 }
 0x88d   :  { %v5346_v8 = vpop.eup %5345  ;;  %v6953_v3 = vadd.f32 %v6893_v44, %v2747_v50  ;;  %v2725_v57 = vmul.f32 %v5344_v13, %v6858_v21  ;;  %v7022_v32 = vsel %vm3872_vm4, 1, %v5779_v48  ;;  %v7029_v9 = vsel %vm3875_vm5, 1, %v5779_v48 }
 0x88e   :  { %v6957_v11 = vadd.f32 %v6893_v44, %v2746_v56  ;;  %v2724_v60 = vmul.f32 %v5346_v8, %v6852_v43  ;;  %v3860_v56 = vld [vmem:[#allocation7 + $0x60] sm:$0xff] }
 0x88f   :  { %v2749_v1 = vmul.f32 %v6888_v45, %v2725_v57  ;;  %v3853_v57 = vld [vmem:[#allocation7 + $0x28] sm:$0xff]  ;;  %vm3876_vm7 = vcmp.gt.f32.partialorder %v3860_v56, 0.0 }
 0x890   :  { %v2782_v12 = vpack.c.bf16 %v6953_v3, %v6957_v11  ;;  %v2748_v42 = vmul.f32 %v6888_v45, %v2724_v60  ;;  %3921 = vperm.xlu0 %5083, %v7022_v32   ;;  %v7032_v60 = vsel %vm3868_vm6, 1, %v5779_v48  ;;  %vm3869_vm8 = vcmp.gt.f32.partialorder %v3853_v57, 0.0 }
 0x891   :  { %3032 = vmatmul.mubr.bf16.gmra.mrb[120].mxu1 %v2780_v15  ;;  %3145 = vmatmul.mubr.bf16.gmra.mrb[136].mxu0 %v2780_v15  ;;  %v5348_v33 = vpop.eup %5347  ;;  %v6967_v21 = vadd.f32 %v6893_v44, %v2749_v1  ;;  %v3851_v15 = vld [vmem:[#allocation7 + $0x18] sm:$0xff] }
 0x892   :  { %3041 = vmatprep.mubr.bf16.mxu1 %v5779_v48  ;;  %3154 = vmatprep.mubr.bf16.mxu0 %v5779_v48  ;;  %v5350_v31 = vpop.eup %5349  ;;  %v2727_v43 = vmul.f32 %v5348_v33, %v6870_v23  ;;  %v6971_v28 = vadd.f32 %v6893_v44, %v2748_v42  ;;  %vm3867_vm3 = vcmp.gt.f32.partialorder %v3851_v15, 0.0  ;;  %v3854_v42 = vld [vmem:[#allocation7 + $0x30] sm:$0xff] }
 0x893   :  { %v2726_v2 = vmul.f32 %v5350_v31, %v6864_v63  ;;  %v7019_v25 = vsel %vm3867_vm3, 1, %v5779_v48  ;;  %vm3870_vm10 = vcmp.gt.f32.partialorder %v3854_v42, 0.0 }
 0x894   :  { %v2783_v62 = vpack.c.bf16 %v6967_v21, %v6971_v28  ;;  %v2751_v49 = vmul.f32 %v6888_v45, %v2727_v43  ;;  %3930 = vperm.xlu0 %5083, %v7029_v9  }
 0x895   :  { %v5352_v29 = vpop.eup %5351  ;;  %v2750_v18 = vmul.f32 %v6888_v45, %v2726_v2  ;;  %v7039_v2 = vsel %vm3876_vm7, 1, %v5779_v48 }
 0x896   :  { %v5354_v34 = vpop.eup %5353  ;;  %v6981_v23 = vadd.f32 %v6893_v44, %v2751_v49  ;;  %v2729_v63 = vmul.f32 %v5352_v29, %v6882_v27  ;;  %v7044_v29 = vsel %vm3869_vm8, 1, %v5779_v48 }
 0x897   :  { %v6985_v16 = vadd.f32 %v6893_v44, %v2750_v18  ;;  %v2728_v14 = vmul.f32 %v5354_v34, %v6876_v6 }
 0x898   :  { %v2753_v53 = vmul.f32 %v6888_v45, %v2729_v63  ;;  %3933 = vperm.xlu0 %5083, %v7039_v2  }
 0x899   :  { %3042 = vmatmul.mubr.bf16.gmra.mrb[124].mxu1 %v2781_v0  ;;  %3155 = vmatmul.mubr.bf16.gmra.mrb[140].mxu0 %v2781_v0  ;;  %v2784_v55 = vpack.c.bf16 %v6981_v23, %v6985_v16  ;;  %v2752_v41 = vmul.f32 %v6888_v45, %v2728_v14  ;;  %v3849_v45 = vld [vmem:[#allocation7 + $0x8] sm:$0xff] }
 0x89a   :  { %3051 = vmatprep.mubr.bf16.mxu1 %v5779_v48  ;;  %3164 = vmatprep.mubr.bf16.mxu0 %v5779_v48  ;;  %v6995_v27 = vadd.f32 %v6893_v44, %v2753_v53  ;;  %vm3865_vm0 = vcmp.gt.f32.partialorder %v3849_v45, 0.0  ;;  %v3855_v53 = vld [vmem:[#allocation7 + $0x38] sm:$0xff] }
 0x89b   :  { %v6998_v4 = vadd.f32 %v6893_v44, %v2752_v41  ;;  %v7003_v20 = vsel %vm3865_vm0, 1, %v5779_v48  ;;  %v7007_v44 = vsel %vm3866_vm1, 1, %v5779_v48  ;;  %vm3871_vm11 = vcmp.gt.f32.partialorder %v3855_v53, 0.0 }
 0x89c   :  { %3900 = vperm.xlu1 %5084, %v7003_v20   ;;  %v3887_v17 = vsel %vm3871_vm11, 1, %v5779_v48  ;;  %vm5782_vm0 = vmmov 0  }
 0x89d   :  { %v2785_v6 = vpack.c.bf16 %v6995_v27, %v6998_v4 }
 0x8a0   :  { %3903 = vperm.xlu1 %5084, %v7007_v44  }
 0x8a1   :  { %3052 = vmatmul.mubr.bf16.gmra.mrb[128].mxu1 %v2782_v12  ;;  %3165 = vmatmul.mubr.bf16.gmra.mrb[144].mxu0 %v2782_v12  ;;  %v3863_v12 = vld [vmem:[#allocation7 + $0x78] sm:$0xff] }
 0x8a2   :  { %3061 = vmatprep.mubr.bf16.mxu1 %v5779_v48  ;;  %3174 = vmatprep.mubr.bf16.mxu0 %v5779_v48  ;;  %vm3879_vm9 = vcmp.gt.f32.partialorder %v3863_v12, 0.0 }
 0x8a3   :  { %v7051_v41 = vsel %vm3879_vm9, 1, %v5779_v48 }
 0x8a4   :  { %3906 = vperm.xlu1 %5084, %v7019_v25   ;;  %3942 = vperm.xlu0 %5083, %v7051_v41  }
 0x8a8   :  { %3909 = vperm.xlu1 %5084, %v7032_v60  }
 0x8a9   :  { %3062 = vmatmul.mubr.bf16.gmra.mrb[132].mxu1 %v2783_v62  ;;  %3175 = vmatmul.mubr.bf16.gmra.mrb[148].mxu0 %v2783_v62 }
 0x8aa   :  { %3071 = vmatprep.mubr.bf16.mxu1 %v5779_v48  ;;  %3184 = vmatprep.mubr.bf16.mxu0 %v5779_v48 }
 0x8ac   :  { %3912 = vperm.xlu1 %5084, %v7044_v29  }
 0x8b1   :  { %3072 = vmatmul.mubr.bf16.gmra.mrb[136].mxu1 %v2784_v55  ;;  %3185 = vmatmul.mubr.bf16.gmra.mrb[152].mxu0 %v2784_v55 }
 0x8b2   :  { %3081 = vmatprep.mubr.bf16.mxu1 %v5779_v48  ;;  %3194 = vmatprep.mubr.bf16.mxu0 %v5779_v48 }
 0x8b9   :  { %3082 = vmatmul.mubr.bf16.gmra.mrb[140].mxu1 %v2785_v6  ;;  %3195 = vmatmul.mubr.bf16.gmra.mrb[156].mxu0 %v2785_v6  ;;  %v3886_v6 = vsel %vm3870_vm10, 1, %v5779_v48 }
 0x8ba   :  { %4938 = vmatprep.mubr.bf16.mxu1 %v5411_v30  ;;  %4970 = vmatprep.mubr.bf16.mxu0 %v5412_v59 }
 0x8bb   :  { %3915 = vperm.xlu1 %5084, %v3886_v6  }
 0x8bf   :  { %3918 = vperm.xlu1 %5084, %v3887_v17  }
 0x954   :  { %v7012_v38 = vpop.f32.mrb[112].mxu1  ;;  %v3126_v47 = vpop.f32.mrb[128].mxu0 }
 0x955   :  { %v3015_v46 = vpop.f32.mrb[113].mxu1  ;;  %v3128_v58 = vpop.f32.mrb[129].mxu0 }
 0x956   :  { %v7016_v19 = vpop.f32.mrb[114].mxu1  ;;  %v3130_v52 = vpop.f32.mrb[130].mxu0 }
 0x957   :  { %v3230_v0 = vpack.c.bf16 %v3130_v52, %v3126_v47  ;;  %v3019_v50 = vpop.f32.mrb[115].mxu1  ;;  %v3132_v13 = vpop.f32.mrb[131].mxu0  ;;  %v5780_v52 = vmov 1  }
 0x958   :  { %v3229_v8 = vpack.c.bf16 %v3019_v50, %v3015_v46  ;;  %v7024_v54 = vpack.c.bf16 %v3132_v13, %v3128_v58  ;;  %5089 = vset.pattern.permute.xlu0 %v5780_v52  ;;  %5085 = vset.pattern.permute.xlu1 %v5780_v52 }
 0x959   :  { %4954 = vmatprep.subr.bf16.mxu0 %v3230_v0  ;;  %4003 = vperm.xlu0 %5089, %v7003_v20  }
 0x95a   :  { %4922 = vmatprep.subr.bf16.mxu1 %v3229_v8  ;;  %4955 = vmatpush3.bf16.msra.mxu0 %v3230_v0 }
 0x95b   :  { %4923 = vmatpush3.bf16.msra.mxu1 %v3229_v8  ;;  %4000 = vperm.xlu1 %5085, %v7010_v61  }
 0x95c   :  { %v7034_v1 = vpop.f32.mrb[116].mxu1  ;;  %v3136_v33 = vpop.f32.mrb[132].mxu0 }
 0x95d   :  { %v3025_v31 = vpop.f32.mrb[117].mxu1  ;;  %v3138_v43 = vpop.f32.mrb[133].mxu0  ;;  %4012 = vperm.xlu0 %5089, %v7032_v60  }
 0x95e   :  { %v7041_v62 = vpop.f32.mrb[118].mxu1  ;;  %v3140_v49 = vpop.f32.mrb[134].mxu0 }
 0x95f   :  { %v3233_v18 = vpack.c.bf16 %v3140_v49, %v3136_v33  ;;  %v3029_v34 = vpop.f32.mrb[119].mxu1  ;;  %v3142_v63 = vpop.f32.mrb[135].mxu0  ;;  %4006 = vperm.xlu1 %5085, %v7007_v44   ;;  %v3857_v44 = vld [vmem:[#allocation7 + $0x48] sm:$0xff] }
 0x960   :  { %v3232_v14 = vpack.c.bf16 %v3029_v34, %v3025_v31  ;;  %v7046_v55 = vpack.c.bf16 %v3142_v63, %v3138_v43  ;;  %vm3873_vm12 = vcmp.gt.f32.partialorder %v3857_v44, 0.0 }
 0x961   :  { %4956 = vmatprep.subr.bf16.mxu0 %v3233_v18  ;;  %4018 = vperm.xlu0 %5089, %v3886_v6  }
 0x962   :  { %4924 = vmatprep.subr.bf16.mxu1 %v3232_v14  ;;  %4957 = vmatpush3.bf16.msra.mxu0 %v3233_v18 }
 0x963   :  { %4925 = vmatpush3.bf16.msra.mxu1 %v3232_v14  ;;  %4009 = vperm.xlu1 %5085, %v7019_v25  }
 0x964   :  { %v7054_v30 = vpop.f32.mrb[120].mxu1  ;;  %v3146_v59 = vpop.f32.mrb[136].mxu0 }
 0x965   :  { %v3035_v45 = vpop.f32.mrb[121].mxu1  ;;  %v3148_v10 = vpop.f32.mrb[137].mxu0 }
 0x966   :  { %v7057_v15 = vpop.f32.mrb[122].mxu1  ;;  %v3150_v7 = vpop.f32.mrb[138].mxu0 }
 0x967   :  { %v3236_v40 = vpack.c.bf16 %v3150_v7, %v3146_v59  ;;  %v3039_v47 = vpop.f32.mrb[123].mxu1  ;;  %v3152_v36 = vpop.f32.mrb[139].mxu0  ;;  %4015 = vperm.xlu1 %5085, %v7044_v29   ;;  %v7089_v29 = vsel %vm3873_vm12, 1, %v5779_v48 }
 0x968   :  { %v3235_v46 = vpack.c.bf16 %v3039_v47, %v3035_v45  ;;  %v7060_v58 = vpack.c.bf16 %v3152_v36, %v3148_v10 }
 0x969   :  { %4958 = vmatprep.subr.bf16.mxu0 %v3236_v40 }
 0x96a   :  { %4926 = vmatprep.subr.bf16.mxu1 %v3235_v46  ;;  %4959 = vmatpush3.bf16.msra.mxu0 %v3236_v40 }
 0x96b   :  { %4927 = vmatpush3.bf16.msra.mxu1 %v3235_v46  ;;  %4021 = vperm.xlu1 %5085, %v3887_v17  }
 0x96c   :  { %v7064_v0 = vpop.f32.mrb[124].mxu1  ;;  %v3156_v50 = vpop.f32.mrb[140].mxu0 }
 0x96d   :  { %v3045_v13 = vpop.f32.mrb[125].mxu1  ;;  %v3158_v56 = vpop.f32.mrb[141].mxu0 }
 0x96e   :  { %v7067_v8 = vpop.f32.mrb[126].mxu1  ;;  %v3160_v57 = vpop.f32.mrb[142].mxu0 }
 0x96f   :  { %v3239_v12 = vpack.c.bf16 %v3160_v57, %v3156_v50  ;;  %v3049_v33 = vpop.f32.mrb[127].mxu1  ;;  %v3162_v42 = vpop.f32.mrb[143].mxu0  ;;  %5086 = vset.pattern.permute.xlu1 %v5779_v48 }
 0x970   :  { %v3238_v31 = vpack.c.bf16 %v3049_v33, %v3045_v13  ;;  %v7071_v43 = vpack.c.bf16 %v3162_v42, %v3158_v56  ;;  %v3858_v13 = vld [vmem:[#allocation7 + $0x50] sm:$0xff]  ;;  %3924 = vperm.xlu1 %5086, %v7089_v29  }
 0x971   :  { %4960 = vmatprep.subr.bf16.mxu0 %v3239_v12  ;;  %vm3874_vm13 = vcmp.gt.f32.partialorder %v3858_v13, 0.0 }
 0x972   :  { %4928 = vmatprep.subr.bf16.mxu1 %v3238_v31  ;;  %4961 = vmatpush3.bf16.msra.mxu0 %v3239_v12 }
 0x973   :  { %4929 = vmatpush3.bf16.msra.mxu1 %v3238_v31  ;;  %v3890_v31 = vsel %vm3874_vm13, 1, %v5779_v48 }
 0x974   :  { %v7074_v20 = vpop.f32.mrb[128].mxu1  ;;  %v3166_v49 = vpop.f32.mrb[144].mxu0  ;;  %3927 = vperm.xlu1 %5086, %v3890_v31  }
 0x975   :  { %v3055_v18 = vpop.f32.mrb[129].mxu1  ;;  %v3168_v61 = vpop.f32.mrb[145].mxu0 }
 0x976   :  { %v7076_v34 = vpop.f32.mrb[130].mxu1  ;;  %v3170_v63 = vpop.f32.mrb[146].mxu0 }
 0x977   :  { %v3242_v14 = vpack.c.bf16 %v3170_v63, %v3166_v49  ;;  %v3059_v60 = vpop.f32.mrb[131].mxu1  ;;  %v3172_v53 = vpop.f32.mrb[147].mxu0  ;;  %v7096_v49 = vld [vmem:[#allocation13 + $0x2] ss:$0 sm:$0xff] }
 0x978   :  { %v3241_v59 = vpack.c.bf16 %v3059_v60, %v3055_v18  ;;  %v7079_v45 = vpack.c.bf16 %v3172_v53, %v3168_v61  ;;  %5087 = vset.pattern.permute.xlu1 %v5780_v52 }
 0x979   :  { %4962 = vmatprep.subr.bf16.mxu0 %v3242_v14  ;;  %4024 = vperm.xlu1 %5087, %v7022_v32   ;;  %v5414_v32 = vld [vmem:[#allocation5 + $0x8] sm:$0xff]  }
 0x97a   :  { %4930 = vmatprep.subr.bf16.mxu1 %v3241_v59  ;;  %4963 = vmatpush3.bf16.msra.mxu0 %v3242_v14 }
 0x97b   :  { %4931 = vmatpush3.bf16.msra.mxu1 %v3241_v59 }
 0x97c   :  { %v7082_v6 = vpop.f32.mrb[132].mxu1  ;;  %v3176_v10 = vpop.f32.mrb[148].mxu0 }
 0x97d   :  { %v3065_v7 = vpop.f32.mrb[133].mxu1  ;;  %v3178_v40 = vpop.f32.mrb[149].mxu0  ;;  %4030 = vperm.xlu1 %5087, %v3890_v31   ;;  %v5417_v31 = vld [vmem:[#allocation5 + $0x58] sm:$0xff]  }
 0x97e   :  { %v7084_v47 = vpop.f32.mrb[134].mxu1  ;;  %v3180_v36 = vpop.f32.mrb[150].mxu0 }
 0x97f   :  { %v3245_v25 = vpack.c.bf16 %v3180_v36, %v3176_v10  ;;  %v3069_v46 = vpop.f32.mrb[135].mxu1  ;;  %v3182_v50 = vpop.f32.mrb[151].mxu0 }
 0x980   :  { %v3244_v56 = vpack.c.bf16 %v3069_v46, %v3065_v7  ;;  %v7086_v57 = vpack.c.bf16 %v3182_v50, %v3178_v40 }
 0x981   :  { %4964 = vmatprep.subr.bf16.mxu0 %v3245_v25  ;;  %4033 = vperm.xlu1 %5087, %v7029_v9   ;;  %v5419_v9 = vld [vmem:[#allocation5 + $0x60] sm:$0xff]  }
 0x982   :  { %4932 = vmatprep.subr.bf16.mxu1 %v3244_v56  ;;  %4965 = vmatpush3.bf16.msra.mxu0 %v3245_v25 }
 0x983   :  { %4933 = vmatpush3.bf16.msra.mxu1 %v3244_v56 }
 0x984   :  { %v7092_v12 = vpop.f32.mrb[136].mxu1  ;;  %v3186_v33 = vpop.f32.mrb[152].mxu0 }
 0x985   :  { %v3075_v17 = vpop.f32.mrb[137].mxu1  ;;  %v3188_v42 = vpop.f32.mrb[153].mxu0  ;;  %5088 = vset.pattern.permute.xlu1 %v5779_v48 }
 0x986   :  { %v3077_v18 = vpop.f32.mrb[138].mxu1  ;;  %v3190_v61 = vpop.f32.mrb[154].mxu0 }
 0x987   :  { %v7099_v63 = vadd.f32 %v7096_v49, %v3077_v18  ;;  %v3248_v14 = vpack.c.bf16 %v3190_v61, %v3186_v33  ;;  %v3079_v60 = vpop.f32.mrb[139].mxu1  ;;  %v3192_v53 = vpop.f32.mrb[155].mxu0  ;;  %v5413_v18 = vld [vmem:[#allocation5 + $0x48] sm:$0xff]   ;;  %v5415_v61 = vld [vmem:[#allocation5 + $0x50] sm:$0xff]  }
 0x988   :  { %v3247_v59 = vpack.c.bf16 %v3079_v60, %v3075_v17  ;;  %v7101_v44 = vpack.c.bf16 %v3192_v53, %v3188_v42  ;;  %v5418_v60 = vld [vmem:[#allocation5 + $0x18] sm:$0xff]   ;;  %v5420_v53 = vld [vmem:[#allocation5 + $0x20] sm:$0xff]  }
 0x989   :  { %4966 = vmatprep.subr.bf16.mxu0 %v3248_v14 }
 0x98a   :  { %4934 = vmatprep.subr.bf16.mxu1 %v3247_v59  ;;  %4967 = vmatpush3.bf16.msra.mxu0 %v3248_v14  ;;  %v5416_v14 = vld [vmem:[#allocation5 + $0x10] sm:$0xff]  }
 0x98b   :  { %4935 = vmatpush3.bf16.msra.mxu1 %v3247_v59  ;;  %v5423_v59 = vld [vmem:[#allocation5 + $0x70] sm:$0xff]  }
 0x98c   :  { %v7103_v10 = vpop.f32.mrb[140].mxu1  ;;  %v3196_v7 = vpop.f32.mrb[156].mxu0 }
 0x98d   :  { %v3085_v40 = vpop.f32.mrb[141].mxu1  ;;  %v3198_v36 = vpop.f32.mrb[157].mxu0 }
 0x98e   :  { %v3087_v25 = vpop.f32.mrb[142].mxu1  ;;  %v3200_v46 = vpop.f32.mrb[158].mxu0 }
 0x98f   :  { %v7108_v50 = vadd.f32 %v7096_v49, %v3087_v25  ;;  %v3251_v13 = vpack.c.bf16 %v3200_v46, %v3196_v7  ;;  %v3089_v56 = vpop.f32.mrb[143].mxu1  ;;  %v3202_v33 = vpop.f32.mrb[159].mxu0  ;;  %v5424_v7 = vld [vmem:[#allocation5 + $0x30] sm:$0xff]   ;;  %v5430_v25 = vld [vmem:[#allocation5 + $0x98] sm:$0xff]   ;;  %v5431_v46 = vld [vmem:[#allocation5 + $0xa0] sm:$0xff]  }
 0x990   :  { %v3250_v17 = vpack.c.bf16 %v3089_v56, %v3085_v40  ;;  %v3252_v42 = vpack.c.bf16 %v3202_v33, %v3198_v36  ;;  %v5427_v40 = vld [vmem:[#allocation5 + $0x80] sm:$0xff]   ;;  %v5428_v36 = vld [vmem:[#allocation5 + $0x88] sm:$0xff]   ;;  %v5434_v56 = vld [vmem:[#allocation5 + $0xb8] sm:$0xff]  }
 0x991   :  { %4968 = vmatprep.subr.bf16.mxu0 %v3251_v13  ;;  %v3861_v33 = vld [vmem:[#allocation7 + $0x68] sm:$0xff] }
 0x992   :  { %4936 = vmatprep.subr.bf16.mxu1 %v3250_v17  ;;  %4969 = vmatpush3.bf16.msra.mxu0 %v3251_v13  ;;  %v5433_v13 = vld [vmem:[#allocation5 + $0xb0] sm:$0xff]   ;;  %vm3877_vm14 = vcmp.gt.f32.partialorder %v3861_v33, 0.0 }
 0x993   :  { %4937 = vmatpush3.bf16.msra.mxu1 %v3250_v17  ;;  %v3862_v17 = vld [vmem:[#allocation7 + $0x70] sm:$0xff] }
 0x994   :  { %4986 = vmatprep.subr.bf16.mxu1 %v7024_v54  ;;  %vm3878_vm15 = vcmp.gt.f32.partialorder %v3862_v17, 0.0  ;;  %v3218_v17 = vadd.f32 %v7096_v49, %v7057_v15 }
 0x995   :  { %4971 = vmatmul.mubr.bf16.vlgmr.msra.gmra.mrb[160].mxu0 %v5413_v18  ;;  %v3215_v18 = vadd.f32 %v7096_v49, %v7034_v1 }
 0x996   :  { %4939 = vmatmul.mubr.bf16.vlgmr.msra.gmra.mrb[144].mxu1 %v5414_v32  ;;  %4974 = vmatprep.mubr.bf16.mxu0 %v5415_v61  ;;  %v3213_v61 = vadd.f32 %v7096_v49, %v7012_v38 }
 0x997   :  { %4987 = vmatpush3.bf16.msra.mxu1 %v7024_v54  ;;  %4942 = vmatprep.mubr.bf16.mxu1 %v5416_v14  ;;  %v5421_v54 = vld [vmem:[#allocation5 + $0x68] sm:$0xff]  }
 0x998   :  { %4988 = vmatprep.subr.bf16.mxu1 %v7046_v55 }
 0x99b   :  { %4989 = vmatpush3.bf16.msra.mxu1 %v7046_v55  ;;  %v5422_v55 = vld [vmem:[#allocation5 + $0x28] sm:$0xff]  }
 0x99c   :  { %4990 = vmatprep.subr.bf16.mxu1 %v7060_v58 }
 0x99d   :  { %4975 = vmatmul.mubr.bf16.gmra.mrb[164].mxu0 %v5417_v31 }
 0x99e   :  { %4943 = vmatmul.mubr.bf16.gmra.mrb[148].mxu1 %v5418_v60  ;;  %4978 = vmatprep.mubr.bf16.mxu0 %v5419_v9  ;;  %v3216_v60 = vadd.f32 %v7096_v49, %v7041_v62  ;;  %v3219_v62 = vadd.f32 %v7096_v49, %v7064_v0 }
 0x99f   :  { %4991 = vmatpush3.bf16.msra.mxu1 %v7060_v58  ;;  %4946 = vmatprep.mubr.bf16.mxu1 %v5420_v53  ;;  %v5425_v58 = vld [vmem:[#allocation5 + $0x78] sm:$0xff]  }
 0x9a0   :  { %4992 = vmatprep.subr.bf16.mxu1 %v7071_v43 }
 0x9a3   :  { %4993 = vmatpush3.bf16.msra.mxu1 %v7071_v43  ;;  %v5426_v43 = vld [vmem:[#allocation5 + $0x38] sm:$0xff]  }
 0x9a4   :  { %4994 = vmatprep.subr.bf16.mxu1 %v7079_v45 }
 0x9a5   :  { %4979 = vmatmul.mubr.bf16.gmra.mrb[168].mxu0 %v5421_v54  ;;  %v3214_v54 = vadd.f32 %v7096_v49, %v7016_v19  ;;  %v3217_v19 = vadd.f32 %v7096_v49, %v7054_v30 }
 0x9a6   :  { %4947 = vmatmul.mubr.bf16.gmra.mrb[152].mxu1 %v5422_v55  ;;  %4982 = vmatprep.mubr.bf16.mxu0 %v5423_v59 }
 0x9a7   :  { %4995 = vmatpush3.bf16.msra.mxu1 %v7079_v45  ;;  %4950 = vmatprep.mubr.bf16.mxu1 %v5424_v7  ;;  %v5429_v45 = vld [vmem:[#allocation5 + $0x90] sm:$0xff]  }
 0x9a8   :  { %4996 = vmatprep.subr.bf16.mxu1 %v7086_v57 }
 0x9ab   :  { %4997 = vmatpush3.bf16.msra.mxu1 %v7086_v57  ;;  %v5432_v57 = vld [vmem:[#allocation5 + $0xa8] sm:$0xff]  }
 0x9ac   :  { %4998 = vmatprep.subr.bf16.mxu1 %v7101_v44 }
 0x9ad   :  { %4983 = vmatmul.mubr.bf16.gmra.mrb[172].mxu0 %v5425_v58 }
 0x9ae   :  { %4951 = vmatmul.mubr.bf16.gmra.mrb[156].mxu1 %v5426_v43 }
 0x9af   :  { %4999 = vmatpush3.bf16.msra.mxu1 %v7101_v44  ;;  %5002 = vmatprep.mubr.bf16.mxu1 %v5427_v40  ;;  %v7127_v44 = vsel %vm3877_vm14, 1, %v5779_v48 }
 0x9b0   :  { %5000 = vmatprep.subr.bf16.mxu1 %v3252_v42  ;;  %3936 = vperm.xlu1 %5088, %v7127_v44  }
 0x9b3   :  { %5001 = vmatpush3.bf16.msra.mxu1 %v3252_v42  ;;  %v7131_v42 = vsel %vm3878_vm15, 1, %v5779_v48 }
 0x9b4   :  { %3939 = vperm.xlu1 %5088, %v7131_v42  }
 0x9b6   :  { %5003 = vmatmul.mubr.bf16.vlgmr.msra.gmra.mrb[160].mxu1 %v5428_v36 }
 0x9b7   :  { %5006 = vmatprep.mubr.bf16.mxu1 %v5429_v45 }
 0x9b8   :  { %5090 = vset.pattern.permute.xlu1 %v5780_v52 }
 0x9be   :  { %5007 = vmatmul.mubr.bf16.gmra.mrb[164].mxu1 %v5430_v25 }
 0x9bf   :  { %5010 = vmatprep.mubr.bf16.mxu1 %v5431_v46 }
 0x9c6   :  { %5011 = vmatmul.mubr.bf16.gmra.mrb[168].mxu1 %v5432_v57  ;;  %v3220_v57 = vadd.f32 %v7096_v49, %v7067_v8  ;;  %v3223_v8 = vadd.f32 %v7096_v49, %v7082_v6 }
 0x9c7   :  { %5014 = vmatprep.mubr.bf16.mxu1 %v5433_v13 }
 0x9ce   :  { %5015 = vmatmul.mubr.bf16.gmra.mrb[172].mxu1 %v5434_v56 }
 0xa68   :  { %v4972_v32 = vpop.f32.mrb[160].mxu0 }
 0xa69   :  { %v4940_v14 = vpop.f32.mrb[144].mxu1  ;;  %v3400_v31 = vpop.f32.mrb[161].mxu0 }
 0xa6a   :  { %v3352_v9 = vadd.f32 %v4940_v14, %v3215_v18  ;;  %v3287_v53 = vpop.f32.mrb[145].mxu1  ;;  %v4973_v48 = vpop.f32.mrb[162].mxu0 }
 0xa6b   :  { %v3350_v55 = vadd.f32 %v3287_v53, %v3213_v61  ;;  %v4941_v52 = vpop.f32.mrb[146].mxu1  ;;  %v3403_v59 = vpop.f32.mrb[163].mxu0 }
 0xa6c   :  { %v3353_v7 = vadd.f32 %v4941_v52, %v3216_v60  ;;  %v7143_v1 = vadd.f32 %v4972_v32, %v3352_v9  ;;  %v3290_v58 = vpop.f32.mrb[147].mxu1  ;;  %v3224_v52 = vadd.f32 %v7096_v49, %v7084_v47  ;;  %v3227_v47 = vadd.f32 %v7096_v49, %v7103_v10 }
 0xa6d   :  { %v3351_v43 = vadd.f32 %v3290_v58, %v3214_v54  ;;  %v7145_v38 = vadd.f32 %v3400_v31, %v3350_v55  ;;  %v3221_v54 = vadd.f32 %v7096_v49, %v7074_v20 }
 0xa6e   :  { %v7147_v40 = vadd.f32 %v4973_v48, %v3353_v7 }
 0xa6f   :  { %v7149_v36 = vadd.f32 %v3403_v59, %v3351_v43  ;;  %v3222_v43 = vadd.f32 %v7096_v49, %v7076_v34 }
 0xa70   :  { %v4976_v45 = vpop.f32.mrb[164].mxu0 }
 0xa71   :  { %v4944_v25 = vpop.f32.mrb[148].mxu1  ;;  %v3416_v46 = vpop.f32.mrb[165].mxu0 }
 0xa72   :  { %v3356_v13 = vadd.f32 %v4944_v25, %v3219_v62  ;;  %v3303_v56 = vpop.f32.mrb[149].mxu1  ;;  %v4977_v33 = vpop.f32.mrb[166].mxu0 }
 0xa73   :  { %v3354_v18 = vadd.f32 %v3303_v56, %v3217_v19  ;;  %v4945_v32 = vpop.f32.mrb[150].mxu1  ;;  %v3419_v61 = vpop.f32.mrb[167].mxu0 }
 0xa74   :  { %v3357_v14 = vadd.f32 %v4945_v32, %v3220_v57  ;;  %v3469_v0 = vadd.f32 %v4976_v45, %v3356_v13  ;;  %v3306_v31 = vpop.f32.mrb[151].mxu1 }
 0xa75   :  { %v3355_v60 = vadd.f32 %v3306_v31, %v3218_v17  ;;  %v3467_v9 = vadd.f32 %v3416_v46, %v3354_v18  ;;  %v3225_v17 = vadd.f32 %v7096_v49, %v7092_v12 }
 0xa76   :  { %v7159_v30 = vadd.f32 %v4977_v33, %v3357_v14 }
 0xa77   :  { %v7161_v53 = vadd.f32 %v3419_v61, %v3355_v60 }
 0xa78   :  { %v4980_v48 = vpop.f32.mrb[168].mxu0 }
 0xa79   :  { %v4948_v15 = vpop.f32.mrb[152].mxu1  ;;  %v3432_v55 = vpop.f32.mrb[169].mxu0 }
 0xa7a   :  { %v3360_v59 = vadd.f32 %v4948_v15, %v3223_v8  ;;  %v3319_v7 = vpop.f32.mrb[153].mxu1  ;;  %v4981_v58 = vpop.f32.mrb[170].mxu0 }
 0xa7b   :  { %v3358_v62 = vadd.f32 %v3319_v7, %v3221_v54  ;;  %v4949_v45 = vpop.f32.mrb[154].mxu1  ;;  %v3435_v19 = vpop.f32.mrb[171].mxu0 }
 0xa7c   :  { %v3361_v25 = vadd.f32 %v4949_v45, %v3224_v52  ;;  %v3473_v6 = vadd.f32 %v4980_v48, %v3360_v59  ;;  %v3322_v46 = vpop.f32.mrb[155].mxu1 }
 0xa7d   :  { %v3359_v57 = vadd.f32 %v3322_v46, %v3222_v43  ;;  %v3471_v13 = vadd.f32 %v3432_v55, %v3358_v62 }
 0xa7e   :  { %v7171_v20 = vadd.f32 %v4981_v58, %v3361_v25 }
 0xa7f   :  { %v7173_v56 = vadd.f32 %v3435_v19, %v3359_v57 }
 0xa80   :  { %v4984_v33 = vpop.f32.mrb[172].mxu0 }
 0xa81   :  { %v4952_v34 = vpop.f32.mrb[156].mxu1  ;;  %v3448_v18 = vpop.f32.mrb[173].mxu0 }
 0xa82   :  { %v3364_v32 = vadd.f32 %v4952_v34, %v3227_v47  ;;  %v3335_v61 = vpop.f32.mrb[157].mxu1  ;;  %v4985_v14 = vpop.f32.mrb[174].mxu0 }
 0xa83   :  { %v3362_v31 = vadd.f32 %v3335_v61, %v3225_v17  ;;  %v4953_v60 = vpop.f32.mrb[158].mxu1  ;;  %v3451_v8 = vpop.f32.mrb[175].mxu0 }
 0xa84   :  { %v3365_v48 = vadd.f32 %v4953_v60, %v7108_v50  ;;  %v3477_v54 = vadd.f32 %v4984_v33, %v3364_v32  ;;  %v3338_v15 = vpop.f32.mrb[159].mxu1 }
 0xa85   :  { %v3363_v55 = vadd.f32 %v3338_v15, %v7099_v63  ;;  %v7181_v52 = vadd.f32 %v3448_v18, %v3362_v31 }
 0xa86   :  { %v7183_v10 = vadd.f32 %v4985_v14, %v3365_v48 }
 0xa87   :  { %v7185_v59 = vadd.f32 %v3451_v8, %v3363_v55 }
 0xa89   :  { %v5004_v12 = vpop.f32.mrb[160].mxu1 }
 0xa8a   :  { %v3578_v49 = vadd.f32 %v5004_v12, %v7143_v1  ;;  %v3513_v7 = vpop.f32.mrb[161].mxu1 }
 0xa8b   :  { %v3576_v58 = vadd.f32 %v3513_v7, %v7145_v38  ;;  %v5005_v43 = vpop.f32.mrb[162].mxu1 }
 0xa8c   :  { %v3579_v62 = vadd.f32 %v5005_v43, %v7147_v40  ;;  %v3516_v50 = vpop.f32.mrb[163].mxu1  ;;  %v7191_v45 = vadd.f32 %v3578_v49, %v6915_v51 }
 0xa8d   :  { %v3577_v63 = vadd.f32 %v3516_v50, %v7149_v36  ;;  %v7199_v46 = vadd.f32 %v3576_v58, %v6897_v22 }
 0xa8e   :  { %v7195_v19 = vadd.f32 %v3579_v62, %v6911_v26  ;;  %v3610_v25 = vmax.f32 %v7191_v45, 0.0 }
 0xa8f   :  { %v7203_v38 = vadd.f32 %v3577_v63, %v6900_v5  ;;  %v3608_v36 = vmax.f32 %v7199_v46, 0.0 }
 0xa90   :  { %v3611_v1 = vmax.f32 %v7195_v19, 0.0  ;;  %3628 = vadd.xlane.f32.xlu0 %v3610_v25 }
 0xa91   :  { %v5008_v51 = vpop.f32.mrb[164].mxu1  ;;  %v3609_v22 = vmax.f32 %v7203_v38, 0.0 }
 0xa92   :  { %v3582_v40 = vadd.f32 %v5008_v51, %v3469_v0  ;;  %3630 = vadd.xlane.f32.xlu1 %v3611_v1  ;;  %v3529_v26 = vpop.f32.mrb[165].mxu1 }
 0xa93   :  { %v3580_v57 = vadd.f32 %v3529_v26, %v3467_v9  ;;  %v5009_v47 = vpop.f32.mrb[166].mxu1 }
 0xa94   :  { %v3583_v33 = vadd.f32 %v5009_v47, %v7159_v30  ;;  %3624 = vadd.xlane.f32.xlu0 %v3608_v36  ;;  %v3532_v5 = vpop.f32.mrb[167].mxu1  ;;  %v7215_v17 = vadd.f32 %v3582_v40, %v6943_v39 }
 0xa95   :  { %v3581_v0 = vadd.f32 %v3532_v5, %v7161_v53  ;;  %v7225_v18 = vadd.f32 %v3580_v57, %v6929_v37 }
 0xa96   :  { %v7219_v34 = vadd.f32 %v3583_v33, %v6939_v24  ;;  %3626 = vadd.xlane.f32.xlu1 %v3609_v22  ;;  %v3614_v9 = vmax.f32 %v7215_v17, 0.0 }
 0xa97   :  { %v7229_v32 = vadd.f32 %v3581_v0, %v6925_v35  ;;  %v3612_v61 = vmax.f32 %v7225_v18, 0.0 }
 0xa98   :  { %v3615_v30 = vmax.f32 %v7219_v34, 0.0  ;;  %3636 = vadd.xlane.f32.xlu0 %v3614_v9 }
 0xa99   :  { %v5012_v39 = vpop.f32.mrb[168].mxu1  ;;  %v7652_v37 = vmax.f32 %v7229_v32, 0.0  ;;  %v7653_v34 = vmax.f32 %v7229_v32, 0.0 }
 0xa9a   :  { %v3586_v53 = vadd.f32 %v5012_v39, %v3473_v6  ;;  %3638 = vadd.xlane.f32.xlu1 %v3615_v30  ;;  %v3545_v24 = vpop.f32.mrb[169].mxu1 }
 0xa9b   :  { %v3584_v14 = vadd.f32 %v3545_v24, %v3471_v13  ;;  %v5013_v31 = vpop.f32.mrb[170].mxu1 }
 0xa9c   :  { %v3587_v60 = vadd.f32 %v5013_v31, %v7171_v20  ;;  %3632 = vadd.xlane.f32.xlu0 %v3612_v61  ;;  %v3548_v35 = vpop.f32.mrb[171].mxu1  ;;  %v7241_v8 = vadd.f32 %v3586_v53, %v6971_v28 }
 0xa9d   :  { %v3585_v6 = vadd.f32 %v3548_v35, %v7173_v56  ;;  %v7251_v15 = vadd.f32 %v3584_v14, %v6957_v11 }
 0xa9e   :  { %v7245_v48 = vadd.f32 %v3587_v60, %v6967_v21  ;;  %3634 = vadd.xlane.f32.xlu1 %v7652_v37  ;;  %v7651_v13 = vmax.f32 %v7241_v8, 0.0  ;;  %v7654_v18 = vmax.f32 %v7241_v8, 0.0 }
 0xa9f   :  { %v7255_v55 = vadd.f32 %v3585_v6, %v6953_v3  ;;  %v7649_v12 = vmax.f32 %v7251_v15, 0.0  ;;  %v7656_v8 = vmax.f32 %v7251_v15, 0.0 }
 0xaa0   :  { %v7650_v20 = vmax.f32 %v7245_v48, 0.0  ;;  %3644 = vadd.xlane.f32.xlu0 %v7651_v13  ;;  %v7655_v32 = vmax.f32 %v7245_v48, 0.0 }
 0xaa1   :  { %v5016_v28 = vpop.f32.mrb[172].mxu1  ;;  %v7648_v7 = vmax.f32 %v7255_v55, 0.0  ;;  %v7657_v48 = vmax.f32 %v7255_v55, 0.0 }
 0xaa2   :  { %v3590_v56 = vadd.f32 %v5016_v28, %v3477_v54  ;;  %3646 = vadd.xlane.f32.xlu1 %v7650_v20  ;;  %v3561_v21 = vpop.f32.mrb[173].mxu1 }
 0xaa3   :  { %v3588_v49 = vadd.f32 %v3561_v21, %v7181_v52  ;;  %v5017_v11 = vpop.f32.mrb[174].mxu1 }
 0xaa4   :  { %v3591_v58 = vadd.f32 %v5017_v11, %v7183_v10  ;;  %3640 = vadd.xlane.f32.xlu0 %v7649_v12  ;;  %v3564_v3 = vpop.f32.mrb[175].mxu1  ;;  %v7268_v43 = vadd.f32 %v3590_v56, %v6998_v4  ;;  %v7282_v4 = vpop.permute.xlu1 %3900 }
 0xaa5   :  { %v3589_v54 = vadd.f32 %v3564_v3, %v7185_v59  ;;  %v7275_v52 = vadd.f32 %v3588_v49, %v6985_v16  ;;  %vm3945_vm3 = vcmp.eq.s32.totalorder %v7282_v4, 1 }
 0xaa6   :  { %3642 = vadd.xlane.f32.xlu1 %v7648_v7  ;;  %v7647_v62 = vmax.f32 %v7268_v43, 0.0  ;;  %v7297_v40 = vadd.f32 %v3591_v58, %v6995_v27 }
 0xaa7   :  { %v7646_v10 = vmax.f32 %v7275_v52, 0.0  ;;  %v7301_v57 = vadd.f32 %v3589_v54, %v6981_v23  ;;  %v7318_v23 = vpop.permute.xlu0 %3897 }
 0xaa8   :  { %3652 = vadd.xlane.f32.xlu0 %v7647_v62  ;;  %v7285_v59 = vpop.permute.xlu1 %3903  ;;  %v7645_v26 = vmax.f32 %v7297_v40, 0.0  ;;  %vm3944_vm11 = vcmp.eq.s32.totalorder %v7318_v23, 1 }
 0xaa9   :  { %vm3946_vm1 = vcmp.eq.s32.totalorder %v7285_v59, 1 }
 0xaab   :  { %v7322_v39 = vpop.permute.xlu0 %3921 }
 0xaac   :  { %3648 = vadd.xlane.f32.xlu0 %v7646_v10  ;;  %v7287_v50 = vpop.permute.xlu1 %3906 }
 0xaad   :  { %vm3947_vm2 = vcmp.eq.s32.totalorder %v7287_v50, 1 }
 0xaaf   :  { %v7326_v24 = vpop.permute.xlu0 %3930 }
 0xab0   :  { %v7290_v16 = vpop.permute.xlu1 %3909 }
 0xab1   :  { %vm3948_vm10 = vcmp.eq.s32.totalorder %v7290_v16, 1 }
 0xab3   :  { %v7330_v31 = vpop.permute.xlu0 %3933 }
 0xab4   :  { %v7292_v63 = vpop.permute.xlu1 %3912 }
 0xab5   :  { %vm3949_vm13 = vcmp.eq.s32.totalorder %v7292_v63, 1 }
 0xab7   :  { %4036 = vperm.xlu1 %5090, %v7039_v2   ;;  %v7334_v35 = vpop.permute.xlu0 %3942 }
 0xab8   :  { %v7294_v51 = vpop.permute.xlu1 %3915 }
 0xab9   :  { %vm3950_vm4 = vcmp.eq.s32.totalorder %v7294_v51, 1 }
 0xabb   :  { %v7338_v28 = vpop.permute.xlu0 %4003 }
 0xabc   :  { %v7303_v2 = vpop.permute.xlu1 %3918  ;;  %vm4048_vm12 = vcmp.eq.s32.totalorder %v7338_v28, 1 }
 0xabd   :  { %vm3951_vm8 = vcmp.eq.s32.totalorder %v7303_v2, 1 }
 0xabf   :  { %v7342_v21 = vpop.permute.xlu0 %4012 }
 0xac0   :  { %v7308_v47 = vpop.permute.xlu1 %4000  ;;  %vm4051_vm14 = vcmp.eq.s32.totalorder %v7342_v21, 1 }
 0xac1   :  { %vm4047_vm5 = vcmp.eq.s32.totalorder %v7308_v47, 1 }
 0xac2   :  { %4027 = vperm.xlu0 %5089, %v7089_v29   ;;  %v7644_v29 = vmax.f32 %v7301_v57, 0.0 }
 0xac3   :  { %v7346_v11 = vpop.permute.xlu0 %4018 }
 0xac4   :  { %v7312_v33 = vpop.permute.xlu1 %4006 }
 0xac5   :  { %vm4049_vm6 = vcmp.eq.s32.totalorder %v7312_v33, 1 }
 0xac8   :  { %v7314_v27 = vpop.permute.xlu1 %4009 }
 0xac9   :  { %vm4050_vm7 = vcmp.eq.s32.totalorder %v7314_v27, 1 }
 0xacc   :  { %v7316_v5 = vpop.permute.xlu1 %4015 }
 0xacd   :  { %vm4052_vm15 = vcmp.eq.s32.totalorder %v7316_v5, 1 }
 0xad0   :  { %v7320_v0 = vpop.permute.xlu1 %4021 }
 0xad1   :  { %vm4054_vm9 = vcmp.eq.s32.totalorder %v7320_v0, 1 }
 0xad4   :  { %v7324_v53 = vpop.permute.xlu1 %3924 }
 0xad8   :  { %v7328_v14 = vpop.permute.xlu1 %3927 }
 0xadb   :  { %3654 = vadd.xlane.f32.xlu1 %v7645_v26 }
 0xadc   :  { %v7332_v60 = vpop.permute.xlu1 %4024 }
 0xadf   :  { %3650 = vadd.xlane.f32.xlu1 %v7644_v29 }
 0xae0   :  { %v7336_v6 = vpop.permute.xlu1 %4030 }
 0xae4   :  { %v7340_v56 = vpop.permute.xlu1 %4033 }
 0xae8   :  { %v7344_v49 = vpop.permute.xlu1 %3936 }
 0xaec   :  { %v7348_v58 = vpop.permute.xlu1 %3939 }
 0xb1d   :  { %v3629_v3 = vpop.xlane.xlu0 %3628 }
 0xb1e   :  { %v3658_v54 = vmul.f32 0.0078125, %v3629_v3 }
 0xb1f   :  { %v3631_v29 = vpop.xlane.xlu1 %3630 }
 0xb20   :  { %v7352_v26 = vsub.f32 %v3610_v25, %v3658_v54  ;;  %v3659_v10 = vmul.f32 0.0078125, %v3631_v29 }
 0xb21   :  { %v3625_v62 = vpop.xlane.xlu0 %3624 }
 0xb22   :  { %v7356_v7 = vsub.f32 %v3611_v1, %v3659_v10  ;;  %v3656_v12 = vmul.f32 0.0078125, %v3625_v62  ;;  %v3690_v20 = vmul.f32 %v7352_v26, %v7352_v26 }
 0xb23   :  { %v3627_v13 = vpop.xlane.xlu1 %3626 }
 0xb24   :  { %v7362_v37 = vsub.f32 %v3608_v36, %v3656_v12  ;;  %v3657_v3 = vmul.f32 0.0078125, %v3627_v13  ;;  %3708 = vadd.xlane.f32.xlu0 %v3690_v20  ;;  %v3691_v45 = vmul.f32 %v7356_v7, %v7356_v7 }
 0xb25   :  { %v3637_v25 = vpop.xlane.xlu0 %3636 }
 0xb26   :  { %v7368_v19 = vsub.f32 %v3609_v22, %v3657_v3  ;;  %v3662_v1 = vmul.f32 0.0078125, %v3637_v25  ;;  %3710 = vadd.xlane.f32.xlu1 %v3691_v45  ;;  %v3688_v62 = vmul.f32 %v7362_v37, %v7362_v37 }
 0xb27   :  { %v3639_v10 = vpop.xlane.xlu1 %3638 }
 0xb28   :  { %v7374_v46 = vsub.f32 %v3614_v9, %v3662_v1  ;;  %v3663_v36 = vmul.f32 0.0078125, %v3639_v10  ;;  %3704 = vadd.xlane.f32.xlu0 %v3688_v62  ;;  %v3689_v13 = vmul.f32 %v7368_v19, %v7368_v19 }
 0xb29   :  { %v3633_v20 = vpop.xlane.xlu0 %3632 }
 0xb2a   :  { %v7380_v38 = vsub.f32 %v3615_v30, %v3663_v36  ;;  %v3660_v22 = vmul.f32 0.0078125, %v3633_v20  ;;  %3706 = vadd.xlane.f32.xlu1 %v3689_v13  ;;  %v3694_v12 = vmul.f32 %v7374_v46, %v7374_v46 }
 0xb2b   :  { %v3635_v29 = vpop.xlane.xlu1 %3634 }
 0xb2c   :  { %v7386_v17 = vsub.f32 %v3612_v61, %v3660_v22  ;;  %v3661_v9 = vmul.f32 0.0078125, %v3635_v29  ;;  %3716 = vadd.xlane.f32.xlu0 %v3694_v12  ;;  %v3695_v54 = vmul.f32 %v7380_v38, %v7380_v38 }
 0xb2d   :  { %v3645_v3 = vpop.xlane.xlu0 %3644 }
 0xb2e   :  { %v7392_v30 = vsub.f32 %v7653_v34, %v3661_v9  ;;  %v3666_v45 = vmul.f32 0.0078125, %v3645_v3  ;;  %3718 = vadd.xlane.f32.xlu1 %v3695_v54  ;;  %v3692_v25 = vmul.f32 %v7386_v17, %v7386_v17 }
 0xb2f   :  { %v3647_v1 = vpop.xlane.xlu1 %3646 }
 0xb30   :  { %v7398_v61 = vsub.f32 %v7654_v18, %v3666_v45  ;;  %v3667_v62 = vmul.f32 0.0078125, %v3647_v1  ;;  %3712 = vadd.xlane.f32.xlu0 %v3692_v25  ;;  %v3693_v10 = vmul.f32 %v7392_v30, %v7392_v30  ;;  %v7658_v1 = vmax.f32 %v7268_v43, 0.0 }
 0xb31   :  { %v3641_v36 = vpop.xlane.xlu0 %3640 }
 0xb32   :  { %v7404_v13 = vsub.f32 %v7655_v32, %v3667_v62  ;;  %v3664_v20 = vmul.f32 0.0078125, %v3641_v36  ;;  %3714 = vadd.xlane.f32.xlu1 %v3693_v10  ;;  %v3698_v22 = vmul.f32 %v7398_v61, %v7398_v61  ;;  %v7659_v36 = vmax.f32 %v7275_v52, 0.0 }
 0xb33   :  { %v3643_v12 = vpop.xlane.xlu1 %3642 }
 0xb34   :  { %v7410_v29 = vsub.f32 %v7656_v8, %v3664_v20  ;;  %v3665_v9 = vmul.f32 0.0078125, %v3643_v12  ;;  %3724 = vadd.xlane.f32.xlu0 %v3698_v22  ;;  %v3699_v54 = vmul.f32 %v7404_v13, %v7404_v13  ;;  %v7660_v8 = vmax.f32 %v7297_v40, 0.0 }
 0xb35   :  { %v3653_v3 = vpop.xlane.xlu0 %3652  ;;  %v5781_v40 = vmov 0.0  }
 0xb36   :  { %v7416_v34 = vsub.f32 %v7657_v48, %v3665_v9  ;;  %v3670_v45 = vmul.f32 0.0078125, %v3653_v3  ;;  %3726 = vadd.xlane.f32.xlu1 %v3699_v54  ;;  %v3696_v25 = vmul.f32 %v7410_v29, %v7410_v29  ;;  %v7661_v48 = vmax.f32 %v7301_v57, 0.0  ;;  %5018 = vmatprep.subr.bf16.mxu0 %v5781_v40  ;;  %v5277_v57 = vld [vmem:[#allocation17 + $0x10] sm:$0xff]  }
 0xb37   :  { %v7436_v20 = vpop.permute.xlu1 %4036  ;;  %5038 = vmatprep.subr.bf16.mxu1 %v5781_v40  ;;  %5034 = vmatprep.mubr.msk.bf16.mxu0 %vm5782_vm0, %v5781_v40 }
 0xb38   :  { %v7422_v15 = vsub.f32 %v7658_v1, %v3670_v45  ;;  %3720 = vadd.xlane.f32.xlu0 %v3696_v25  ;;  %v3697_v18 = vmul.f32 %v7416_v34, %v7416_v34  ;;  %v5276_v25 = vld [vmem:[#allocation17 + $0x8] sm:$0xff]   ;;  %v5278_v1 = vld [vmem:[#allocation17 + $0x18] sm:$0xff]   ;;  %5054 = vmatprep.mubr.msk.bf16.mxu1 %vm5782_vm0, %v5781_v40  ;;  %vm3954_vm0 = vcmp.eq.s32.totalorder %v7328_v14, 1 }
 0xb39   :  { %v3649_v62 = vpop.xlane.xlu0 %3648 }
 0xb3a   :  { %v3668_v10 = vmul.f32 0.0078125, %v3649_v62  ;;  %3722 = vadd.xlane.f32.xlu1 %v3697_v18  ;;  %v3702_v55 = vmul.f32 %v7422_v15, %v7422_v15  ;;  %v5280_v18 = vld [vmem:[#allocation17 + $0x28] sm:$0xff]   ;;  %v5281_v62 = vld [vmem:[#allocation17 + $0x30] sm:$0xff]  }
 0xb3c   :  { %v7430_v32 = vsub.f32 %v7659_v36, %v3668_v10  ;;  %3732 = vadd.xlane.f32.xlu0 %v3702_v55  ;;  %v5282_v10 = vld [vmem:[#allocation17 + $0x38] sm:$0xff]   ;;  %v5283_v36 = vld [vmem:[#allocation20] sm:$0xff]  }
 0xb3d   :  { %5039 = vmatpush3.bf16.msra.mxu1 %v5283_v36 }
 0xb3e   :  { %v3700_v43 = vmul.f32 %v7430_v32, %v7430_v32  ;;  %5040 = vmatprep.subr.bf16.mxu1 %v5781_v40 }
 0xb40   :  { %3728 = vadd.xlane.f32.xlu0 %v3700_v43  ;;  %v5284_v43 = vld [vmem:[#allocation20 + $0x8] sm:$0xff]  }
 0xb41   :  { %v7459_v55 = vpop.permute.xlu0 %4027  ;;  %5041 = vmatpush3.bf16.msra.mxu1 %v5284_v43 }
 0xb42   :  { %5042 = vmatprep.subr.bf16.mxu1 %v5781_v40 }
 0xb4b   :  { %4042 = vperm.xlu1 %5090, %v7131_v42   ;;  %v5275_v42 = vld [vmem:[#allocation17] sm:$0xff]  }
 0xb4c   :  { %5019 = vmatpush3.bf16.msra.mxu0 %v5275_v42 }
 0xb4d   :  { %5020 = vmatprep.subr.bf16.mxu0 %v5781_v40 }
 0xb50   :  { %5021 = vmatpush3.bf16.msra.mxu0 %v5276_v25 }
 0xb51   :  { %5022 = vmatprep.subr.bf16.mxu0 %v5781_v40 }
 0xb54   :  { %5023 = vmatpush3.bf16.msra.mxu0 %v5277_v57 }
 0xb55   :  { %5024 = vmatprep.subr.bf16.mxu0 %v5781_v40 }
 0xb56   :  { %4039 = vperm.xlu0 %5089, %v7127_v44  }
 0xb58   :  { %5025 = vmatpush3.bf16.msra.mxu0 %v5278_v1 }
 0xb59   :  { %5026 = vmatprep.subr.bf16.mxu0 %v5781_v40 }
 0xb68   :  { %v3655_v22 = vpop.xlane.xlu1 %3654 }
 0xb69   :  { %v3671_v12 = vmul.f32 0.0078125, %v3655_v22 }
 0xb6b   :  { %v7440_v9 = vsub.f32 %v7660_v8, %v3671_v12 }
 0xb6c   :  { %v3651_v52 = vpop.xlane.xlu1 %3650 }
 0xb6d   :  { %v3669_v54 = vmul.f32 0.0078125, %v3651_v52  ;;  %v3703_v3 = vmul.f32 %v7440_v9, %v7440_v9 }
 0xb6f   :  { %v7446_v45 = vsub.f32 %v7661_v48, %v3669_v54  ;;  %3734 = vadd.xlane.f32.xlu1 %v3703_v3  ;;  %v5285_v3 = vld [vmem:[#allocation20 + $0x10] sm:$0xff]  }
 0xb70   :  { %5043 = vmatpush3.bf16.msra.mxu1 %v5285_v3 }
 0xb71   :  { %v3701_v44 = vmul.f32 %v7446_v45, %v7446_v45  ;;  %5044 = vmatprep.subr.bf16.mxu1 %v5781_v40 }
 0xb73   :  { %3730 = vadd.xlane.f32.xlu1 %v3701_v44 }
 0xb84   :  { %4045 = vperm.xlu1 %5090, %v7051_v41   ;;  %v5279_v41 = vld [vmem:[#allocation17 + $0x20] sm:$0xff]  }
 0xb85   :  { %5027 = vmatpush3.bf16.msra.mxu0 %v5279_v41  ;;  %v5286_v41 = vld [vmem:[#allocation20 + $0x18] sm:$0xff]  }
 0xb86   :  { %5028 = vmatprep.subr.bf16.mxu0 %v5781_v40  ;;  %5045 = vmatpush3.bf16.msra.mxu1 %v5286_v41 }
 0xb87   :  { %5046 = vmatprep.subr.bf16.mxu1 %v5781_v40 }
 0xb89   :  { %5029 = vmatpush3.bf16.msra.mxu0 %v5280_v18 }
 0xb8a   :  { %5030 = vmatprep.subr.bf16.mxu0 %v5781_v40 }
 0xb8d   :  { %5031 = vmatpush3.bf16.msra.mxu0 %v5281_v62 }
 0xb8e   :  { %5032 = vmatprep.subr.bf16.mxu0 %v5781_v40 }
 0xb91   :  { %5033 = vmatpush3.bf16.msra.mxu0 %v5282_v10 }
 0xbb1   :  { %v3709_v22 = vpop.xlane.xlu0 %3708 }
 0xbb2   :  { %v3738_v12 = vmul.f32 0.0078125, %v3709_v22 }
 0xbb3   :  { %v3711_v8 = vpop.xlane.xlu1 %3710 }
 0xbb4   :  { %v3754_v52 = vadd.f32 1e-05, %v3738_v12  ;;  %v3739_v54 = vmul.f32 0.0078125, %v3711_v8  ;;  %v5287_v12 = vld [vmem:[#allocation20 + $0x20] sm:$0xff]  }
 0xbb5   :  { %v3705_v48 = vpop.xlane.xlu0 %3704  ;;  %5047 = vmatpush3.bf16.msra.mxu1 %v5287_v12 }
 0xbb6   :  { %5355 = vrsqrt.f32 %v3754_v52  ;;  %v3755_v44 = vadd.f32 1e-05, %v3739_v54  ;;  %v3736_v42 = vmul.f32 0.0078125, %v3705_v48  ;;  %5048 = vmatprep.subr.bf16.mxu1 %v5781_v40 }
 0xbb7   :  { %v3707_v25 = vpop.xlane.xlu1 %3706 }
 0xbb8   :  { %5357 = vrsqrt.f32 %v3755_v44  ;;  %v3752_v57 = vadd.f32 1e-05, %v3736_v42  ;;  %v3737_v1 = vmul.f32 0.0078125, %v3707_v25  ;;  %v5288_v25 = vld [vmem:[#allocation20 + $0x28] sm:$0xff]  }
 0xbb9   :  { %v3717_v18 = vpop.xlane.xlu0 %3716  ;;  %5049 = vmatpush3.bf16.msra.mxu1 %v5288_v25 }
 0xbba   :  { %5359 = vrsqrt.f32 %v3752_v57  ;;  %v3753_v62 = vadd.f32 1e-05, %v3737_v1  ;;  %v3742_v10 = vmul.f32 0.0078125, %v3717_v18  ;;  %v7469_v1 = vld [vmem:[#allocation14 + $0x2] ss:$0 sm:$0xff]  ;;  %5050 = vmatprep.subr.bf16.mxu1 %v5781_v40 }
 0xbbb   :  { %v3719_v36 = vpop.xlane.xlu1 %3718 }
 0xbbc   :  { %5361 = vrsqrt.f32 %v3753_v62  ;;  %v3758_v43 = vadd.f32 1e-05, %v3742_v10  ;;  %v3743_v22 = vmul.f32 0.0078125, %v3719_v36 }
 0xbbd   :  { %v3713_v8 = vpop.xlane.xlu0 %3712 }
 0xbbe   :  { %5363 = vrsqrt.f32 %v3758_v43  ;;  %v3759_v52 = vadd.f32 1e-05, %v3743_v22  ;;  %v3740_v54 = vmul.f32 0.0078125, %v3713_v8 }
 0xbbf   :  { %v3715_v3 = vpop.xlane.xlu1 %3714 }
 0xbc0   :  { %v5356_v48 = vpop.eup %5355  ;;  %5365 = vrsqrt.f32 %v3759_v52  ;;  %v3756_v44 = vadd.f32 1e-05, %v3740_v54  ;;  %v3741_v42 = vmul.f32 0.0078125, %v3715_v3 }
 0xbc1   :  { %v3786_v57 = vmul.f32 %v5356_v48, %v7352_v26  ;;  %v3725_v18 = vpop.xlane.xlu0 %3724  ;;  %v7476_v26 = vld [vmem:[#allocation16 + $0x2] ss:$0 sm:$0xff] }
 0xbc2   :  { %v5358_v41 = vpop.eup %5357  ;;  %5367 = vrsqrt.f32 %v3756_v44  ;;  %v3757_v62 = vadd.f32 1e-05, %v3741_v42  ;;  %v3746_v10 = vmul.f32 0.0078125, %v3725_v18 }
 0xbc3   :  { %v3787_v36 = vmul.f32 %v5358_v41, %v7356_v7  ;;  %v3727_v43 = vpop.xlane.xlu1 %3726  ;;  %v3810_v12 = vmul.f32 %v7469_v1, %v3786_v57 }
 0xbc4   :  { %v5360_v22 = vpop.eup %5359  ;;  %5369 = vrsqrt.f32 %v3757_v62  ;;  %v3762_v8 = vadd.f32 1e-05, %v3746_v10  ;;  %v3747_v52 = vmul.f32 0.0078125, %v3727_v43 }
 0xbc5   :  { %v3784_v54 = vmul.f32 %v5360_v22, %v7362_v37  ;;  %v3721_v3 = vpop.xlane.xlu0 %3720  ;;  %v3811_v48 = vmul.f32 %v7469_v1, %v3787_v36  ;;  %v3834_v10 = vadd.f32 %v7476_v26, %v3810_v12 }
 0xbc6   :  { %v5362_v7 = vpop.eup %5361  ;;  %5371 = vrsqrt.f32 %v3762_v8  ;;  %v3763_v44 = vadd.f32 1e-05, %v3747_v52  ;;  %v3744_v42 = vmul.f32 0.0078125, %v3721_v3 }
 0xbc7   :  { %v3808_v25 = vmul.f32 %v7469_v1, %v3784_v54  ;;  %v3785_v37 = vmul.f32 %v5362_v7, %v7368_v19  ;;  %v3723_v57 = vpop.xlane.xlu1 %3722  ;;  %v3835_v19 = vadd.f32 %v7476_v26, %v3811_v48  ;;  %v3962_v48 = vsel %vm3946_vm1, %v3834_v10, -1e+09 }
 0xbc8   :  { %v5364_v18 = vpop.eup %5363  ;;  %5373 = vrsqrt.f32 %v3763_v44  ;;  %v3760_v41 = vadd.f32 1e-05, %v3744_v42  ;;  %v3745_v62 = vmul.f32 0.0078125, %v3723_v57  ;;  %v4065_v44 = vsel %vm4049_vm6, %v3834_v10, -1e+09 }
 0xbc9   :  { %v3809_v36 = vmul.f32 %v7469_v1, %v3785_v37  ;;  %v3790_v43 = vmul.f32 %v5364_v18, %v7374_v46  ;;  %v7493_v22 = vpop.xlane.xlu0 %3732  ;;  %v3832_v52 = vadd.f32 %v7476_v26, %v3808_v25  ;;  %v7515_v57 = vsel %vm3947_vm2, %v3835_v19, -1e+09 }
 0xbca   :  { %v5366_v8 = vpop.eup %5365  ;;  %5375 = vrsqrt.f32 %v3760_v41  ;;  %v3761_v12 = vadd.f32 1e-05, %v3745_v62  ;;  %vm4057_vm1 = vcmp.eq.s32.totalorder %v7336_v6, 1  ;;  %vm4053_vm6 = vcmp.eq.s32.totalorder %v7346_v11, 1 }
 0xbcb   :  { %v3833_v54 = vadd.f32 %v7476_v26, %v3809_v36  ;;  %v3791_v3 = vmul.f32 %v5366_v8, %v7380_v38  ;;  %v3814_v46 = vmul.f32 %v7469_v1, %v3790_v43  ;;  %v3960_v59 = vsel %vm3944_vm11, %v3832_v52, -1e+09 }
 0xbcc   :  { %v5368_v7 = vpop.eup %5367  ;;  %5377 = vrsqrt.f32 %v3761_v12  ;;  %vm4058_vm2 = vcmp.eq.s32.totalorder %v7340_v56, 1 }
 0xbcd   :  { %v3788_v42 = vmul.f32 %v5368_v7, %v7386_v17  ;;  %v3838_v38 = vadd.f32 %v7476_v26, %v3814_v46  ;;  %v3729_v25 = vpop.xlane.xlu0 %3728  ;;  %v3815_v37 = vmul.f32 %v7469_v1, %v3791_v3  ;;  %v7524_v17 = vsel %vm4047_vm5, %v3832_v52, -1e+09 }
 0xbce   :  { %v5370_v18 = vpop.eup %5369  ;;  %v3748_v33 = vmul.f32 0.0078125, %v3729_v25  ;;  %v7528_v50 = vsel %vm3945_vm3, %v3833_v54, -1e+09  ;;  %v7537_v47 = vsel %vm4048_vm12, %v3833_v54, -1e+09  ;;  %vm3955_vm3 = vcmp.eq.s32.totalorder %v7326_v24, 1 }
 0xbcf   :  { %v3812_v41 = vmul.f32 %v7469_v1, %v3788_v42  ;;  %v3789_v62 = vmul.f32 %v5370_v18, %v7392_v30  ;;  %v3966_v10 = vsel %vm3950_vm4, %v3838_v38, -1e+09  ;;  %v3839_v8 = vadd.f32 %v7476_v26, %v3815_v37 }
 0xbd0   :  { %v5372_v36 = vpop.eup %5371  ;;  %v3978_v43 = vmax.f32 %v3962_v48, %v3966_v10  ;;  %v3764_v23 = vadd.f32 1e-05, %v3748_v33  ;;  %v4066_v30 = vsel %vm4050_vm7, %v3835_v19, -1e+09  ;;  %v4069_v3 = vsel %vm4053_vm6, %v3838_v38, -1e+09 }
 0xbd1   :  { %v3836_v4 = vadd.f32 %v7476_v26, %v3812_v41  ;;  %v3813_v52 = vmul.f32 %v7469_v1, %v3789_v62  ;;  %v3794_v12 = vmul.f32 %v5372_v36, %v7398_v61  ;;  %v3967_v46 = vsel %vm3951_vm8, %v3839_v8, -1e+09 }
 0xbd2   :  { %v5374_v51 = vpop.eup %5373  ;;  %5379 = vrsqrt.f32 %v3764_v23  ;;  %v4070_v28 = vsel %vm4054_vm9, %v3839_v8, -1e+09  ;;  %v3979_v11 = vmax.f32 %v7515_v57, %v3967_v46  ;;  %v4081_v18 = vmax.f32 %v4065_v44, %v4069_v3 }
 0xbd3   :  { %v3964_v54 = vsel %vm3948_vm10, %v3836_v4, -1e+09  ;;  %v3837_v7 = vadd.f32 %v7476_v26, %v3813_v52  ;;  %v3818_v61 = vmul.f32 %v7469_v1, %v3794_v12  ;;  %v3795_v27 = vmul.f32 %v5374_v51, %v7404_v13 }
 0xbd4   :  { %v5376_v19 = vpop.eup %5375  ;;  %v3976_v48 = vmax.f32 %v3960_v59, %v3964_v54  ;;  %v4067_v2 = vsel %vm4051_vm14, %v3836_v4, -1e+09  ;;  %v4082_v42 = vmax.f32 %v4066_v30, %v4070_v28  ;;  %vm3952_vm4 = vcmp.eq.s32.totalorder %v7322_v39, 1 }
 0xbd5   :  { %v3965_v0 = vsel %vm3949_vm13, %v3837_v7, -1e+09  ;;  %v3792_v16 = vmul.f32 %v5376_v19, %v7410_v29  ;;  %v3842_v38 = vadd.f32 %v7476_v26, %v3818_v61  ;;  %v3819_v25 = vmul.f32 %v7469_v1, %v3795_v27 }
 0xbd6   :  { %v5378_v37 = vpop.eup %5377  ;;  %v3977_v13 = vmax.f32 %v7528_v50, %v3965_v0  ;;  %v7566_v57 = vsel %vm4052_vm15, %v3837_v7, -1e+09  ;;  %v4079_v21 = vmax.f32 %v7524_v17, %v4067_v2  ;;  %vm4055_vm5 = vcmp.eq.s32.totalorder %v7332_v60, 1 }
 0xbd7   :  { %v3816_v59 = vmul.f32 %v7469_v1, %v3792_v16  ;;  %v3793_v63 = vmul.f32 %v5378_v37, %v7416_v34  ;;  %v3970_v29 = vsel %vm3954_vm0, %v3842_v38, -1e+09  ;;  %v4073_v33 = vsel %vm4057_vm1, %v3842_v38, -1e+09 }
 0xbd8   :  { %v7575_v41 = vmax.f32 %v3978_v43, %v3970_v29  ;;  %v7577_v44 = vmax.f32 %v4081_v18, %v4073_v33  ;;  %v3843_v5 = vadd.f32 %v7476_v26, %v3819_v25  ;;  %v4080_v50 = vmax.f32 %v7537_v47, %v7566_v57 }
 0xbd9   :  { %v3817_v34 = vmul.f32 %v7469_v1, %v3793_v63  ;;  %v3840_v14 = vadd.f32 %v7476_v26, %v3816_v59  ;;  %vm3953_vm7 = vcmp.eq.s32.totalorder %v7324_v53, 1  ;;  %vm3956_vm8 = vcmp.eq.s32.totalorder %v7330_v31, 1 }
 0xbda   :  { %v3971_v6 = vsel %vm3955_vm3, %v3843_v5, -1e+09  ;;  %v4074_v17 = vsel %vm4058_vm2, %v3843_v5, -1e+09  ;;  %vm4059_vm9 = vcmp.eq.s32.totalorder %v7436_v20, 1  ;;  %v3750_v46 = vmul.f32 0.0078125, %v7493_v22 }
 0xbdb   :  { %v3841_v62 = vadd.f32 %v7476_v26, %v3817_v34  ;;  %v3968_v10 = vsel %vm3952_vm4, %v3840_v14, -1e+09  ;;  %v3983_v36 = vmax.f32 %v3979_v11, %v3971_v6  ;;  %v4071_v24 = vsel %vm4055_vm5, %v3840_v14, -1e+09 }
 0xbdc   :  { %v5380_v43 = vpop.eup %5379  ;;  %v7590_v56 = vmax.f32 %v3976_v48, %v3968_v10  ;;  %v4086_v23 = vmax.f32 %v4082_v42, %v4074_v17  ;;  %v4083_v39 = vmax.f32 %v4079_v21, %v4071_v24  ;;  %v3766_v28 = vadd.f32 1e-05, %v3750_v46 }
 0xbdd   :  { %v3796_v8 = vmul.f32 %v5380_v43, %v7430_v32  ;;  %v3969_v4 = vsel %vm3953_vm7, %v3841_v62, -1e+09  ;;  %v4043_v32 = vpop.permute.xlu1 %4042  ;;  %vm3958_vm10 = vcmp.eq.s32.totalorder %v7348_v58, 1  ;;  %vm3959_vm12 = vcmp.eq.s32.totalorder %v7334_v35, 1 }
 0xbde   :  { %v3981_v52 = vmax.f32 %v3977_v13, %v3969_v4  ;;  %5381 = vrsqrt.f32 %v3766_v28  ;;  %vm4061_vm11 = vcmp.eq.s32.totalorder %v4043_v32, 1  ;;  %vm4056_vm13 = vcmp.eq.s32.totalorder %v7459_v55, 1  ;;  %v4040_v13 = vpop.permute.xlu0 %4039 }
 0xbdf   :  { %v3820_v12 = vmul.f32 %v7469_v1, %v3796_v8  ;;  %v4072_v59 = vsel %vm4056_vm13, %v3841_v62, -1e+09  ;;  %vm3957_vm15 = vcmp.eq.s32.totalorder %v7344_v49, 1  ;;  %vm4060_vm0 = vcmp.eq.s32.totalorder %v4040_v13, 1 }
 0xbe0   :  { %v4084_v55 = vmax.f32 %v4080_v50, %v4072_v59  ;;  %vm4102_vm1 = vcmask 1040384   ;;  %vm4104_vm6 = vcmask 1041408  }
 0xbe1   :  { %v3844_v60 = vadd.f32 %v7476_v26, %v3820_v12  ;;  %vm4508_vm4 = vmpackc.low %vm4104_vm6, %vm4104_vm6 }
 0xbe3   :  { %v3972_v30 = vsel %vm3956_vm8, %v3844_v60, -1e+09  ;;  %v4075_v51 = vsel %vm4059_vm9, %v3844_v60, -1e+09 }
 0xbe4   :  { %v3984_v53 = vmax.f32 %v7590_v56, %v3972_v30  ;;  %v4087_v3 = vmax.f32 %v4083_v39, %v4075_v51  ;;  %v5289_v30 = vld [vmem:[#allocation20 + $0x30] sm:$0xff]   ;;  %v5290_v51 = vld [vmem:[#allocation20 + $0x38] sm:$0xff]  }
 0xbe5   :  { %5051 = vmatpush3.bf16.msra.mxu1 %v5289_v30 }
 0xbe6   :  { %5052 = vmatprep.subr.bf16.mxu1 %v5781_v40 }
 0xbe8   :  { %v5382_v19 = vpop.eup %5381 }
 0xbe9   :  { %v3798_v20 = vmul.f32 %v5382_v19, %v7422_v15  ;;  %5053 = vmatpush3.bf16.msra.mxu1 %v5290_v51 }
 0xbeb   :  { %v3822_v11 = vmul.f32 %v7469_v1, %v3798_v20 }
 0xbed   :  { %v3846_v42 = vadd.f32 %v7476_v26, %v3822_v11 }
 0xbef   :  { %v3974_v25 = vsel %vm3958_vm10, %v3846_v42, -1e+09  ;;  %v4077_v37 = vsel %vm4061_vm11, %v3846_v42, -1e+09 }
 0xbf0   :  { %v3986_v58 = vmax.f32 %v7575_v41, %v3974_v25  ;;  %v4089_v29 = vmax.f32 %v7577_v44, %v4077_v37 }
 0xbfc   :  { %v3735_v54 = vpop.xlane.xlu1 %3734 }
 0xbfd   :  { %v3751_v7 = vmul.f32 0.0078125, %v3735_v54 }
 0xbff   :  { %v3767_v61 = vadd.f32 1e-05, %v3751_v7 }
 0xc00   :  { %v3731_v27 = vpop.xlane.xlu1 %3730 }
 0xc01   :  { %5383 = vrsqrt.f32 %v3767_v61  ;;  %v3749_v48 = vmul.f32 0.0078125, %v3731_v27  ;;  %v4511_v27 = vld [vmem:[#allocation22] ss:$0 sm:$0xff] }
 0xc03   :  { %v3765_v31 = vadd.f32 1e-05, %v3749_v48 }
 0xc04   :  { %v4046_v16 = vpop.permute.xlu1 %4045 }
 0xc05   :  { %5385 = vrsqrt.f32 %v3765_v31  ;;  %vm4062_vm14 = vcmp.eq.s32.totalorder %v4046_v16, 1 }
 0xc0b   :  { %v5384_v2 = vpop.eup %5383 }
 0xc0c   :  { %v3799_v22 = vmul.f32 %v5384_v2, %v7440_v9 }
 0xc0e   :  { %v3823_v0 = vmul.f32 %v7469_v1, %v3799_v22 }
 0xc0f   :  { %v5386_v38 = vpop.eup %5385 }
 0xc10   :  { %v3797_v18 = vmul.f32 %v5386_v38, %v7446_v45  ;;  %v3847_v15 = vadd.f32 %v7476_v26, %v3823_v0 }
 0xc12   :  { %v3821_v9 = vmul.f32 %v7469_v1, %v3797_v18  ;;  %v3975_v21 = vsel %vm3959_vm12, %v3847_v15, -1e+09  ;;  %v4078_v63 = vsel %vm4062_vm14, %v3847_v15, -1e+09 }
 0xc13   :  { %v3987_v33 = vmax.f32 %v3983_v36, %v3975_v21  ;;  %v4090_v5 = vmax.f32 %v4086_v23, %v4078_v63 }
 0xc14   :  { %v3845_v45 = vadd.f32 %v7476_v26, %v3821_v9 }
 0xc15   :  { %v3989_v35 = vmax.f32 %v3986_v58, %v3987_v33  ;;  %v4092_v1 = vmax.f32 %v4089_v29, %v4090_v5 }
 0xc16   :  { %v3973_v34 = vsel %vm3957_vm15, %v3845_v45, -1e+09  ;;  %v4076_v14 = vsel %vm4060_vm0, %v3845_v45, -1e+09 }
 0xc17   :  { %v3985_v6 = vmax.f32 %v3981_v52, %v3973_v34  ;;  %v4088_v17 = vmax.f32 %v4084_v55, %v4076_v14 }
 0xc19   :  { %v3988_v41 = vmax.f32 %v3984_v53, %v3985_v6  ;;  %v4091_v62 = vmax.f32 %v4087_v3, %v4088_v17  ;;  %v4499_v53 = vld [vmem:[#allocation19] ss:$0 sm:$0xff] }
 0xc1b   :  { %v3990_v44 = vmax.f32 %v3988_v41, %v3989_v35  ;;  %v4093_v10 = vmax.f32 %v4091_v62, %v4092_v1 }
 0xc1d   :  { %v3991_v36 = vrot.slane %v3990_v44, 4  ;;  %v4094_v43 = vrot.slane %v4093_v10, 4 }
 0xc1f   :  { %v3992_v49 = vmax.f32 %v3990_v44, %v3991_v36  ;;  %v4095_v56 = vmax.f32 %v4093_v10, %v4094_v43 }
 0xc21   :  { %v3993_v26 = vrot.slane %v3992_v49, 2  ;;  %v4096_v24 = vrot.slane %v4095_v56, 2 }
 0xc23   :  { %v3994_v23 = vmax.f32 %v3992_v49, %v3993_v26  ;;  %v4097_v8 = vmax.f32 %v4095_v56, %v4096_v24 }
 0xc25   :  { %v3995_v4 = vrot.slane %v3994_v23, 1  ;;  %v4098_v47 = vrot.slane %v4097_v8, 1 }
 0xc27   :  { %v3996_v57 = vmax.f32 %v3994_v23, %v3995_v4  ;;  %v4099_v50 = vmax.f32 %v4097_v8, %v4098_v47 }
 0xc29   :  { %vm3997_vm2 = vcmp.gt.f32.partialorder %v3996_v57, -5e+08  ;;  %vm4100_vm3 = vcmp.gt.f32.partialorder %v4099_v50, -5e+08 }
 0xc2a   :  { %v3998_v52 = vsel %vm3997_vm2, %v3996_v57, 0.0  ;;  %v4101_v39 = vsel %vm4100_vm3, %v4099_v50, 0.0 }
 0xc2b   :  { %v4103_v12 = vsel %vm4102_vm1, %v3998_v52, %v4101_v39 }
 0xc2c   :  { %v4509_v60 = vpack.c.bf16 %v4103_v12, %v4103_v12 }
 0xc2e   :  { %5035 = vmatmul.mubr.msk.bf16.vlgmr.msra.gmra.mrb[176].mxu0 %vm4508_vm4, %v4509_v60 }
 0xd01   :  { %v4212_v3 = vpop.f32.mrb[176].mxu0 }
 0xd02   :  { %v4213_v46 = vadd.f32 %v4499_v53, %v4212_v3  ;;  %v5036_v28 = vpop.f32.mrb[177].mxu0 }
 0xd03   :  { %v4215_v32 = vpop.f32.mrb[178].mxu0 }
 0xd04   :  { %v4218_v54 = vmax.f32 %v4213_v46, 0.0  ;;  %v5037_v7 = vpop.f32.mrb[179].mxu0 }
 0xd06   :  { %v4219_v61 = vpack.c.bf16 %v4218_v54, %v4218_v54 }
 0xd08   :  { %5055 = vmatmul.mubr.bf16.vlgmr.msra.gmra.mrb[176].mxu1 %v4219_v61 }
 0xddb   :  { %v4325_v19 = vpop.f32.mrb[176].mxu1 }
 0xddc   :  { %v4326_v48 = vadd.f32 %v4511_v27, %v4325_v19  ;;  %v5056_v31 = vpop.f32.mrb[177].mxu1 }
 0xddd   :  { %v4328_v20 = vpop.f32.mrb[178].mxu1 }
 0xdde   :  { %4331 = vst [vmem:[#allocation23] sm:$0xff] %v4326_v48  ;;  %v5057_v40 = vpop.f32.mrb[179].mxu1 }
 0xddf   :  { %5732 = shalt.err (!%p5729_p10)
}
 0xde0   :  { %s5733_s17 = scalar_lea.hbm %s7643_s13, 128 }
 0xde1   :  { %p5734_p11 = scmp.ne.s32.totalorder %s7643_s13, %s5733_s17  ;;  %p5737_p12 = scmp.lt.u32.totalorder %s5733_s17, %s7643_s13 }
 0xde3   :  { %p5739_p13 = pnand %p5737_p12, %p5734_p11 }
 0xde5   :  { %5742 = shalt.err (!%p5739_p13)
}
 0xde6   :  { %4341 = dma.vmem_to_hbm [thread:$0]  %s4339_s22, 128, %s7643_s13, [#allocation4]  }
 0xde7   :  { %5757 = dma.done.wait [#allocation4], 128  }
 0xde8   :  { %5758 = vsyncadd [#allocation4], 4294967168 }
 0xde9   :  { %4345 = vsyncpa [#allocation3], 1 }
 0xdea   :  { %4346 = vsyncpa [#allocation6], 1 }
 0xdeb   :  { %4347 = vsyncpa [#allocation9], 1 }
 0xdec   :  { %4348 = vsyncpa [#allocation12], 1 }
 0xded   :  { %4349 = vsyncpa [#allocation15], 1 }
 0xdee   :  { %4350 = vsyncpa [#allocation18], 1 }
 0xdef   :  { %4351 = vsyncpa [#allocation21], 1 }
 0xdf0   :  { %4352 = vsyncpa [#allocation4], 1 }

</bundles_post_ra>
